<compile_context>
chip_gen: v7x
topology: tpu7x:2x2x1
jax: 0.10.0
libtpu: 0.0.40
codegen_flags: <defaults>
</compile_context>

<pallas_src>
import functools

import jax
import jax.numpy as jnp
from jax.experimental import pallas as pl
from jax.experimental.pallas import tpu as pltpu

# ----------------------------- config (AttentionConfig stand-in) -------------
EXPERT_NUM = 4
SHARE_NUM = 1
TOP_K = 2

B, S = 2, 8                       # batch, seq
IN_F, OUT_F, HID = 128, 128, 128  # lane-dense feature dims (multiples of 128)


# ----------------------------- helpers ----------------------------------------
def _round_up(x, m):
    return ((x + m - 1) // m) * m


def _choose_token_tile(n, cap=512):
    """Token tile >=128 rows; pad n up to the tile instead of shrinking it."""
    tm = min(cap, _round_up(max(n, 128), 128))
    return tm, _round_up(n, tm)


def _pick_elementwise_dtype():
    """bf16 VPU exists on v6e/v7x; keep f32 elsewhere (v5e has no bf16 VPU)."""
    try:
        kind = jax.devices()[0].device_kind.lower()
    except Exception:
        kind = ""
    return jnp.bfloat16 if ("v6" in kind or "v7" in kind) else jnp.float32


def _estimate_vmem_bytes(tm, in_f, out_f, eh, gate_cols, elem_dtype,
                         single_buffer_weights):
    eb = jnp.dtype(elem_dtype).itemsize
    weights = (in_f * gate_cols * 4 + gate_cols * 4          # gate W / b (f32)
               + in_f * eh * 2 + eh * eb                     # W1 (bf16), b1
               + eh * out_f * 2                              # W2 (bf16)
               + gate_cols * out_f * 4 + out_f * 4)          # b2 routed / share
    wbuf = 1 if single_buffer_weights else 2
    x_bytes = 2 * tm * in_f * 4                              # double-buffered x tile
    out_bytes = 2 * tm * (out_f + gate_cols) * 4             # double-buffered outputs
    inter = tm * eh * (4 + 2 + eb) + 4 * tm * gate_cols * 4  # h/hw + gate temps
    return wbuf * weights + x_bytes + out_bytes + inter


# ----------------------------- fused MoE kernel ------------------------------
def moe_fused_kernel(x_ref, wg_ref, bg_ref, w1_ref, b1_ref, w2_ref,
                     b2r_ref, b2s_ref, out_ref, ew_ref, *,
                     expert_num, top_k, hid, compute_dtype, elem_dtype):
    x = x_ref[...]                                           # (tm, IN), f32

    # ---- gate: exact f32 logits -> softmax over the lane-padded expert axis.
    # Padded columns have bias -1e30 -> exp underflows to exactly 0, so the
    # softmax over the real experts matches jax.nn.softmax bit-for-bit.
    logits = jnp.dot(x, wg_ref[...],
                     preferred_element_type=jnp.float32) + bg_ref[...]
    m = logits.max(axis=-1, keepdims=True)
    e = jnp.exp(logits - m)
    ew = e / e.sum(axis=-1, keepdims=True)                   # (tm, GATE_COLS)
    ew_ref[...] = ew.astype(ew_ref.dtype)                    # lane-dense store

    # ---- dense top-k routing weights (same tie-break as lax.top_k).
    gate_cols = ew.shape[-1]
    col = jax.lax.broadcasted_iota(jnp.int32, ew.shape, 1).astype(jnp.float32)
    remaining = ew
    route = jnp.zeros_like(ew)
    for _ in range(top_k):                                   # static unroll (tiny k)
        mx = remaining.max(axis=-1, keepdims=True)
        is_max = remaining == mx
        sel_col = jnp.min(jnp.where(is_max, col, float(gate_cols)),
                          axis=-1, keepdims=True)            # lowest index among maxima
        sel = col == sel_col
        route = jnp.where(sel, ew, route)
        remaining = jnp.where(sel, -jnp.inf, remaining)
    route = route / route.sum(axis=-1, keepdims=True)        # renormalized top-k

    # ---- all expert MLPs in one pair of lane-dense MXU contractions.
    xb = x.astype(compute_dtype)
    h = jnp.dot(xb, w1_ref[...],
                preferred_element_type=jnp.float32)          # (tm, E_tot*HID), f32 acc
    h = jnp.maximum(h.astype(elem_dtype) + b1_ref[...], 0.0)  # bias + ReLU (VPU dtype)

    # Fold route weight in per 128-lane expert block (no (tm, eh) scale matmul);
    # share-expert blocks keep an implicit scale of 1.
    blocks = []
    for eix in range(expert_num):
        w_e = route[:, eix:eix + 1].astype(elem_dtype)       # (tm, 1)
        blocks.append(h[:, eix * hid:(eix + 1) * hid] * w_e)
    if h.shape[-1] > expert_num * hid:                       # share experts
        blocks.append(h[:, expert_num * hid:])
    hw = jnp.concatenate(blocks, axis=-1).astype(compute_dtype)   # (tm, E_tot*HID)

    y = jnp.dot(hw, w2_ref[...], preferred_element_type=jnp.float32)   # (tm, OUT)
    y = y + jnp.dot(route, b2r_ref[...],
                    preferred_element_type=jnp.float32) + b2s_ref[...]
    out_ref[...] = y.astype(out_ref.dtype)


# ----------------------------- full forward -----------------------------------
def sparse_moe_forward(x, params, *, expert_num, share_num, top_k,
                       compute_dtype=jnp.bfloat16, elementwise_dtype=None):
    if top_k > expert_num:
        raise ValueError("top_k must be <= expert_num")
    elem_dtype = (_pick_elementwise_dtype() if elementwise_dtype is None
                  else elementwise_dtype)

    b, s, in_f = x.shape
    n = b * s
    w1, b1, w2, b2 = params["w1"], params["b1"], params["w2"], params["b2"]
    e_tot, _, hid = w1.shape
    out_f = w2.shape[-1]
    eh = e_tot * hid
    gate_cols = _round_up(expert_num, 128)    # lane-dense gate / ew / route width

    # Expert stacks flattened along the lane axis (shared, VMEM-resident).
    w1_flat = jnp.transpose(w1, (1, 0, 2)).reshape(in_f, eh).astype(compute_dtype)
    b1_flat = b1.reshape(1, eh).astype(elem_dtype)
    w2_flat = w2.reshape(eh, out_f).astype(compute_dtype)
    b2_routed = jnp.zeros((gate_cols, out_f), jnp.float32).at[:expert_num].set(
        b2[:expert_num].reshape(expert_num, out_f).astype(jnp.float32))
    b2_share = b2[expert_num:].reshape(share_num, out_f).sum(
        axis=0, keepdims=True).astype(jnp.float32)

    # Gate weights padded to a lane-dense 128-wide expert axis.
    wg_pad = jnp.zeros((in_f, gate_cols), jnp.float32).at[:, :expert_num].set(
        params["wg"].astype(jnp.float32))
    bg_pad = jnp.full((1, gate_cols), -1e30, jnp.float32).at[0, :expert_num].set(
        params["bg"].astype(jnp.float32))

    # Big token tile (>=128 rows); pad the token axis up to the tile.
    tm, n_pad = _choose_token_tile(n)
    flat_x = x.reshape(n, in_f).astype(jnp.float32)
    if n_pad != n:
        flat_x = jnp.pad(flat_x, ((0, n_pad - n), (0, 0)))
    grid = (n_pad // tm,)

    kernel = functools.partial(
        moe_fused_kernel, expert_num=expert_num, top_k=top_k, hid=hid,
        compute_dtype=compute_dtype, elem_dtype=elem_dtype)

    def build_call(single_buffer_weights):
        def const_spec(shape):
            # Constant-index weight blocks: request single buffering so the
            # resident stack isn't doubled (matters on v7x's 64 MiB VMEM).
            if single_buffer_weights:
                return pl.BlockSpec(shape, lambda i: (0, 0),
                                    pipeline_mode=pl.Buffered(1))
            return pl.BlockSpec(shape, lambda i: (0, 0))

        vmem_bytes = _estimate_vmem_bytes(tm, in_f, out_f, eh, gate_cols,
                                          elem_dtype, single_buffer_weights)
        vmem_limit = int(min(max(2 * vmem_bytes, 32 * 1024 * 1024),
                             64 * 1024 * 1024))

        return pl.pallas_call(
            kernel,
            out_shape=(jax.ShapeDtypeStruct((n_pad, out_f), x.dtype),
                       jax.ShapeDtypeStruct((n_pad, gate_cols), jnp.float32)),
            grid=grid,
            in_specs=[
                pl.BlockSpec((tm, in_f), lambda i: (i, 0)),   # x tile
                const_spec((in_f, gate_cols)),                # gate W (padded)
                const_spec((1, gate_cols)),                   # gate b (padded)
                const_spec((in_f, eh)),                       # W1 stack
                const_spec((1, eh)),                          # b1 stack
                const_spec((eh, out_f)),                      # W2 stack
                const_spec((gate_cols, out_f)),               # b2 routed (padded)
                const_spec((1, out_f)),                       # b2 share (summed)
            ],
            out_specs=(pl.BlockSpec((tm, out_f), lambda i: (i, 0)),
                       pl.BlockSpec((tm, gate_cols), lambda i: (i, 0))),
            compiler_params=pltpu.CompilerParams(
                dimension_semantics=("parallel",),
                vmem_limit_bytes=vmem_limit),
        )

    args = (flat_x, wg_pad, bg_pad, w1_flat, b1_flat, w2_flat,
            b2_routed, b2_share)
    try:
        out_flat, ew_pad = build_call(True)(*args)
    except Exception:
        # TODO(synk): pl.Buffered(1) single-buffering not accepted by this
        # jax/Mosaic version; fall back to default 2-deep buffering.
        out_flat, ew_pad = build_call(False)(*args)

    out = out_flat[:n].reshape(b, s, out_f)
    expert_weights = ew_pad[:n, :expert_num]
    return out, expert_weights


# ----------------------------- reference (pure JAX, f32) -----------------------
def reference_forward(x, params, *, expert_num, share_num, top_k):
    b, s, in_f = x.shape
    out_f = params["w2"].shape[-1]
    hp = jax.lax.Precision.HIGHEST
    flat_x = x.reshape(-1, in_f).astype(jnp.float32)

    logits = jnp.dot(flat_x, params["wg"], precision=hp) + params["bg"]
    ew = jax.nn.softmax(logits, axis=-1)
    topv, topi = jax.lax.top_k(ew, top_k)
    topv = topv / topv.sum(axis=-1, keepdims=True)
    route = jnp.sum(
        jax.nn.one_hot(topi, expert_num, dtype=jnp.float32) * topv[..., None],
        axis=1)

    out = jnp.zeros((flat_x.shape[0], out_f), jnp.float32)
    for e in range(expert_num):
        h = jnp.maximum(
            jnp.dot(flat_x, params["w1"][e], precision=hp) + params["b1"][e, 0],
            0.0)
        y = jnp.dot(h, params["w2"][e], precision=hp) + params["b2"][e, 0]
        out = out + y * route[:, e:e + 1]
    for k in range(share_num):
        e = expert_num + k
        h = jnp.maximum(
            jnp.dot(flat_x, params["w1"][e], precision=hp) + params["b1"][e, 0],
            0.0)
        y = jnp.dot(h, params["w2"][e], precision=hp) + params["b2"][e, 0]
        out = out + y
    return out.reshape(b, s, out_f), ew


# ----------------------------- param init --------------------------------------
def init_params(key):
    e_tot = EXPERT_NUM + SHARE_NUM
    ks = jax.random.split(key, 6)
    scale = 0.05
    return {
        "w1": jax.random.normal(ks[0], (e_tot, IN_F, HID), jnp.float32) * scale,
        "b1": jax.random.normal(ks[1], (e_tot, 1, HID), jnp.float32) * scale,
        "w2": jax.random.normal(ks[2], (e_tot, HID, OUT_F), jnp.float32) * scale,
        "b2": jax.random.normal(ks[3], (e_tot, 1, OUT_F), jnp.float32) * scale,
        "wg": jax.random.normal(ks[4], (IN_F, EXPERT_NUM), jnp.float32) * scale,
        "bg": jax.random.normal(ks[5], (EXPERT_NUM,), jnp.float32) * scale,
    }


if __name__ == "__main__":
    key = jax.random.PRNGKey(0)
    pk, xk = jax.random.split(key)
    params = init_params(pk)
    x = jax.random.normal(xk, (B, S, IN_F), jnp.float32)

    final_ret, expert_weights = sparse_moe_forward(
        x, params, expert_num=EXPERT_NUM, share_num=SHARE_NUM, top_k=TOP_K)
    final_ret = jax.block_until_ready(final_ret)
    expert_weights = jax.block_until_ready(expert_weights)

    ref_out, ref_ew = reference_forward(
        x, params, expert_num=EXPERT_NUM, share_num=SHARE_NUM, top_k=TOP_K)

    assert final_ret.shape == (B, S, OUT_F)
    assert expert_weights.shape == (B * S, EXPERT_NUM)
    # Gate / routing path is exact f32 in the kernel -> tight tolerance.
    assert jnp.allclose(expert_weights, ref_ew, atol=1e-5, rtol=1e-5)
    # Expert MLPs run bf16-on-MXU with f32 accumulation (and bf16 elementwise
    # on v6e/v7x) -> loose tolerance against the full-f32 reference.
    assert jnp.allclose(final_ret, ref_out, atol=2e-2, rtol=2e-2)

    print("KERNEL_OK")
</pallas_src>

<mosaic_0001>
module attributes {stable_mosaic.version = 11 : i64} {
  func.func @moe_fused_kernel(%arg0: i32, %arg1: memref<128x128xf32, #tpu.memory_space<vmem>>, %arg2: memref<128x128xf32, #tpu.memory_space<vmem>>, %arg3: memref<1x128xf32, #tpu.memory_space<vmem>>, %arg4: memref<128x640xbf16, #tpu.memory_space<vmem>>, %arg5: memref<1x640xf32, #tpu.memory_space<vmem>>, %arg6: memref<640x128xbf16, #tpu.memory_space<vmem>>, %arg7: memref<128x128xf32, #tpu.memory_space<vmem>>, %arg8: memref<1x128xf32, #tpu.memory_space<vmem>>, %arg9: memref<128x128xf32, #tpu.memory_space<vmem>>, %arg10: memref<128x128xf32, #tpu.memory_space<vmem>>) attributes {dimension_semantics = [#tpu.dimension_semantics<parallel>], iteration_bounds = array<i64: 1>, scalar_prefetch = 0 : i64, scratch_operands = 0 : i64, tpu.core_type = #tpu.core_type<tc>, window_params = [{transform_indices = @transform_0, window_bounds = array<i64: 128, 128>}, {pipeline_mode = #tpu.pipeline_mode<synchronous>, transform_indices = @transform_1, window_bounds = array<i64: 128, 128>}, {pipeline_mode = #tpu.pipeline_mode<synchronous>, transform_indices = @transform_2, window_bounds = array<i64: 1, 128>}, {pipeline_mode = #tpu.pipeline_mode<synchronous>, transform_indices = @transform_3, window_bounds = array<i64: 128, 640>}, {pipeline_mode = #tpu.pipeline_mode<synchronous>, transform_indices = @transform_4, window_bounds = array<i64: 1, 640>}, {pipeline_mode = #tpu.pipeline_mode<synchronous>, transform_indices = @transform_5, window_bounds = array<i64: 640, 128>}, {pipeline_mode = #tpu.pipeline_mode<synchronous>, transform_indices = @transform_6, window_bounds = array<i64: 128, 128>}, {pipeline_mode = #tpu.pipeline_mode<synchronous>, transform_indices = @transform_7, window_bounds = array<i64: 1, 128>}, {transform_indices = @transform_8, window_bounds = array<i64: 128, 128>}, {transform_indices = @transform_9, window_bounds = array<i64: 128, 128>}]} {
    %c0 = arith.constant 0 : index
    %c0_0 = arith.constant 0 : index
    %0 = vector.load %arg1[%c0, %c0_0] : memref<128x128xf32, #tpu.memory_space<vmem>>, vector<128x128xf32>
    %c0_1 = arith.constant 0 : index
    %c0_2 = arith.constant 0 : index
    %1 = vector.load %arg2[%c0_1, %c0_2] : memref<128x128xf32, #tpu.memory_space<vmem>>, vector<128x128xf32>
    %cst = arith.constant dense<0.000000e+00> : vector<128x128xf32>
    %2 = tpu.matmul %0, %1, %cst {dimension_numbers = #tpu.dot_dimension_numbers<[1], [0], [0], [1], [0, 0, 1, 1], [], []>} : vector<128x128xf32>, vector<128x128xf32>, vector<128x128xf32> -> vector<128x128xf32>
    %c0_3 = arith.constant 0 : index
    %c0_4 = arith.constant 0 : index
    %3 = vector.load %arg3[%c0_3, %c0_4] : memref<1x128xf32, #tpu.memory_space<vmem>>, vector<1x128xf32>
    %4 = vector.broadcast %3 : vector<1x128xf32> to vector<128x128xf32>
    %5 = arith.addf %2, %4 : vector<128x128xf32>
    %cst_5 = arith.constant dense<0xFF800000> : vector<128xf32>
    %6 = vector.multi_reduction <maximumf>, %5, %cst_5 [1] : vector<128x128xf32> to vector<128xf32>
    %7 = vector.shape_cast %6 : vector<128xf32> to vector<128x1xf32>
    %8 = vector.broadcast %7 : vector<128x1xf32> to vector<128x128xf32>
    %9 = arith.subf %5, %8 : vector<128x128xf32>
    %10 = math.exp %9 : vector<128x128xf32>
    %cst_6 = arith.constant dense<0.000000e+00> : vector<128xf32>
    %11 = vector.multi_reduction <add>, %10, %cst_6 [1] : vector<128x128xf32> to vector<128xf32>
    %12 = vector.shape_cast %11 : vector<128xf32> to vector<128x1xf32>
    %13 = vector.broadcast %12 : vector<128x1xf32> to vector<128x128xf32>
    %14 = arith.divf %10, %13 : vector<128x128xf32>
    %c0_7 = arith.constant 0 : index
    %c0_8 = arith.constant 0 : index
    %15 = vector.load %arg10[%c0_7, %c0_8] : memref<128x128xf32, #tpu.memory_space<vmem>>, vector<128x128xf32>
    tpu.vector_store %arg10[%c0_7, %c0_8], %14 {strides = array<i32>} : memref<128x128xf32, #tpu.memory_space<vmem>>, vector<128x128xf32>,
    %16 = tpu.iota {dimensions = array<i32: 1>} : vector<128x128xi32>
    %17 = arith.sitofp %16 : vector<128x128xi32> to vector<128x128xf32>
    %cst_9 = arith.constant 0.000000e+00 : f32
    %18 = vector.broadcast %cst_9 : f32 to vector<128x128xf32>
    %cst_10 = arith.constant dense<0xFF800000> : vector<128xf32>
    %19 = vector.multi_reduction <maximumf>, %14, %cst_10 [1] : vector<128x128xf32> to vector<128xf32>
    %20 = vector.shape_cast %19 : vector<128xf32> to vector<128x1xf32>
    %21 = vector.broadcast %20 : vector<128x1xf32> to vector<128x128xf32>
    %22 = arith.cmpf oeq, %14, %21 : vector<128x128xf32>
    %cst_11 = arith.constant 1.280000e+02 : f32
    %23 = vector.broadcast %cst_11 : f32 to vector<128x128xf32>
    %24 = arith.select %22, %17, %23 : vector<128x128xi1>, vector<128x128xf32>
    %cst_12 = arith.constant dense<0x7F800000> : vector<128xf32>
    %25 = vector.multi_reduction <minimumf>, %24, %cst_12 [1] : vector<128x128xf32> to vector<128xf32>
    %26 = vector.shape_cast %25 : vector<128xf32> to vector<128x1xf32>
    %27 = vector.broadcast %26 : vector<128x1xf32> to vector<128x128xf32>
    %28 = arith.cmpf oeq, %17, %27 : vector<128x128xf32>
    %29 = arith.select %28, %14, %18 : vector<128x128xi1>, vector<128x128xf32>
    %cst_13 = arith.constant 0xFF800000 : f32
    %30 = vector.broadcast %cst_13 : f32 to vector<128x128xf32>
    %31 = arith.select %28, %30, %14 : vector<128x128xi1>, vector<128x128xf32>
    %cst_14 = arith.constant dense<0xFF800000> : vector<128xf32>
    %32 = vector.multi_reduction <maximumf>, %31, %cst_14 [1] : vector<128x128xf32> to vector<128xf32>
    %33 = vector.shape_cast %32 : vector<128xf32> to vector<128x1xf32>
    %34 = vector.broadcast %33 : vector<128x1xf32> to vector<128x128xf32>
    %35 = arith.cmpf oeq, %31, %34 : vector<128x128xf32>
    %cst_15 = arith.constant 1.280000e+02 : f32
    %36 = vector.broadcast %cst_15 : f32 to vector<128x128xf32>
    %37 = arith.select %35, %17, %36 : vector<128x128xi1>, vector<128x128xf32>
    %cst_16 = arith.constant dense<0x7F800000> : vector<128xf32>
    %38 = vector.multi_reduction <minimumf>, %37, %cst_16 [1] : vector<128x128xf32> to vector<128xf32>
    %39 = vector.shape_cast %38 : vector<128xf32> to vector<128x1xf32>
    %40 = vector.broadcast %39 : vector<128x1xf32> to vector<128x128xf32>
    %41 = arith.cmpf oeq, %17, %40 : vector<128x128xf32>
    %42 = arith.select %41, %14, %29 : vector<128x128xi1>, vector<128x128xf32>
    %cst_17 = arith.constant dense<0.000000e+00> : vector<128xf32>
    %43 = vector.multi_reduction <add>, %42, %cst_17 [1] : vector<128x128xf32> to vector<128xf32>
    %44 = vector.shape_cast %43 : vector<128xf32> to vector<128x1xf32>
    %45 = vector.broadcast %44 : vector<128x1xf32> to vector<128x128xf32>
    %46 = arith.divf %42, %45 : vector<128x128xf32>
    %47 = arith.truncf %0 : vector<128x128xf32> to vector<128x128xbf16>
    %c0_18 = arith.constant 0 : index
    %c0_19 = arith.constant 0 : index
    %48 = vector.load %arg4[%c0_18, %c0_19] : memref<128x640xbf16, #tpu.memory_space<vmem>>, vector<128x640xbf16>
    %cst_20 = arith.constant dense<0.000000e+00> : vector<128x640xf32>
    %49 = tpu.matmul %47, %48, %cst_20 {dimension_numbers = #tpu.dot_dimension_numbers<[1], [0], [0], [1], [0, 0, 1, 1], [], []>} : vector<128x128xbf16>, vector<128x640xbf16>, vector<128x640xf32> -> vector<128x640xf32>
    %c0_21 = arith.constant 0 : index
    %c0_22 = arith.constant 0 : index
    %50 = vector.load %arg5[%c0_21, %c0_22] : memref<1x640xf32, #tpu.memory_space<vmem>>, vector<1x640xf32>
    %51 = vector.broadcast %50 : vector<1x640xf32> to vector<128x640xf32>
    %52 = arith.addf %49, %51 : vector<128x640xf32>
    %cst_23 = arith.constant 0.000000e+00 : f32
    %53 = vector.broadcast %cst_23 : f32 to vector<128x640xf32>
    %54 = arith.maximumf %52, %53 : vector<128x640xf32>
    %55 = vector.extract_strided_slice %46 {offsets = [0, 0], sizes = [128, 1], strides = [1, 1]} : vector<128x128xf32> to vector<128x1xf32>
    %56 = vector.extract_strided_slice %54 {offsets = [0, 0], sizes = [128, 128], strides = [1, 1]} : vector<128x640xf32> to vector<128x128xf32>
    %57 = vector.broadcast %55 : vector<128x1xf32> to vector<128x128xf32>
    %58 = arith.mulf %56, %57 : vector<128x128xf32>
    %59 = vector.extract_strided_slice %46 {offsets = [0, 1], sizes = [128, 1], strides = [1, 1]} : vector<128x128xf32> to vector<128x1xf32>
    %60 = vector.extract_strided_slice %54 {offsets = [0, 128], sizes = [128, 128], strides = [1, 1]} : vector<128x640xf32> to vector<128x128xf32>
    %61 = vector.broadcast %59 : vector<128x1xf32> to vector<128x128xf32>
    %62 = arith.mulf %60, %61 : vector<128x128xf32>
    %63 = vector.extract_strided_slice %46 {offsets = [0, 2], sizes = [128, 1], strides = [1, 1]} : vector<128x128xf32> to vector<128x1xf32>
    %64 = vector.extract_strided_slice %54 {offsets = [0, 256], sizes = [128, 128], strides = [1, 1]} : vector<128x640xf32> to vector<128x128xf32>
    %65 = vector.broadcast %63 : vector<128x1xf32> to vector<128x128xf32>
    %66 = arith.mulf %64, %65 : vector<128x128xf32>
    %67 = vector.extract_strided_slice %46 {offsets = [0, 3], sizes = [128, 1], strides = [1, 1]} : vector<128x128xf32> to vector<128x1xf32>
    %68 = vector.extract_strided_slice %54 {offsets = [0, 384], sizes = [128, 128], strides = [1, 1]} : vector<128x640xf32> to vector<128x128xf32>
    %69 = vector.broadcast %67 : vector<128x1xf32> to vector<128x128xf32>
    %70 = arith.mulf %68, %69 : vector<128x128xf32>
    %71 = vector.extract_strided_slice %54 {offsets = [0, 512], sizes = [128, 128], strides = [1, 1]} : vector<128x640xf32> to vector<128x128xf32>
    %72 = tpu.concatenate %58, %62, %66, %70, %71 in 1 : vector<128x128xf32>, vector<128x128xf32>, vector<128x128xf32>, vector<128x128xf32>, vector<128x128xf32> -> vector<128x640xf32>
    %73 = arith.truncf %72 : vector<128x640xf32> to vector<128x640xbf16>
    %c0_24 = arith.constant 0 : index
    %c0_25 = arith.constant 0 : index
    %74 = vector.load %arg6[%c0_24, %c0_25] : memref<640x128xbf16, #tpu.memory_space<vmem>>, vector<640x128xbf16>
    %cst_26 = arith.constant dense<0.000000e+00> : vector<128x128xf32>
    %75 = tpu.matmul %73, %74, %cst_26 {dimension_numbers = #tpu.dot_dimension_numbers<[1], [0], [0], [1], [0, 0, 1, 1], [], []>} : vector<128x640xbf16>, vector<640x128xbf16>, vector<128x128xf32> -> vector<128x128xf32>
    %c0_27 = arith.constant 0 : index
    %c0_28 = arith.constant 0 : index
    %76 = vector.load %arg7[%c0_27, %c0_28] : memref<128x128xf32, #tpu.memory_space<vmem>>, vector<128x128xf32>
    %cst_29 = arith.constant dense<0.000000e+00> : vector<128x128xf32>
    %77 = tpu.matmul %46, %76, %cst_29 {dimension_numbers = #tpu.dot_dimension_numbers<[1], [0], [0], [1], [0, 0, 1, 1], [], []>} : vector<128x128xf32>, vector<128x128xf32>, vector<128x128xf32> -> vector<128x128xf32>
    %78 = arith.addf %75, %77 : vector<128x128xf32>
    %c0_30 = arith.constant 0 : index
    %c0_31 = arith.constant 0 : index
    %79 = vector.load %arg8[%c0_30, %c0_31] : memref<1x128xf32, #tpu.memory_space<vmem>>, vector<1x128xf32>
    %80 = vector.broadcast %79 : vector<1x128xf32> to vector<128x128xf32>
    %81 = arith.addf %78, %80 : vector<128x128xf32>
    %c0_32 = arith.constant 0 : index
    %c0_33 = arith.constant 0 : index
    %82 = vector.load %arg9[%c0_32, %c0_33] : memref<128x128xf32, #tpu.memory_space<vmem>>, vector<128x128xf32>
    tpu.vector_store %arg9[%c0_32, %c0_33], %81 {strides = array<i32>} : memref<128x128xf32, #tpu.memory_space<vmem>>, vector<128x128xf32>,
    return
  }
  func.func @transform_0(%arg0: i32) -> (i32, i32) {
    %c0_i32 = arith.constant 0 : i32
    %c0_i32_0 = arith.constant 0 : i32
    return %arg0, %c0_i32 : i32, i32
  }
  func.func @transform_1(%arg0: i32) -> (i32, i32) {
    %c0_i32 = arith.constant 0 : i32
    %c0_i32_0 = arith.constant 0 : i32
    %c0_i32_1 = arith.constant 0 : i32
    return %c0_i32, %c0_i32_0 : i32, i32
  }
  func.func @transform_2(%arg0: i32) -> (i32, i32) {
    %c0_i32 = arith.constant 0 : i32
    %c0_i32_0 = arith.constant 0 : i32
    %c0_i32_1 = arith.constant 0 : i32
    return %c0_i32, %c0_i32_0 : i32, i32
  }
  func.func @transform_3(%arg0: i32) -> (i32, i32) {
    %c0_i32 = arith.constant 0 : i32
    %c0_i32_0 = arith.constant 0 : i32
    %c0_i32_1 = arith.constant 0 : i32
    return %c0_i32, %c0_i32_0 : i32, i32
  }
  func.func @transform_4(%arg0: i32) -> (i32, i32) {
    %c0_i32 = arith.constant 0 : i32
    %c0_i32_0 = arith.constant 0 : i32
    %c0_i32_1 = arith.constant 0 : i32
    return %c0_i32, %c0_i32_0 : i32, i32
  }
  func.func @transform_5(%arg0: i32) -> (i32, i32) {
    %c0_i32 = arith.constant 0 : i32
    %c0_i32_0 = arith.constant 0 : i32
    %c0_i32_1 = arith.constant 0 : i32
    return %c0_i32, %c0_i32_0 : i32, i32
  }
  func.func @transform_6(%arg0: i32) -> (i32, i32) {
    %c0_i32 = arith.constant 0 : i32
    %c0_i32_0 = arith.constant 0 : i32
    %c0_i32_1 = arith.constant 0 : i32
    return %c0_i32, %c0_i32_0 : i32, i32
  }
  func.func @transform_7(%arg0: i32) -> (i32, i32) {
    %c0_i32 = arith.constant 0 : i32
    %c0_i32_0 = arith.constant 0 : i32
    %c0_i32_1 = arith.constant 0 : i32
    return %c0_i32, %c0_i32_0 : i32, i32
  }
  func.func @transform_8(%arg0: i32) -> (i32, i32) {
    %c0_i32 = arith.constant 0 : i32
    %c0_i32_0 = arith.constant 0 : i32
    return %arg0, %c0_i32 : i32, i32
  }
  func.func @transform_9(%arg0: i32) -> (i32, i32) {
    %c0_i32 = arith.constant 0 : i32
    %c0_i32_0 = arith.constant 0 : i32
    return %arg0, %c0_i32 : i32, i32
  }
}

module attributes {stable_mosaic.version = 11 : i64} {
  func.func @moe_fused_kernel(%arg0: i32, %arg1: memref<128x128xf32, #tpu.memory_space<vmem>>, %arg2: memref<128x128xf32, #tpu.memory_space<vmem>>, %arg3: memref<1x128xf32, #tpu.memory_space<vmem>>, %arg4: memref<128x640xbf16, #tpu.memory_space<vmem>>, %arg5: memref<1x640xf32, #tpu.memory_space<vmem>>, %arg6: memref<640x128xbf16, #tpu.memory_space<vmem>>, %arg7: memref<128x128xf32, #tpu.memory_space<vmem>>, %arg8: memref<1x128xf32, #tpu.memory_space<vmem>>, %arg9: memref<128x128xf32, #tpu.memory_space<vmem>>, %arg10: memref<128x128xf32, #tpu.memory_space<vmem>>) attributes {dimension_semantics = [#tpu.dimension_semantics<parallel>], iteration_bounds = array<i64: 1>, scalar_prefetch = 0 : i64, scratch_operands = 0 : i64, tpu.core_type = #tpu.core_type<tc>, window_params = [{transform_indices = @transform_0, window_bounds = array<i64: 128, 128>}, {pipeline_mode = #tpu.pipeline_mode<synchronous>, transform_indices = @transform_1, window_bounds = array<i64: 128, 128>}, {pipeline_mode = #tpu.pipeline_mode<synchronous>, transform_indices = @transform_2, window_bounds = array<i64: 1, 128>}, {pipeline_mode = #tpu.pipeline_mode<synchronous>, transform_indices = @transform_3, window_bounds = array<i64: 128, 640>}, {pipeline_mode = #tpu.pipeline_mode<synchronous>, transform_indices = @transform_4, window_bounds = array<i64: 1, 640>}, {pipeline_mode = #tpu.pipeline_mode<synchronous>, transform_indices = @transform_5, window_bounds = array<i64: 640, 128>}, {pipeline_mode = #tpu.pipeline_mode<synchronous>, transform_indices = @transform_6, window_bounds = array<i64: 128, 128>}, {pipeline_mode = #tpu.pipeline_mode<synchronous>, transform_indices = @transform_7, window_bounds = array<i64: 1, 128>}, {transform_indices = @transform_8, window_bounds = array<i64: 128, 128>}, {transform_indices = @transform_9, window_bounds = array<i64: 128, 128>}]} {
    %c0 = arith.constant 0 : index
    %c0_0 = arith.constant 0 : index
    %0 = vector.load %arg1[%c0, %c0_0] : memref<128x128xf32, #tpu.memory_space<vmem>>, vector<128x128xf32>
    %c0_1 = arith.constant 0 : index
    %c0_2 = arith.constant 0 : index
    %1 = vector.load %arg2[%c0_1, %c0_2] : memref<128x128xf32, #tpu.memory_space<vmem>>, vector<128x128xf32>
    %cst = arith.constant dense<0.000000e+00> : vector<128x128xf32>
    %2 = tpu.matmul %0, %1, %cst {dimension_numbers = #tpu.dot_dimension_numbers<[1], [0], [0], [1], [0, 0, 1, 1], [], []>} : vector<128x128xf32>, vector<128x128xf32>, vector<128x128xf32> -> vector<128x128xf32>
    %c0_3 = arith.constant 0 : index
    %c0_4 = arith.constant 0 : index
    %3 = vector.load %arg3[%c0_3, %c0_4] : memref<1x128xf32, #tpu.memory_space<vmem>>, vector<1x128xf32>
    %4 = vector.broadcast %3 : vector<1x128xf32> to vector<128x128xf32>
    %5 = arith.addf %2, %4 : vector<128x128xf32>
    %cst_5 = arith.constant dense<0xFF800000> : vector<128xf32>
    %6 = vector.multi_reduction <maximumf>, %5, %cst_5 [1] : vector<128x128xf32> to vector<128xf32>
    %7 = vector.shape_cast %6 : vector<128xf32> to vector<128x1xf32>
    %8 = vector.broadcast %7 : vector<128x1xf32> to vector<128x128xf32>
    %9 = arith.subf %5, %8 : vector<128x128xf32>
    %10 = math.exp %9 : vector<128x128xf32>
    %cst_6 = arith.constant dense<0.000000e+00> : vector<128xf32>
    %11 = vector.multi_reduction <add>, %10, %cst_6 [1] : vector<128x128xf32> to vector<128xf32>
    %12 = vector.shape_cast %11 : vector<128xf32> to vector<128x1xf32>
    %13 = vector.broadcast %12 : vector<128x1xf32> to vector<128x128xf32>
    %14 = arith.divf %10, %13 : vector<128x128xf32>
    %c0_7 = arith.constant 0 : index
    %c0_8 = arith.constant 0 : index
    %15 = vector.load %arg10[%c0_7, %c0_8] : memref<128x128xf32, #tpu.memory_space<vmem>>, vector<128x128xf32>
    tpu.vector_store %arg10[%c0_7, %c0_8], %14 {strides = array<i32>} : memref<128x128xf32, #tpu.memory_space<vmem>>, vector<128x128xf32>,
    %16 = tpu.iota {dimensions = array<i32: 1>} : vector<128x128xi32>
    %17 = arith.sitofp %16 : vector<128x128xi32> to vector<128x128xf32>
    %cst_9 = arith.constant 0.000000e+00 : f32
    %18 = vector.broadcast %cst_9 : f32 to vector<128x128xf32>
    %cst_10 = arith.constant dense<0xFF800000> : vector<128xf32>
    %19 = vector.multi_reduction <maximumf>, %14, %cst_10 [1] : vector<128x128xf32> to vector<128xf32>
    %20 = vector.shape_cast %19 : vector<128xf32> to vector<128x1xf32>
    %21 = vector.broadcast %20 : vector<128x1xf32> to vector<128x128xf32>
    %22 = arith.cmpf oeq, %14, %21 : vector<128x128xf32>
    %cst_11 = arith.constant 1.280000e+02 : f32
    %23 = vector.broadcast %cst_11 : f32 to vector<128x128xf32>
    %24 = arith.select %22, %17, %23 : vector<128x128xi1>, vector<128x128xf32>
    %cst_12 = arith.constant dense<0x7F800000> : vector<128xf32>
    %25 = vector.multi_reduction <minimumf>, %24, %cst_12 [1] : vector<128x128xf32> to vector<128xf32>
    %26 = vector.shape_cast %25 : vector<128xf32> to vector<128x1xf32>
    %27 = vector.broadcast %26 : vector<128x1xf32> to vector<128x128xf32>
    %28 = arith.cmpf oeq, %17, %27 : vector<128x128xf32>
    %29 = arith.select %28, %14, %18 : vector<128x128xi1>, vector<128x128xf32>
    %cst_13 = arith.constant 0xFF800000 : f32
    %30 = vector.broadcast %cst_13 : f32 to vector<128x128xf32>
    %31 = arith.select %28, %30, %14 : vector<128x128xi1>, vector<128x128xf32>
    %cst_14 = arith.constant dense<0xFF800000> : vector<128xf32>
    %32 = vector.multi_reduction <maximumf>, %31, %cst_14 [1] : vector<128x128xf32> to vector<128xf32>
    %33 = vector.shape_cast %32 : vector<128xf32> to vector<128x1xf32>
    %34 = vector.broadcast %33 : vector<128x1xf32> to vector<128x128xf32>
    %35 = arith.cmpf oeq, %31, %34 : vector<128x128xf32>
    %cst_15 = arith.constant 1.280000e+02 : f32
    %36 = vector.broadcast %cst_15 : f32 to vector<128x128xf32>
    %37 = arith.select %35, %17, %36 : vector<128x128xi1>, vector<128x128xf32>
    %cst_16 = arith.constant dense<0x7F800000> : vector<128xf32>
    %38 = vector.multi_reduction <minimumf>, %37, %cst_16 [1] : vector<128x128xf32> to vector<128xf32>
    %39 = vector.shape_cast %38 : vector<128xf32> to vector<128x1xf32>
    %40 = vector.broadcast %39 : vector<128x1xf32> to vector<128x128xf32>
    %41 = arith.cmpf oeq, %17, %40 : vector<128x128xf32>
    %42 = arith.select %41, %14, %29 : vector<128x128xi1>, vector<128x128xf32>
    %cst_17 = arith.constant dense<0.000000e+00> : vector<128xf32>
    %43 = vector.multi_reduction <add>, %42, %cst_17 [1] : vector<128x128xf32> to vector<128xf32>
    %44 = vector.shape_cast %43 : vector<128xf32> to vector<128x1xf32>
    %45 = vector.broadcast %44 : vector<128x1xf32> to vector<128x128xf32>
    %46 = arith.divf %42, %45 : vector<128x128xf32>
    %47 = arith.truncf %0 : vector<128x128xf32> to vector<128x128xbf16>
    %c0_18 = arith.constant 0 : index
    %c0_19 = arith.constant 0 : index
    %48 = vector.load %arg4[%c0_18, %c0_19] : memref<128x640xbf16, #tpu.memory_space<vmem>>, vector<128x640xbf16>
    %cst_20 = arith.constant dense<0.000000e+00> : vector<128x640xf32>
    %49 = tpu.matmul %47, %48, %cst_20 {dimension_numbers = #tpu.dot_dimension_numbers<[1], [0], [0], [1], [0, 0, 1, 1], [], []>} : vector<128x128xbf16>, vector<128x640xbf16>, vector<128x640xf32> -> vector<128x640xf32>
    %c0_21 = arith.constant 0 : index
    %c0_22 = arith.constant 0 : index
    %50 = vector.load %arg5[%c0_21, %c0_22] : memref<1x640xf32, #tpu.memory_space<vmem>>, vector<1x640xf32>
    %51 = vector.broadcast %50 : vector<1x640xf32> to vector<128x640xf32>
    %52 = arith.addf %49, %51 : vector<128x640xf32>
    %cst_23 = arith.constant 0.000000e+00 : f32
    %53 = vector.broadcast %cst_23 : f32 to vector<128x640xf32>
    %54 = arith.maximumf %52, %53 : vector<128x640xf32>
    %55 = vector.extract_strided_slice %46 {offsets = [0, 0], sizes = [128, 1], strides = [1, 1]} : vector<128x128xf32> to vector<128x1xf32>
    %56 = vector.extract_strided_slice %54 {offsets = [0, 0], sizes = [128, 128], strides = [1, 1]} : vector<128x640xf32> to vector<128x128xf32>
    %57 = vector.broadcast %55 : vector<128x1xf32> to vector<128x128xf32>
    %58 = arith.mulf %56, %57 : vector<128x128xf32>
    %59 = vector.extract_strided_slice %46 {offsets = [0, 1], sizes = [128, 1], strides = [1, 1]} : vector<128x128xf32> to vector<128x1xf32>
    %60 = vector.extract_strided_slice %54 {offsets = [0, 128], sizes = [128, 128], strides = [1, 1]} : vector<128x640xf32> to vector<128x128xf32>
    %61 = vector.broadcast %59 : vector<128x1xf32> to vector<128x128xf32>
    %62 = arith.mulf %60, %61 : vector<128x128xf32>
    %63 = vector.extract_strided_slice %46 {offsets = [0, 2], sizes = [128, 1], strides = [1, 1]} : vector<128x128xf32> to vector<128x1xf32>
    %64 = vector.extract_strided_slice %54 {offsets = [0, 256], sizes = [128, 128], strides = [1, 1]} : vector<128x640xf32> to vector<128x128xf32>
    %65 = vector.broadcast %63 : vector<128x1xf32> to vector<128x128xf32>
    %66 = arith.mulf %64, %65 : vector<128x128xf32>
    %67 = vector.extract_strided_slice %46 {offsets = [0, 3], sizes = [128, 1], strides = [1, 1]} : vector<128x128xf32> to vector<128x1xf32>
    %68 = vector.extract_strided_slice %54 {offsets = [0, 384], sizes = [128, 128], strides = [1, 1]} : vector<128x640xf32> to vector<128x128xf32>
    %69 = vector.broadcast %67 : vector<128x1xf32> to vector<128x128xf32>
    %70 = arith.mulf %68, %69 : vector<128x128xf32>
    %71 = vector.extract_strided_slice %54 {offsets = [0, 512], sizes = [128, 128], strides = [1, 1]} : vector<128x640xf32> to vector<128x128xf32>
    %72 = tpu.concatenate %58, %62, %66, %70, %71 in 1 : vector<128x128xf32>, vector<128x128xf32>, vector<128x128xf32>, vector<128x128xf32>, vector<128x128xf32> -> vector<128x640xf32>
    %73 = arith.truncf %72 : vector<128x640xf32> to vector<128x640xbf16>
    %c0_24 = arith.constant 0 : index
    %c0_25 = arith.constant 0 : index
    %74 = vector.load %arg6[%c0_24, %c0_25] : memref<640x128xbf16, #tpu.memory_space<vmem>>, vector<640x128xbf16>
    %cst_26 = arith.constant dense<0.000000e+00> : vector<128x128xf32>
    %75 = tpu.matmul %73, %74, %cst_26 {dimension_numbers = #tpu.dot_dimension_numbers<[1], [0], [0], [1], [0, 0, 1, 1], [], []>} : vector<128x640xbf16>, vector<640x128xbf16>, vector<128x128xf32> -> vector<128x128xf32>
    %c0_27 = arith.constant 0 : index
    %c0_28 = arith.constant 0 : index
    %76 = vector.load %arg7[%c0_27, %c0_28] : memref<128x128xf32, #tpu.memory_space<vmem>>, vector<128x128xf32>
    %cst_29 = arith.constant dense<0.000000e+00> : vector<128x128xf32>
    %77 = tpu.matmul %46, %76, %cst_29 {dimension_numbers = #tpu.dot_dimension_numbers<[1], [0], [0], [1], [0, 0, 1, 1], [], []>} : vector<128x128xf32>, vector<128x128xf32>, vector<128x128xf32> -> vector<128x128xf32>
    %78 = arith.addf %75, %77 : vector<128x128xf32>
    %c0_30 = arith.constant 0 : index
    %c0_31 = arith.constant 0 : index
    %79 = vector.load %arg8[%c0_30, %c0_31] : memref<1x128xf32, #tpu.memory_space<vmem>>, vector<1x128xf32>
    %80 = vector.broadcast %79 : vector<1x128xf32> to vector<128x128xf32>
    %81 = arith.addf %78, %80 : vector<128x128xf32>
    %c0_32 = arith.constant 0 : index
    %c0_33 = arith.constant 0 : index
    %82 = vector.load %arg9[%c0_32, %c0_33] : memref<128x128xf32, #tpu.memory_space<vmem>>, vector<128x128xf32>
    tpu.vector_store %arg9[%c0_32, %c0_33], %81 {strides = array<i32>} : memref<128x128xf32, #tpu.memory_space<vmem>>, vector<128x128xf32>,
    return
  }
  func.func @transform_0(%arg0: i32) -> (i32, i32) {
    %c0_i32 = arith.constant 0 : i32
    %c0_i32_0 = arith.constant 0 : i32
    return %arg0, %c0_i32 : i32, i32
  }
  func.func @transform_1(%arg0: i32) -> (i32, i32) {
    %c0_i32 = arith.constant 0 : i32
    %c0_i32_0 = arith.constant 0 : i32
    %c0_i32_1 = arith.constant 0 : i32
    return %c0_i32, %c0_i32_0 : i32, i32
  }
  func.func @transform_2(%arg0: i32) -> (i32, i32) {
    %c0_i32 = arith.constant 0 : i32
    %c0_i32_0 = arith.constant 0 : i32
    %c0_i32_1 = arith.constant 0 : i32
    return %c0_i32, %c0_i32_0 : i32, i32
  }
  func.func @transform_3(%arg0: i32) -> (i32, i32) {
    %c0_i32 = arith.constant 0 : i32
    %c0_i32_0 = arith.constant 0 : i32
    %c0_i32_1 = arith.constant 0 : i32
    return %c0_i32, %c0_i32_0 : i32, i32
  }
  func.func @transform_4(%arg0: i32) -> (i32, i32) {
    %c0_i32 = arith.constant 0 : i32
    %c0_i32_0 = arith.constant 0 : i32
    %c0_i32_1 = arith.constant 0 : i32
    return %c0_i32, %c0_i32_0 : i32, i32
  }
  func.func @transform_5(%arg0: i32) -> (i32, i32) {
    %c0_i32 = arith.constant 0 : i32
    %c0_i32_0 = arith.constant 0 : i32
    %c0_i32_1 = arith.constant 0 : i32
    return %c0_i32, %c0_i32_0 : i32, i32
  }
  func.func @transform_6(%arg0: i32) -> (i32, i32) {
    %c0_i32 = arith.constant 0 : i32
    %c0_i32_0 = arith.constant 0 : i32
    %c0_i32_1 = arith.constant 0 : i32
    return %c0_i32, %c0_i32_0 : i32, i32
  }
  func.func @transform_7(%arg0: i32) -> (i32, i32) {
    %c0_i32 = arith.constant 0 : i32
    %c0_i32_0 = arith.constant 0 : i32
    %c0_i32_1 = arith.constant 0 : i32
    return %c0_i32, %c0_i32_0 : i32, i32
  }
  func.func @transform_8(%arg0: i32) -> (i32, i32) {
    %c0_i32 = arith.constant 0 : i32
    %c0_i32_0 = arith.constant 0 : i32
    return %arg0, %c0_i32 : i32, i32
  }
  func.func @transform_9(%arg0: i32) -> (i32, i32) {
    %c0_i32 = arith.constant 0 : i32
    %c0_i32_0 = arith.constant 0 : i32
    return %arg0, %c0_i32 : i32, i32
  }
}

</mosaic_0001>

<bundles_post_ra>
// kernel: tpu_custom_call.1
= control target key start
LH: loop header
LB: loop body
LE: loop exit
PB: predicated region body
PF: predicated region fallthrough
CT: control target
= control target key end

     0   :  { %15 = vsyncpa [#allocation3], 0  ;;  %s5092_s0 = inlined_call_operand.hbm [shape: f32[128,128], index: 0, kind: input, shape index: {}]   ;;  %s5093_s1 = inlined_call_operand.hbm [shape: f32[128,128], index: 1, kind: input, shape index: {}]   ;;  %s5094_s2 = inlined_call_operand.vmem [shape: f32[1,128], index: 2, kind: input, shape index: {}]   ;;  %s5095_s3 = inlined_call_operand.hbm [shape: bf16[128,640], index: 3, kind: input, shape index: {}]   ;;  %s5096_s4 = inlined_call_operand.vmem [shape: f32[1,640], index: 4, kind: input, shape index: {}]   ;;  %s5097_s5 = inlined_call_operand.hbm [shape: bf16[640,128], index: 5, kind: input, shape index: {}]   ;;  %s5098_s6 = inlined_call_operand.hbm [shape: f32[128,128], index: 6, kind: input, shape index: {}]   ;;  %s5099_s7 = inlined_call_operand.vmem [shape: f32[1,128], index: 7, kind: input, shape index: {}]   ;;  %s5100_s8 = inlined_call_operand.hbm [shape: f32[128,128], index: 8, kind: output, shape index: {0}]   ;;  %s5101_s9 = inlined_call_operand.hbm [shape: f32[128,128], index: 9, kind: output, shape index: {1}]  }
   0x1   :  { %16 = vsyncpa [#allocation6], 0 }
   0x2   :  { %17 = vsyncpa [#allocation9], 0 }
   0x3   :  { %18 = vsyncpa [#allocation4], 0 }
   0x4   :  { %19 = vsyncpa [#allocation13], 0  ;;  %s3677_s30 = smov [#allocation5]   ;;  %s3678_s11 = smov [#allocation8]  }
   0x5   :  { %s37_s10 = sshll.u32 %s3677_s30, 4  ;;  %s65_s12 = sshll.u32 %s3678_s11, 4  ;;  %s38_s10 = int_to_ptr.vmem [resolvable:$true] %s37_s10  ;;  %s3744_s12 = int_to_ptr.vmem [resolvable:$true] %s65_s12 }
   0x6   :  { %s3513_s15 = scalar_lea.hbm %s5093_s1, 2048 }
   0x7   :  { %p3514_p0 = scmp.ne.s32.totalorder %s5093_s1, %s3513_s15  ;;  %p3517_p1 = scmp.lt.u32.totalorder %s3513_s15, %s5093_s1 }
   0x9   :  { %p3519_p2 = pnand %p3517_p1, %p3514_p0 }
   0xb   :  { %3522 = shalt.err (!%p3519_p2)
}
   0xc   :  { %s3523_s20 = scalar_lea.vmem %s38_s10, 2048  ;;  %p3528_p4 = scmp.lt.s32.totalorder %s38_s10, %s38_s10 }
   0xd   :  { %p3524_p3 = scmp.ne.s32.totalorder %s38_s10, %s3523_s20  ;;  %p3529_p5 = scmp.lt.s32.totalorder %s3523_s20, %s3523_s20 }
   0xf   :  { %p3530_p6 = por %p3529_p5, %p3528_p4 }
  0x11   :  { %p3531_p7 = pnand %p3530_p6, %p3524_p3 }
  0x13   :  { %3534 = shalt.err (!%p3531_p7)
}
  0x14   :  { %s3679_s21 = smov 128   ;;  %s3680_s22 = smov 8  }
  0x15   :  { %43 = dma.hbm_to_vmem [thread:$0]  %s5093_s1, 2048, %s38_s10, [#allocation6], %s3679_s21, %s3679_s21, %s3680_s22  }
  0x16   :  { %s3535_s27 = scalar_lea.hbm %s5097_s5, 5120 }
  0x17   :  { %p3536_p8 = scmp.ne.s32.totalorder %s5097_s5, %s3535_s27  ;;  %p3539_p9 = scmp.lt.u32.totalorder %s3535_s27, %s5097_s5 }
  0x19   :  { %p3541_p10 = pnand %p3539_p9, %p3536_p8 }
  0x1b   :  { %3544 = shalt.err (!%p3541_p10)
}
  0x1c   :  { %s3545_s13 = scalar_lea.vmem %s3744_s12, 5120  ;;  %p3550_p12 = scmp.lt.s32.totalorder %s3744_s12, %s3744_s12 }
  0x1d   :  { %p3546_p11 = scmp.ne.s32.totalorder %s3744_s12, %s3545_s13  ;;  %p3551_p13 = scmp.lt.s32.totalorder %s3545_s13, %s3545_s13 }
  0x1f   :  { %p3552_p0 = por %p3551_p13, %p3550_p12 }
  0x21   :  { %p3553_p1 = pnand %p3552_p0, %p3546_p11 }
  0x23   :  { %3556 = shalt.err (!%p3553_p1)
}
  0x24   :  { %s3681_s1 = smov 64   ;;  %s3682_s10 = smov 4  }
  0x25   :  { %71 = dma.hbm_to_vmem [thread:$0]  %s5097_s5, 5120, %s3744_s12, [#allocation9], %s3681_s1, %s3681_s1, %s3682_s10  }
  0x26   :  { %s3683_s16 = smov [#allocation2]   ;;  %s3684_s18 = smov [#allocation7]  }
  0x27   :  { %s25_s17 = sshll.u32 %s3683_s16, 4  ;;  %s51_s19 = sshll.u32 %s3684_s18, 4  ;;  %s26_s17 = int_to_ptr.vmem [resolvable:$true] %s25_s17  ;;  %s3778_s19 = int_to_ptr.vmem [resolvable:$true] %s51_s19 }
  0x28   :  { %s3557_s24 = scalar_lea.hbm %s5092_s0, 2048 }
  0x29   :  { %p3558_p2 = scmp.ne.s32.totalorder %s5092_s0, %s3557_s24  ;;  %p3561_p3 = scmp.lt.u32.totalorder %s3557_s24, %s5092_s0 }
  0x2b   :  { %p3563_p4 = pnand %p3561_p3, %p3558_p2 }
  0x2d   :  { %3566 = shalt.err (!%p3563_p4)
}
  0x2e   :  { %s3567_s5 = scalar_lea.vmem %s26_s17, 2048  ;;  %p3572_p6 = scmp.lt.s32.totalorder %s26_s17, %s26_s17 }
  0x2f   :  { %p3568_p5 = scmp.ne.s32.totalorder %s26_s17, %s3567_s5  ;;  %p3573_p7 = scmp.lt.s32.totalorder %s3567_s5, %s3567_s5 }
  0x31   :  { %p3574_p8 = por %p3573_p7, %p3572_p6 }
  0x33   :  { %p3575_p9 = pnand %p3574_p8, %p3568_p5 }
  0x35   :  { %3578 = shalt.err (!%p3575_p9)
}
  0x36   :  { %31 = dma.hbm_to_vmem [thread:$0]  %s5092_s0, 2048, %s26_s17, [#allocation3], %s3679_s21, %s3679_s21, %s3680_s22  }
  0x37   :  { %s3579_s13 = scalar_lea.hbm %s5095_s3, 5120 }
  0x38   :  { %p3580_p10 = scmp.ne.s32.totalorder %s5095_s3, %s3579_s13  ;;  %p3583_p11 = scmp.lt.u32.totalorder %s3579_s13, %s5095_s3 }
  0x3a   :  { %p3585_p12 = pnand %p3583_p11, %p3580_p10 }
  0x3c   :  { %3588 = shalt.err (!%p3585_p12)
}
  0x3d   :  { %s3589_s16 = scalar_lea.vmem %s3778_s19, 5120  ;;  %p3594_p0 = scmp.lt.s32.totalorder %s3778_s19, %s3778_s19 }
  0x3e   :  { %p3590_p13 = scmp.ne.s32.totalorder %s3778_s19, %s3589_s16  ;;  %p3595_p1 = scmp.lt.s32.totalorder %s3589_s16, %s3589_s16 }
  0x40   :  { %p3596_p2 = por %p3595_p1, %p3594_p0 }
  0x42   :  { %p3597_p3 = pnand %p3596_p2, %p3590_p13 }
  0x44   :  { %3600 = shalt.err (!%p3597_p3)
}
  0x45   :  { %s3685_s0 = smov 320   ;;  %s3686_s17 = smov 20  }
  0x46   :  { %57 = dma.hbm_to_vmem [thread:$0]  %s5095_s3, 5120, %s3778_s19, [#allocation6], %s3685_s0, %s3685_s0, %s3686_s17  }
  0x47   :  { %s3687_s23 = smov [#allocation10]   ;;  %s3601_s27 = scalar_lea.hbm %s5098_s6, 2048 }
  0x48   :  { %s77_s24 = sshll.u32 %s3687_s23, 4  ;;  %p3602_p4 = scmp.ne.s32.totalorder %s5098_s6, %s3601_s27  ;;  %s78_s24 = int_to_ptr.vmem [resolvable:$true] %s77_s24 }
  0x49   :  { %p3605_p5 = scmp.lt.u32.totalorder %s3601_s27, %s5098_s6 }
  0x4b   :  { %p3607_p6 = pnand %p3605_p5, %p3602_p4 }
  0x4d   :  { %3610 = shalt.err (!%p3607_p6)
}
  0x4e   :  { %s3611_s30 = scalar_lea.vmem %s78_s24, 2048  ;;  %p3616_p8 = scmp.lt.s32.totalorder %s78_s24, %s78_s24 }
  0x4f   :  { %p3612_p7 = scmp.ne.s32.totalorder %s78_s24, %s3611_s30  ;;  %p3617_p9 = scmp.lt.s32.totalorder %s3611_s30, %s3611_s30 }
  0x51   :  { %p3618_p10 = por %p3617_p9, %p3616_p8 }
  0x53   :  { %p3619_p11 = pnand %p3618_p10, %p3612_p7 }
  0x55   :  { %3622 = shalt.err (!%p3619_p11)
}
  0x56   :  { %83 = dma.hbm_to_vmem [thread:$0]  %s5098_s6, 2048, %s78_s24, [#allocation9], %s3679_s21, %s3679_s21, %s3680_s22  }
  0x57   :  { %3667 = dma.done.wait [#allocation3], 2048  }
  0x58   :  { %3668 = vsyncadd [#allocation3], 4294965248 }
  0x59   :  { %3669 = dma.done.wait [#allocation6], 7168  }
  0x5a   :  { %3670 = vsyncadd [#allocation6], 4294960128 }
  0x5b   :  { %3671 = dma.done.wait [#allocation9], 7168  }
  0x5c   :  { %3672 = vsyncadd [#allocation9], 4294960128  ;;  %v118_v0 = vld [vmem:[#allocation5] sm:$0xff]  ;;  %v119_v1 = vld [vmem:[#allocation5 + $0x8] sm:$0xff] }
  0x5d   :  { %v120_v2 = vld [vmem:[#allocation5 + $0x10] sm:$0xff]  ;;  %v3183_v3 = vpack.c.bf16 %v119_v1, %v118_v0  ;;  %v121_v4 = vld [vmem:[#allocation5 + $0x18] sm:$0xff]  ;;  %v122_v6 = vld [vmem:[#allocation5 + $0x20] sm:$0xff] }
  0x5e   :  { %v3187_v5 = vpack.c.bf16 %v121_v4, %v120_v2  ;;  %v123_v7 = vld [vmem:[#allocation5 + $0x28] sm:$0xff]  ;;  %v124_v8 = vld [vmem:[#allocation5 + $0x30] sm:$0xff]  ;;  %v125_v10 = vld [vmem:[#allocation5 + $0x38] sm:$0xff] }
  0x5f   :  { %3184 = vmatprep.subr.bf16.mxu0 %v3183_v3  ;;  %v3191_v9 = vpack.c.bf16 %v123_v7, %v122_v6  ;;  %v102_v11 = vld [vmem:[#allocation2] sm:$0xff]  ;;  %v103_v12 = vld [vmem:[#allocation2 + $0x8] sm:$0xff]  ;;  %v104_v14 = vld [vmem:[#allocation2 + $0x10] sm:$0xff]  ;;  %v3195_v28 = vpack.c.bf16 %v125_v10, %v124_v8 }
  0x60   :  { %3186 = vmatpush3.bf16.msra.mxu0 %v3183_v3  ;;  %3039 = vmatprep.mubr.f32.mxu0 %v102_v11  ;;  %v3827_v13 = vpack.c.bf16 %v103_v12, %v102_v11  ;;  %v105_v15 = vld [vmem:[#allocation2 + $0x18] sm:$0xff]  ;;  %v106_v16 = vld [vmem:[#allocation2 + $0x20] sm:$0xff]  ;;  %v107_v18 = vld [vmem:[#allocation2 + $0x28] sm:$0xff] }
  0x61   :  { %3188 = vmatprep.subr.bf16.mxu0 %v3187_v5  ;;  %v3829_v17 = vpack.c.bf16 %v105_v15, %v104_v14  ;;  %v108_v19 = vld [vmem:[#allocation2 + $0x30] sm:$0xff]  ;;  %v109_v20 = vld [vmem:[#allocation2 + $0x38] sm:$0xff]  ;;  %v126_v21 = vld [vmem:[#allocation5 + $0x40] sm:$0xff]  ;;  %v3831_v23 = vpack.c.bf16 %v107_v18, %v106_v16 }
  0x62   :  { %v127_v22 = vld [vmem:[#allocation5 + $0x48] sm:$0xff]  ;;  %v3833_v24 = vpack.c.bf16 %v109_v20, %v108_v19  ;;  %v110_v25 = vld [vmem:[#allocation2 + $0x40] sm:$0xff]  ;;  %v112_v27 = vld [vmem:[#allocation2 + $0x50] sm:$0xff] }
  0x63   :  { %v111_v26 = vld [vmem:[#allocation2 + $0x48] sm:$0xff]  ;;  %v113_v30 = vld [vmem:[#allocation2 + $0x58] sm:$0xff]  ;;  %v114_v31 = vld [vmem:[#allocation2 + $0x60] sm:$0xff]  ;;  %v3199_v40 = vpack.c.bf16 %v127_v22, %v126_v21 }
  0x64   :  { %3190 = vmatpush3.bf16.msra.mxu0 %v3187_v5  ;;  %v3835_v29 = vpack.c.bf16 %v111_v26, %v110_v25  ;;  %v115_v32 = vld [vmem:[#allocation2 + $0x68] sm:$0xff]  ;;  %v3837_v33 = vpack.c.bf16 %v113_v30, %v112_v27  ;;  %v116_v35 = vld [vmem:[#allocation2 + $0x70] sm:$0xff]  ;;  %v117_v36 = vld [vmem:[#allocation2 + $0x78] sm:$0xff] }
  0x65   :  { %3192 = vmatprep.subr.bf16.mxu0 %v3191_v9  ;;  %v3839_v34 = vpack.c.bf16 %v115_v32, %v114_v31  ;;  %v3841_v37 = vpack.c.bf16 %v117_v36, %v116_v35  ;;  %v128_v38 = vld [vmem:[#allocation5 + $0x50] sm:$0xff]  ;;  %v129_v39 = vld [vmem:[#allocation5 + $0x58] sm:$0xff]  ;;  %v130_v41 = vld [vmem:[#allocation5 + $0x60] sm:$0xff] }
  0x66   :  { %v131_v42 = vld [vmem:[#allocation5 + $0x68] sm:$0xff]  ;;  %v3203_v43 = vpack.c.bf16 %v129_v39, %v128_v38  ;;  %v132_v44 = vld [vmem:[#allocation5 + $0x70] sm:$0xff]  ;;  %v133_v45 = vld [vmem:[#allocation5 + $0x78] sm:$0xff] }
  0x67   :  { %v3207_v46 = vpack.c.bf16 %v131_v42, %v130_v41  ;;  %v3211_v47 = vpack.c.bf16 %v133_v45, %v132_v44  ;;  %v2701_v48 = vld [vmem:[%s5094_s2] ss:$0 sm:$0xff] }
  0x68   :  { %3194 = vmatpush3.bf16.msra.mxu0 %v3191_v9 }
  0x69   :  { %3196 = vmatprep.subr.bf16.mxu0 %v3195_v28 }
  0x6c   :  { %3198 = vmatpush3.bf16.msra.mxu0 %v3195_v28 }
  0x6d   :  { %3200 = vmatprep.subr.bf16.mxu0 %v3199_v40 }
  0x70   :  { %3202 = vmatpush3.bf16.msra.mxu0 %v3199_v40 }
  0x71   :  { %3204 = vmatprep.subr.bf16.mxu0 %v3203_v43 }
  0x74   :  { %3206 = vmatpush3.bf16.msra.mxu0 %v3203_v43 }
  0x75   :  { %3208 = vmatprep.subr.bf16.mxu0 %v3207_v46 }
  0x78   :  { %3210 = vmatpush3.bf16.msra.mxu0 %v3207_v46 }
  0x79   :  { %3212 = vmatprep.subr.bf16.mxu0 %v3211_v47 }
  0x7c   :  { %3214 = vmatpush3.bf16.msra.mxu0 %v3211_v47 }
  0x7f   :  { %3040 = vmatmul.mubr.f32.vlgmr.msra.gmra.mrb[0].mxu0 %v103_v12 }
  0x80   :  { %3042 = vmatprep.mubr.f32.mxu0 %v104_v14 }
  0x83   :  { %3043 = vmatmul.mubr.f32.gmra.mrb[2].mxu0 %v105_v15 }
  0x84   :  { %3045 = vmatprep.mubr.f32.mxu0 %v106_v16 }
  0x87   :  { %3046 = vmatmul.mubr.f32.gmra.mrb[4].mxu0 %v107_v18 }
  0x88   :  { %3048 = vmatprep.mubr.f32.mxu0 %v108_v19 }
  0x8b   :  { %3049 = vmatmul.mubr.f32.gmra.mrb[6].mxu0 %v109_v20 }
  0x8c   :  { %3051 = vmatprep.mubr.f32.mxu0 %v110_v25 }
  0x8f   :  { %3052 = vmatmul.mubr.f32.gmra.mrb[8].mxu0 %v111_v26 }
  0x90   :  { %3054 = vmatprep.mubr.f32.mxu0 %v112_v27 }
  0x93   :  { %3055 = vmatmul.mubr.f32.gmra.mrb[10].mxu0 %v113_v30 }
  0x94   :  { %3057 = vmatprep.mubr.f32.mxu0 %v114_v31 }
  0x97   :  { %3058 = vmatmul.mubr.f32.gmra.mrb[12].mxu0 %v115_v32 }
  0x98   :  { %3060 = vmatprep.mubr.f32.mxu0 %v116_v35 }
  0x9b   :  { %3061 = vmatmul.mubr.f32.gmra.mrb[14].mxu0 %v117_v36 }
 0x152   :  { %v3041_v49 = vpop.f32.mrb[0].mxu0 }
 0x153   :  { %v207_v50 = vpop.f32.mrb[1].mxu0  ;;  %v213_v54 = vadd.f32 %v3041_v49, %v2701_v48 }
 0x154   :  { %v208_v51 = vadd.f32 %v2701_v48, %v207_v50 }
 0x156   :  { %v3044_v52 = vpop.f32.mrb[2].mxu0  ;;  %286 = vmax.xlane.f32.xlu0 %v208_v51 }
 0x157   :  { %v217_v53 = vpop.f32.mrb[3].mxu0  ;;  %v223_v56 = vadd.f32 %v3044_v52, %v2701_v48 }
 0x158   :  { %v218_v55 = vadd.f32 %v2701_v48, %v217_v53 }
 0x15a   :  { %v3047_v57 = vpop.f32.mrb[4].mxu0  ;;  %290 = vmax.xlane.f32.xlu1 %v218_v55  ;;  %288 = vmax.xlane.f32.xlu0 %v213_v54 }
 0x15b   :  { %v227_v58 = vpop.f32.mrb[5].mxu0  ;;  %v233_v60 = vadd.f32 %v3047_v57, %v2701_v48 }
 0x15c   :  { %v228_v59 = vadd.f32 %v2701_v48, %v227_v58 }
 0x15e   :  { %v3050_v61 = vpop.f32.mrb[6].mxu0  ;;  %292 = vmax.xlane.f32.xlu1 %v223_v56  ;;  %294 = vmax.xlane.f32.xlu0 %v228_v59 }
 0x15f   :  { %v237_v62 = vpop.f32.mrb[7].mxu0  ;;  %v3846_v0 = vadd.f32 %v3050_v61, %v2701_v48 }
 0x160   :  { %v238_v63 = vadd.f32 %v2701_v48, %v237_v62 }
 0x162   :  { %v3053_v1 = vpop.f32.mrb[8].mxu0  ;;  %296 = vmax.xlane.f32.xlu1 %v233_v60  ;;  %298 = vmax.xlane.f32.xlu0 %v238_v63 }
 0x163   :  { %v247_v2 = vpop.f32.mrb[9].mxu0  ;;  %v3848_v4 = vadd.f32 %v3053_v1, %v2701_v48 }
 0x164   :  { %v248_v3 = vadd.f32 %v2701_v48, %v247_v2 }
 0x166   :  { %v3056_v5 = vpop.f32.mrb[10].mxu0  ;;  %300 = vmax.xlane.f32.xlu1 %v3846_v0  ;;  %302 = vmax.xlane.f32.xlu0 %v248_v3 }
 0x167   :  { %v257_v6 = vpop.f32.mrb[11].mxu0  ;;  %v3853_v8 = vadd.f32 %v3056_v5, %v2701_v48 }
 0x168   :  { %v3851_v7 = vadd.f32 %v2701_v48, %v257_v6 }
 0x16a   :  { %v3059_v9 = vpop.f32.mrb[12].mxu0  ;;  %304 = vmax.xlane.f32.xlu1 %v3848_v4  ;;  %306 = vmax.xlane.f32.xlu0 %v3851_v7 }
 0x16b   :  { %v267_v10 = vpop.f32.mrb[13].mxu0  ;;  %v3859_v12 = vadd.f32 %v3059_v9, %v2701_v48 }
 0x16c   :  { %v3857_v11 = vadd.f32 %v2701_v48, %v267_v10 }
 0x16e   :  { %v3062_v14 = vpop.f32.mrb[14].mxu0  ;;  %308 = vmax.xlane.f32.xlu1 %v3853_v8  ;;  %310 = vmax.xlane.f32.xlu0 %v3857_v11 }
 0x16f   :  { %v277_v15 = vpop.f32.mrb[15].mxu0  ;;  %v3865_v18 = vadd.f32 %v3062_v14, %v2701_v48 }
 0x170   :  { %v3863_v16 = vadd.f32 %v2701_v48, %v277_v15 }
 0x172   :  { %312 = vmax.xlane.f32.xlu1 %v3859_v12  ;;  %314 = vmax.xlane.f32.xlu0 %v3863_v16 }
 0x176   :  { %316 = vmax.xlane.f32.xlu1 %v3865_v18 }
 0x1e3   :  { %v287_v19 = vpop.xlane.xlu0 %286 }
 0x1e4   :  { %v318_v20 = vsub.f32 %v208_v51, %v287_v19 }
 0x1e6   :  { %v334_v21 = vmul.f32 1.442695, %v318_v20 }
 0x1e7   :  { %v291_v22 = vpop.xlane.xlu1 %290  ;;  %v289_v25 = vpop.xlane.xlu0 %288 }
 0x1e8   :  { %3417 = vpow2.f32 %v334_v21  ;;  %v320_v26 = vsub.f32 %v218_v55, %v291_v22  ;;  %v319_v27 = vsub.f32 %v213_v54, %v289_v25 }
 0x1ea   :  { %v338_v28 = vmul.f32 1.442695, %v320_v26  ;;  %v336_v30 = vmul.f32 1.442695, %v319_v27 }
 0x1eb   :  { %v293_v31 = vpop.xlane.xlu1 %292  ;;  %v295_v32 = vpop.xlane.xlu0 %294 }
 0x1ec   :  { %3419 = vpow2.f32 %v338_v28  ;;  %v321_v35 = vsub.f32 %v223_v56, %v293_v31  ;;  %v322_v36 = vsub.f32 %v228_v59, %v295_v32 }
 0x1ed   :  { %3421 = vpow2.f32 %v336_v30 }
 0x1ee   :  { %v340_v38 = vmul.f32 1.442695, %v321_v35  ;;  %v342_v39 = vmul.f32 1.442695, %v322_v36 }
 0x1ef   :  { %v297_v40 = vpop.xlane.xlu1 %296  ;;  %v299_v41 = vpop.xlane.xlu0 %298 }
 0x1f0   :  { %3423 = vpow2.f32 %v340_v38  ;;  %v323_v42 = vsub.f32 %v233_v60, %v297_v40  ;;  %v324_v43 = vsub.f32 %v238_v63, %v299_v41 }
 0x1f1   :  { %3425 = vpow2.f32 %v342_v39 }
 0x1f2   :  { %v3870_v44 = vpop.eup %3417  ;;  %v344_v45 = vmul.f32 1.442695, %v323_v42  ;;  %v346_v46 = vmul.f32 1.442695, %v324_v43 }
 0x1f3   :  { %v301_v47 = vpop.xlane.xlu1 %300  ;;  %366 = vadd.xlane.f32.xlu0 %v3870_v44  ;;  %v303_v48 = vpop.xlane.xlu0 %302 }
 0x1f4   :  { %3427 = vpow2.f32 %v344_v45  ;;  %v325_v49 = vsub.f32 %v3846_v0, %v301_v47  ;;  %v326_v50 = vsub.f32 %v248_v3, %v303_v48 }
 0x1f5   :  { %3429 = vpow2.f32 %v346_v46 }
 0x1f6   :  { %v3874_v51 = vpop.eup %3419  ;;  %v348_v52 = vmul.f32 1.442695, %v325_v49  ;;  %v350_v53 = vmul.f32 1.442695, %v326_v50 }
 0x1f7   :  { %v3876_v54 = vpop.eup %3421  ;;  %v305_v55 = vpop.xlane.xlu1 %304  ;;  %370 = vadd.xlane.f32.xlu0 %v3874_v51 }
 0x1f8   :  { %v307_v56 = vpop.xlane.xlu0 %306  ;;  %3431 = vpow2.f32 %v348_v52  ;;  %v327_v57 = vsub.f32 %v3848_v4, %v305_v55  ;;  %368 = vadd.xlane.f32.xlu1 %v3876_v54 }
 0x1f9   :  { %v328_v58 = vsub.f32 %v3851_v7, %v307_v56  ;;  %3433 = vpow2.f32 %v350_v53 }
 0x1fa   :  { %v3882_v59 = vpop.eup %3423  ;;  %v352_v60 = vmul.f32 1.442695, %v327_v57 }
 0x1fb   :  { %v354_v61 = vmul.f32 1.442695, %v328_v58  ;;  %v3884_v62 = vpop.eup %3425  ;;  %v309_v63 = vpop.xlane.xlu1 %308 }
 0x1fc   :  { %v311_v0 = vpop.xlane.xlu0 %310  ;;  %3435 = vpow2.f32 %v352_v60  ;;  %v329_v1 = vsub.f32 %v3853_v8, %v309_v63  ;;  %372 = vadd.xlane.f32.xlu1 %v3882_v59  ;;  %374 = vadd.xlane.f32.xlu0 %v3884_v62 }
 0x1fd   :  { %v330_v2 = vsub.f32 %v3857_v11, %v311_v0  ;;  %3437 = vpow2.f32 %v354_v61 }
 0x1fe   :  { %v3890_v3 = vpop.eup %3427  ;;  %v356_v4 = vmul.f32 1.442695, %v329_v1 }
 0x1ff   :  { %v358_v5 = vmul.f32 1.442695, %v330_v2  ;;  %v3892_v6 = vpop.eup %3429  ;;  %v313_v7 = vpop.xlane.xlu1 %312 }
 0x200   :  { %v315_v9 = vpop.xlane.xlu0 %314  ;;  %3439 = vpow2.f32 %v356_v4  ;;  %v331_v10 = vsub.f32 %v3859_v12, %v313_v7  ;;  %376 = vadd.xlane.f32.xlu1 %v3890_v3  ;;  %378 = vadd.xlane.f32.xlu0 %v3892_v6 }
 0x201   :  { %v332_v8 = vsub.f32 %v3863_v16, %v315_v9  ;;  %3441 = vpow2.f32 %v358_v5 }
 0x202   :  { %v3898_v11 = vpop.eup %3431  ;;  %v360_v14 = vmul.f32 1.442695, %v331_v10 }
 0x203   :  { %v362_v15 = vmul.f32 1.442695, %v332_v8  ;;  %v3900_v19 = vpop.eup %3433  ;;  %v317_v20 = vpop.xlane.xlu1 %316 }
 0x204   :  { %3443 = vpow2.f32 %v360_v14  ;;  %v333_v21 = vsub.f32 %v3865_v18, %v317_v20  ;;  %380 = vadd.xlane.f32.xlu1 %v3898_v11  ;;  %382 = vadd.xlane.f32.xlu0 %v3900_v19 }
 0x205   :  { %3445 = vpow2.f32 %v362_v15 }
 0x206   :  { %v3905_v12 = vpop.eup %3435  ;;  %v364_v22 = vmul.f32 1.442695, %v333_v21 }
 0x207   :  { %v3907_v16 = vpop.eup %3437 }
 0x208   :  { %3447 = vpow2.f32 %v364_v22  ;;  %384 = vadd.xlane.f32.xlu1 %v3905_v12  ;;  %386 = vadd.xlane.f32.xlu0 %v3907_v16 }
 0x20a   :  { %v3911_v25 = vpop.eup %3439 }
 0x20b   :  { %v3913_v26 = vpop.eup %3441 }
 0x20c   :  { %388 = vadd.xlane.f32.xlu1 %v3911_v25  ;;  %390 = vadd.xlane.f32.xlu0 %v3913_v26 }
 0x20e   :  { %v3917_v18 = vpop.eup %3443 }
 0x20f   :  { %v3919_v27 = vpop.eup %3445 }
 0x210   :  { %392 = vadd.xlane.f32.xlu1 %v3917_v18  ;;  %394 = vadd.xlane.f32.xlu0 %v3919_v27 }
 0x212   :  { %v3923_v28 = vpop.eup %3447 }
 0x214   :  { %396 = vadd.xlane.f32.xlu1 %v3923_v28 }
 0x280   :  { %v367_v30 = vpop.xlane.xlu0 %366 }
 0x281   :  { %3449 = vrcp.f32 %v367_v30 }
 0x284   :  { %v371_v31 = vpop.xlane.xlu0 %370 }
 0x285   :  { %v369_v32 = vpop.xlane.xlu1 %368  ;;  %3451 = vrcp.f32 %v371_v31 }
 0x286   :  { %3453 = vrcp.f32 %v369_v32 }
 0x289   :  { %v373_v35 = vpop.xlane.xlu1 %372  ;;  %v375_v36 = vpop.xlane.xlu0 %374 }
 0x28a   :  { %3455 = vrcp.f32 %v373_v35 }
 0x28b   :  { %v3450_v38 = vpop.eup %3449  ;;  %3457 = vrcp.f32 %v375_v36 }
 0x28c   :  { %v3927_v39 = vmul.f32 %v3450_v38, %v3870_v44 }
 0x28d   :  { %v377_v40 = vpop.xlane.xlu1 %376  ;;  %v379_v41 = vpop.xlane.xlu0 %378 }
 0x28e   :  { %430 = vst [vmem:[#allocation12] sm:$0xff] %v3927_v39  ;;  %3459 = vrcp.f32 %v377_v40  ;;  %449 = vmax.xlane.f32.xlu0 %v3927_v39 }
 0x28f   :  { %v3452_v42 = vpop.eup %3451  ;;  %3461 = vrcp.f32 %v379_v41 }
 0x290   :  { %v3454_v43 = vpop.eup %3453  ;;  %v3932_v45 = vmul.f32 %v3452_v42, %v3874_v51 }
 0x291   :  { %v3935_v46 = vmul.f32 %v3454_v43, %v3876_v54  ;;  %v381_v47 = vpop.xlane.xlu1 %380  ;;  %v383_v48 = vpop.xlane.xlu0 %382 }
 0x292   :  { %432 = vst [vmem:[#allocation12 + $0x10] sm:$0xff] %v3932_v45  ;;  %3463 = vrcp.f32 %v381_v47  ;;  %453 = vmax.xlane.f32.xlu0 %v3932_v45 }
 0x293   :  { %431 = vst [vmem:[#allocation12 + $0x8] sm:$0xff] %v3935_v46  ;;  %3465 = vrcp.f32 %v383_v48  ;;  %451 = vmax.xlane.f32.xlu1 %v3935_v46 }
 0x294   :  { %v3456_v44 = vpop.eup %3455 }
 0x295   :  { %v3458_v49 = vpop.eup %3457  ;;  %v3942_v50 = vmul.f32 %v3456_v44, %v3882_v59  ;;  %v385_v51 = vpop.xlane.xlu1 %384 }
 0x296   :  { %v387_v52 = vpop.xlane.xlu0 %386  ;;  %v3945_v53 = vmul.f32 %v3458_v49, %v3884_v62  ;;  %3467 = vrcp.f32 %v385_v51 }
 0x297   :  { %433 = vst [vmem:[#allocation12 + $0x18] sm:$0xff] %v3942_v50  ;;  %3469 = vrcp.f32 %v387_v52  ;;  %455 = vmax.xlane.f32.xlu1 %v3942_v50 }
 0x298   :  { %v3460_v54 = vpop.eup %3459  ;;  %434 = vst [vmem:[#allocation12 + $0x20] sm:$0xff] %v3945_v53  ;;  %457 = vmax.xlane.f32.xlu0 %v3945_v53 }
 0x299   :  { %v3462_v55 = vpop.eup %3461  ;;  %v3952_v56 = vmul.f32 %v3460_v54, %v3890_v3  ;;  %v389_v57 = vpop.xlane.xlu1 %388 }
 0x29a   :  { %v391_v58 = vpop.xlane.xlu0 %390  ;;  %v3955_v59 = vmul.f32 %v3462_v55, %v3892_v6  ;;  %3471 = vrcp.f32 %v389_v57 }
 0x29b   :  { %435 = vst [vmem:[#allocation12 + $0x28] sm:$0xff] %v3952_v56  ;;  %3473 = vrcp.f32 %v391_v58  ;;  %459 = vmax.xlane.f32.xlu1 %v3952_v56 }
 0x29c   :  { %v3464_v60 = vpop.eup %3463  ;;  %436 = vst [vmem:[#allocation12 + $0x30] sm:$0xff] %v3955_v59  ;;  %461 = vmax.xlane.f32.xlu0 %v3955_v59 }
 0x29d   :  { %v3466_v61 = vpop.eup %3465  ;;  %v3962_v62 = vmul.f32 %v3464_v60, %v3898_v11  ;;  %v393_v63 = vpop.xlane.xlu1 %392 }
 0x29e   :  { %v395_v0 = vpop.xlane.xlu0 %394  ;;  %v3965_v1 = vmul.f32 %v3466_v61, %v3900_v19  ;;  %3475 = vrcp.f32 %v393_v63 }
 0x29f   :  { %437 = vst [vmem:[#allocation12 + $0x38] sm:$0xff] %v3962_v62  ;;  %3477 = vrcp.f32 %v395_v0  ;;  %463 = vmax.xlane.f32.xlu1 %v3962_v62 }
 0x2a0   :  { %v3468_v2 = vpop.eup %3467  ;;  %438 = vst [vmem:[#allocation12 + $0x40] sm:$0xff] %v3965_v1  ;;  %465 = vmax.xlane.f32.xlu0 %v3965_v1 }
 0x2a1   :  { %v3470_v3 = vpop.eup %3469  ;;  %v3972_v4 = vmul.f32 %v3468_v2, %v3905_v12  ;;  %v397_v5 = vpop.xlane.xlu1 %396  ;;  %v5105_v12 = vlaneseq }
 0x2a2   :  { %v3975_v6 = vmul.f32 %v3470_v3, %v3907_v16  ;;  %3479 = vrcp.f32 %v397_v5 }
 0x2a3   :  { %439 = vst [vmem:[#allocation12 + $0x48] sm:$0xff] %v3972_v4  ;;  %467 = vmax.xlane.f32.xlu1 %v3972_v4  ;;  %v447_v22 = vand.u32 127, %v5105_v12 }
 0x2a4   :  { %v3472_v7 = vpop.eup %3471  ;;  %440 = vst [vmem:[#allocation12 + $0x50] sm:$0xff] %v3975_v6  ;;  %469 = vmax.xlane.f32.xlu0 %v3975_v6 }
 0x2a5   :  { %v3474_v9 = vpop.eup %3473  ;;  %v3982_v10 = vmul.f32 %v3472_v7, %v3911_v25  ;;  %v4007_v16 = vcvt.s32.f32 %v447_v22 }
 0x2a6   :  { %v3985_v8 = vmul.f32 %v3474_v9, %v3913_v26 }
 0x2a7   :  { %441 = vst [vmem:[#allocation12 + $0x58] sm:$0xff] %v3982_v10  ;;  %471 = vmax.xlane.f32.xlu1 %v3982_v10 }
 0x2a8   :  { %v3476_v11 = vpop.eup %3475  ;;  %442 = vst [vmem:[#allocation12 + $0x60] sm:$0xff] %v3985_v8  ;;  %473 = vmax.xlane.f32.xlu0 %v3985_v8 }
 0x2a9   :  { %v3478_v14 = vpop.eup %3477  ;;  %v3992_v15 = vmul.f32 %v3476_v11, %v3917_v18 }
 0x2aa   :  { %v3995_v19 = vmul.f32 %v3478_v14, %v3919_v27 }
 0x2ab   :  { %443 = vst [vmem:[#allocation12 + $0x68] sm:$0xff] %v3992_v15  ;;  %475 = vmax.xlane.f32.xlu1 %v3992_v15 }
 0x2ac   :  { %v3480_v20 = vpop.eup %3479  ;;  %444 = vst [vmem:[#allocation12 + $0x70] sm:$0xff] %v3995_v19  ;;  %477 = vmax.xlane.f32.xlu0 %v3995_v19 }
 0x2ad   :  { %v4002_v21 = vmul.f32 %v3480_v20, %v3923_v28 }
 0x2af   :  { %445 = vst [vmem:[#allocation12 + $0x78] sm:$0xff] %v4002_v21  ;;  %479 = vmax.xlane.f32.xlu1 %v4002_v21 }
 0x31b   :  { %v450_v25 = vpop.xlane.xlu0 %449 }
 0x31c   :  { %vm481_vm0 = vcmp.eq.f32.partialorder %v3927_v39, %v450_v25 }
 0x31d   :  { %v497_v26 = vsel %vm481_vm0, %v4007_v16, 128.0 }
 0x31e   :  { %513 = vmin.xlane.f32.xlu0 %v497_v26 }
 0x31f   :  { %v454_v18 = vpop.xlane.xlu0 %453 }
 0x320   :  { %v452_v27 = vpop.xlane.xlu1 %451  ;;  %vm483_vm1 = vcmp.eq.f32.partialorder %v3932_v45, %v454_v18 }
 0x321   :  { %vm482_vm2 = vcmp.eq.f32.partialorder %v3935_v46, %v452_v27  ;;  %v499_v28 = vsel %vm483_vm1, %v4007_v16, 128.0 }
 0x322   :  { %v498_v30 = vsel %vm482_vm2, %v4007_v16, 128.0  ;;  %517 = vmin.xlane.f32.xlu0 %v499_v28 }
 0x323   :  { %515 = vmin.xlane.f32.xlu1 %v498_v30 }
 0x324   :  { %v456_v31 = vpop.xlane.xlu1 %455 }
 0x325   :  { %v458_v32 = vpop.xlane.xlu0 %457  ;;  %vm484_vm3 = vcmp.eq.f32.partialorder %v3942_v50, %v456_v31 }
 0x326   :  { %v500_v35 = vsel %vm484_vm3, %v4007_v16, 128.0  ;;  %vm485_vm4 = vcmp.eq.f32.partialorder %v3945_v53, %v458_v32 }
 0x327   :  { %519 = vmin.xlane.f32.xlu1 %v500_v35  ;;  %v501_v36 = vsel %vm485_vm4, %v4007_v16, 128.0 }
 0x328   :  { %521 = vmin.xlane.f32.xlu0 %v501_v36  ;;  %v460_v38 = vpop.xlane.xlu1 %459 }
 0x329   :  { %v462_v40 = vpop.xlane.xlu0 %461  ;;  %vm486_vm5 = vcmp.eq.f32.partialorder %v3952_v56, %v460_v38 }
 0x32a   :  { %v502_v41 = vsel %vm486_vm5, %v4007_v16, 128.0  ;;  %vm487_vm6 = vcmp.eq.f32.partialorder %v3955_v59, %v462_v40 }
 0x32b   :  { %523 = vmin.xlane.f32.xlu1 %v502_v41  ;;  %v503_v42 = vsel %vm487_vm6, %v4007_v16, 128.0 }
 0x32c   :  { %525 = vmin.xlane.f32.xlu0 %v503_v42  ;;  %v464_v43 = vpop.xlane.xlu1 %463 }
 0x32d   :  { %v466_v47 = vpop.xlane.xlu0 %465  ;;  %vm488_vm7 = vcmp.eq.f32.partialorder %v3962_v62, %v464_v43 }
 0x32e   :  { %v504_v48 = vsel %vm488_vm7, %v4007_v16, 128.0  ;;  %vm489_vm8 = vcmp.eq.f32.partialorder %v3965_v1, %v466_v47 }
 0x32f   :  { %527 = vmin.xlane.f32.xlu1 %v504_v48  ;;  %v505_v44 = vsel %vm489_vm8, %v4007_v16, 128.0 }
 0x330   :  { %529 = vmin.xlane.f32.xlu0 %v505_v44  ;;  %v468_v49 = vpop.xlane.xlu1 %467 }
 0x331   :  { %v470_v51 = vpop.xlane.xlu0 %469  ;;  %vm490_vm9 = vcmp.eq.f32.partialorder %v3972_v4, %v468_v49 }
 0x332   :  { %v506_v52 = vsel %vm490_vm9, %v4007_v16, 128.0  ;;  %vm491_vm10 = vcmp.eq.f32.partialorder %v3975_v6, %v470_v51 }
 0x333   :  { %531 = vmin.xlane.f32.xlu1 %v506_v52  ;;  %v507_v54 = vsel %vm491_vm10, %v4007_v16, 128.0 }
 0x334   :  { %533 = vmin.xlane.f32.xlu0 %v507_v54  ;;  %v472_v55 = vpop.xlane.xlu1 %471 }
 0x335   :  { %v474_v57 = vpop.xlane.xlu0 %473  ;;  %vm492_vm11 = vcmp.eq.f32.partialorder %v3982_v10, %v472_v55 }
 0x336   :  { %v508_v58 = vsel %vm492_vm11, %v4007_v16, 128.0  ;;  %vm493_vm12 = vcmp.eq.f32.partialorder %v3985_v8, %v474_v57 }
 0x337   :  { %535 = vmin.xlane.f32.xlu1 %v508_v58  ;;  %v509_v60 = vsel %vm493_vm12, %v4007_v16, 128.0 }
 0x338   :  { %537 = vmin.xlane.f32.xlu0 %v509_v60  ;;  %v476_v61 = vpop.xlane.xlu1 %475 }
 0x339   :  { %v478_v63 = vpop.xlane.xlu0 %477  ;;  %vm494_vm13 = vcmp.eq.f32.partialorder %v3992_v15, %v476_v61 }
 0x33a   :  { %v510_v0 = vsel %vm494_vm13, %v4007_v16, 128.0  ;;  %vm495_vm14 = vcmp.eq.f32.partialorder %v3995_v19, %v478_v63 }
 0x33b   :  { %539 = vmin.xlane.f32.xlu1 %v510_v0  ;;  %v511_v2 = vsel %vm495_vm14, %v4007_v16, 128.0 }
 0x33c   :  { %541 = vmin.xlane.f32.xlu0 %v511_v2  ;;  %v480_v3 = vpop.xlane.xlu1 %479 }
 0x33d   :  { %vm496_vm15 = vcmp.eq.f32.partialorder %v4002_v21, %v480_v3 }
 0x33e   :  { %v512_v5 = vsel %vm496_vm15, %v4007_v16, 128.0 }
 0x33f   :  { %543 = vmin.xlane.f32.xlu1 %v512_v5 }
 0x3ab   :  { %v4041_v7 = vpop.xlane.xlu0 %513 }
 0x3ac   :  { %vm545_vm0 = vcmp.eq.f32.partialorder %v4007_v16, %v4041_v7 }
 0x3ad   :  { %v4049_v9 = vsel %vm545_vm0, -inf, %v3927_v39 }
 0x3ae   :  { %593 = vmax.xlane.f32.xlu0 %v4049_v9 }
 0x3af   :  { %v4052_v11 = vpop.xlane.xlu0 %517 }
 0x3b0   :  { %v4054_v14 = vpop.xlane.xlu1 %515  ;;  %vm547_vm1 = vcmp.eq.f32.partialorder %v4007_v16, %v4052_v11 }
 0x3b1   :  { %vm546_vm2 = vcmp.eq.f32.partialorder %v4007_v16, %v4054_v14  ;;  %v4064_v20 = vsel %vm547_vm1, -inf, %v3932_v45 }
 0x3b2   :  { %v4070_v22 = vsel %vm546_vm2, -inf, %v3935_v46  ;;  %597 = vmax.xlane.f32.xlu0 %v4064_v20  ;;  %v562_v7 = vsel %vm546_vm2, %v3935_v46, 0.0 }
 0x3b3   :  { %595 = vmax.xlane.f32.xlu1 %v4070_v22 }
 0x3b4   :  { %v4074_v25 = vpop.xlane.xlu1 %519 }
 0x3b5   :  { %v4076_v26 = vpop.xlane.xlu0 %521  ;;  %vm548_vm3 = vcmp.eq.f32.partialorder %v4007_v16, %v4074_v25 }
 0x3b6   :  { %v4084_v18 = vsel %vm548_vm3, -inf, %v3942_v50  ;;  %vm549_vm4 = vcmp.eq.f32.partialorder %v4007_v16, %v4076_v26 }
 0x3b7   :  { %599 = vmax.xlane.f32.xlu1 %v4084_v18  ;;  %v4093_v27 = vsel %vm549_vm4, -inf, %v3945_v53 }
 0x3b8   :  { %601 = vmax.xlane.f32.xlu0 %v4093_v27  ;;  %v4096_v28 = vpop.xlane.xlu1 %523 }
 0x3b9   :  { %v4098_v30 = vpop.xlane.xlu0 %525  ;;  %vm550_vm5 = vcmp.eq.f32.partialorder %v4007_v16, %v4096_v28 }
 0x3ba   :  { %v4106_v31 = vsel %vm550_vm5, -inf, %v3952_v56  ;;  %vm551_vm6 = vcmp.eq.f32.partialorder %v4007_v16, %v4098_v30 }
 0x3bb   :  { %603 = vmax.xlane.f32.xlu1 %v4106_v31  ;;  %v4115_v32 = vsel %vm551_vm6, -inf, %v3955_v59 }
 0x3bc   :  { %605 = vmax.xlane.f32.xlu0 %v4115_v32  ;;  %v4118_v35 = vpop.xlane.xlu1 %527 }
 0x3bd   :  { %v4120_v36 = vpop.xlane.xlu0 %529  ;;  %vm552_vm7 = vcmp.eq.f32.partialorder %v4007_v16, %v4118_v35 }
 0x3be   :  { %vm553_vm8 = vcmp.eq.f32.partialorder %v4007_v16, %v4120_v36  ;;  %v4130_v38 = vsel %vm552_vm7, -inf, %v3962_v62  ;;  %v568_v30 = vsel %vm552_vm7, %v3962_v62, 0.0 }
 0x3bf   :  { %607 = vmax.xlane.f32.xlu1 %v4130_v38  ;;  %v4137_v40 = vsel %vm553_vm8, -inf, %v3965_v1 }
 0x3c0   :  { %609 = vmax.xlane.f32.xlu0 %v4137_v40  ;;  %v4140_v41 = vpop.xlane.xlu1 %531 }
 0x3c1   :  { %v4142_v42 = vpop.xlane.xlu0 %533  ;;  %vm554_vm9 = vcmp.eq.f32.partialorder %v4007_v16, %v4140_v41 }
 0x3c2   :  { %vm555_vm10 = vcmp.eq.f32.partialorder %v4007_v16, %v4142_v42  ;;  %v4152_v43 = vsel %vm554_vm9, -inf, %v3972_v4  ;;  %v570_v36 = vsel %vm554_vm9, %v3972_v4, 0.0 }
 0x3c3   :  { %611 = vmax.xlane.f32.xlu1 %v4152_v43  ;;  %v4159_v47 = vsel %vm555_vm10, -inf, %v3975_v6 }
 0x3c4   :  { %613 = vmax.xlane.f32.xlu0 %v4159_v47  ;;  %v4162_v48 = vpop.xlane.xlu1 %535 }
 0x3c5   :  { %v4164_v44 = vpop.xlane.xlu0 %537  ;;  %vm5108_vm11 = vcmp.eq.f32.partialorder %v4007_v16, %v4162_v48  ;;  %vm5118_vm9 = vcmp.eq.f32.partialorder %v4007_v16, %v4162_v48 }
 0x3c6   :  { %vm5104_vm12 = vcmp.eq.f32.partialorder %v4007_v16, %v4164_v44  ;;  %v4174_v49 = vsel %vm5108_vm11, -inf, %v3982_v10  ;;  %v572_v42 = vsel %vm5118_vm9, %v3982_v10, 0.0 }
 0x3c7   :  { %615 = vmax.xlane.f32.xlu1 %v4174_v49  ;;  %v4181_v51 = vsel %vm5104_vm12, -inf, %v3985_v8 }
 0x3c8   :  { %617 = vmax.xlane.f32.xlu0 %v4181_v51  ;;  %v4184_v52 = vpop.xlane.xlu1 %539 }
 0x3c9   :  { %v4186_v54 = vpop.xlane.xlu0 %541  ;;  %vm5102_vm13 = vcmp.eq.f32.partialorder %v4007_v16, %v4184_v52 }
 0x3ca   :  { %vm5103_vm14 = vcmp.eq.f32.partialorder %v4007_v16, %v4186_v54  ;;  %v4196_v55 = vsel %vm5102_vm13, -inf, %v3992_v15 }
 0x3cb   :  { %619 = vmax.xlane.f32.xlu1 %v4196_v55  ;;  %v4203_v57 = vsel %vm5103_vm14, -inf, %v3995_v19 }
 0x3cc   :  { %621 = vmax.xlane.f32.xlu0 %v4203_v57  ;;  %v4206_v58 = vpop.xlane.xlu1 %543 }
 0x3cd   :  { %5117 = vst [vmem:[#allocation19_spill] sm:$0xff] %v4206_v58  ;;  %vm5107_vm15 = vcmp.eq.f32.partialorder %v4007_v16, %v4206_v58 }
 0x3ce   :  { %v4214_v60 = vsel %vm5107_vm15, -inf, %v4002_v21 }
 0x3cf   :  { %623 = vmax.xlane.f32.xlu1 %v4214_v60 }
 0x43b   :  { %v594_v61 = vpop.xlane.xlu0 %593 }
 0x43c   :  { %vm625_vm13 = vcmp.eq.f32.partialorder %v4049_v9, %v594_v61 }
 0x43d   :  { %v641_v63 = vsel %vm625_vm13, %v4007_v16, 128.0 }
 0x43e   :  { %657 = vmin.xlane.f32.xlu0 %v641_v63 }
 0x43f   :  { %v598_v0 = vpop.xlane.xlu0 %597 }
 0x440   :  { %v596_v2 = vpop.xlane.xlu1 %595  ;;  %vm627_vm14 = vcmp.eq.f32.partialorder %v4064_v20, %v598_v0 }
 0x441   :  { %vm626_vm12 = vcmp.eq.f32.partialorder %v4070_v22, %v596_v2  ;;  %v643_v3 = vsel %vm627_vm14, %v4007_v16, 128.0 }
 0x442   :  { %v642_v5 = vsel %vm626_vm12, %v4007_v16, 128.0  ;;  %661 = vmin.xlane.f32.xlu0 %v643_v3 }
 0x443   :  { %659 = vmin.xlane.f32.xlu1 %v642_v5 }
 0x444   :  { %v600_v12 = vpop.xlane.xlu1 %599 }
 0x445   :  { %v602_v58 = vpop.xlane.xlu0 %601  ;;  %vm628_vm15 = vcmp.eq.f32.partialorder %v4084_v18, %v600_v12 }
 0x446   :  { %vm629_vm11 = vcmp.eq.f32.partialorder %v4093_v27, %v602_v58  ;;  %v644_v9 = vsel %vm628_vm15, %v4007_v16, 128.0 }
 0x447   :  { %663 = vmin.xlane.f32.xlu1 %v644_v9  ;;  %v645_v61 = vsel %vm629_vm11, %v4007_v16, 128.0 }
 0x448   :  { %665 = vmin.xlane.f32.xlu0 %v645_v61  ;;  %v604_v20 = vpop.xlane.xlu1 %603 }
 0x449   :  { %v606_v22 = vpop.xlane.xlu0 %605  ;;  %vm630_vm13 = vcmp.eq.f32.partialorder %v4106_v31, %v604_v20 }
 0x44a   :  { %vm631_vm12 = vcmp.eq.f32.partialorder %v4115_v32, %v606_v22  ;;  %v646_v63 = vsel %vm630_vm13, %v4007_v16, 128.0  ;;  %v3321_v22 = vld [vmem:[#allocation7 + $0x4] ss:$20 sps:$4 sm:$0xff]  }
 0x44b   :  { %667 = vmin.xlane.f32.xlu1 %v646_v63  ;;  %v647_v0 = vsel %vm631_vm12, %v4007_v16, 128.0  ;;  %v3323_v63 = vld [vmem:[#allocation7] ss:$20 sps:$4 sm:$0xff]   ;;  %1076 = vmatprep.subr.bf16.mxu1 %v3321_v22  ;;  %v3354_v22 = vld [vmem:[#allocation7 + $0xd0] ss:$20 sps:$4 sm:$0xff]  }
 0x44c   :  { %669 = vmin.xlane.f32.xlu0 %v647_v0  ;;  %v608_v12 = vpop.xlane.xlu1 %607  ;;  %v3324_v0 = vld [vmem:[#allocation7 + $0x8] ss:$20 sps:$4 sm:$0xff]   ;;  %1077 = vmatpush1.bf16.msra.mxu1 %v3323_v63 }
 0x44d   :  { %v610_v18 = vpop.xlane.xlu0 %609  ;;  %vm632_vm14 = vcmp.eq.f32.partialorder %v4130_v38, %v608_v12  ;;  %v3326_v12 = vld [vmem:[#allocation7 + $0xc] ss:$20 sps:$4 sm:$0xff]   ;;  %v3357_v63 = vld [vmem:[#allocation7 + $0xf4] ss:$20 sps:$4 sm:$0xff]  }
 0x44e   :  { %vm633_vm15 = vcmp.eq.f32.partialorder %v4137_v40, %v610_v18  ;;  %v648_v27 = vsel %vm632_vm14, %v4007_v16, 128.0  ;;  %v3327_v18 = vld [vmem:[#allocation7 + $0x2c] ss:$20 sps:$4 sm:$0xff]   ;;  %1189 = vmatprep.subr.bf16.mxu0 %v3326_v12  ;;  %v3359_v12 = vld [vmem:[#allocation7 + $0xf0] ss:$20 sps:$4 sm:$0xff]  }
 0x44f   :  { %671 = vmin.xlane.f32.xlu1 %v648_v27  ;;  %v649_v58 = vsel %vm633_vm15, %v4007_v16, 128.0  ;;  %1190 = vmatpush1.bf16.msra.mxu0 %v3324_v0  ;;  %v3330_v27 = vld [vmem:[#allocation7 + $0x30] ss:$20 sps:$4 sm:$0xff]  }
 0x450   :  { %673 = vmin.xlane.f32.xlu0 %v649_v58  ;;  %v612_v31 = vpop.xlane.xlu1 %611  ;;  %1078 = vmatprep.subr.bf16.mxu1 %v3327_v18  ;;  %v3333_v58 = vld [vmem:[#allocation7 + $0x54] ss:$20 sps:$4 sm:$0xff]   ;;  %v3362_v0 = vld [vmem:[#allocation7 + $0xfc] ss:$20 sps:$4 sm:$0xff]   ;;  %v3360_v18 = vld [vmem:[#allocation7 + $0xf8] ss:$20 sps:$4 sm:$0xff]  }
 0x451   :  { %v614_v32 = vpop.xlane.xlu0 %613  ;;  %vm634_vm11 = vcmp.eq.f32.partialorder %v4152_v43, %v612_v31  ;;  %v3338_v31 = vld [vmem:[#allocation7 + $0x5c] ss:$20 sps:$4 sm:$0xff]  }
 0x452   :  { %vm635_vm13 = vcmp.eq.f32.partialorder %v4159_v47, %v614_v32  ;;  %v650_v2 = vsel %vm634_vm11, %v4007_v16, 128.0  ;;  %v3336_v32 = vld [vmem:[#allocation7 + $0x58] ss:$20 sps:$4 sm:$0xff]  }
 0x453   :  { %675 = vmin.xlane.f32.xlu1 %v650_v2  ;;  %v651_v3 = vsel %vm635_vm13, %v4007_v16, 128.0  ;;  %v3339_v2 = vld [vmem:[#allocation7 + $0x7c] ss:$20 sps:$4 sm:$0xff]  }
 0x454   :  { %677 = vmin.xlane.f32.xlu0 %v651_v3  ;;  %v616_v38 = vpop.xlane.xlu1 %615  ;;  %v3344_v3 = vld [vmem:[#allocation7 + $0x84] ss:$20 sps:$4 sm:$0xff]  }
 0x455   :  { %v618_v40 = vpop.xlane.xlu0 %617  ;;  %vm636_vm12 = vcmp.eq.f32.partialorder %v4174_v49, %v616_v38  ;;  %v3341_v38 = vld [vmem:[#allocation7 + $0x78] ss:$20 sps:$4 sm:$0xff]  }
 0x456   :  { %vm637_vm14 = vcmp.eq.f32.partialorder %v4181_v51, %v618_v40  ;;  %v652_v5 = vsel %vm636_vm12, %v4007_v16, 128.0  ;;  %v5109_v40 = vmov 0  }
 0x457   :  { %679 = vmin.xlane.f32.xlu1 %v652_v5  ;;  %v653_v9 = vsel %vm637_vm14, %v4007_v16, 128.0  ;;  %1108 = vmatprep.mubr.bf16.mxu1 %v5109_v40  ;;  %v3342_v5 = vld [vmem:[#allocation7 + $0x80] ss:$20 sps:$4 sm:$0xff]  }
 0x458   :  { %681 = vmin.xlane.f32.xlu0 %v653_v9  ;;  %v620_v43 = vpop.xlane.xlu1 %619  ;;  %v3345_v9 = vld [vmem:[#allocation7 + $0xa4] ss:$20 sps:$4 sm:$0xff]   ;;  %1221 = vmatprep.mubr.bf16.mxu0 %v5109_v40 }
 0x459   :  { %v622_v47 = vpop.xlane.xlu0 %621  ;;  %vm638_vm15 = vcmp.eq.f32.partialorder %v4196_v55, %v620_v43  ;;  %v3332_v55 = vld [vmem:[#allocation7 + $0x34] ss:$20 sps:$4 sm:$0xff]   ;;  %v3350_v43 = vld [vmem:[#allocation7 + $0xac] ss:$20 sps:$4 sm:$0xff]  }
 0x45a   :  { %vm639_vm11 = vcmp.eq.f32.partialorder %v4203_v57, %v622_v47  ;;  %v654_v61 = vsel %vm638_vm15, %v4007_v16, 128.0  ;;  %v3329_v57 = vld [vmem:[#allocation7 + $0x28] ss:$20 sps:$4 sm:$0xff]   ;;  %1191 = vmatprep.subr.bf16.mxu0 %v3332_v55  ;;  %v3347_v47 = vld [vmem:[#allocation7 + $0xa0] ss:$20 sps:$4 sm:$0xff]   ;;  %vm5119_vm15 = vcmp.eq.f32.partialorder %v4007_v16, %v4164_v44 }
 0x45b   :  { %683 = vmin.xlane.f32.xlu1 %v654_v61  ;;  %v655_v20 = vsel %vm639_vm11, %v4007_v16, 128.0  ;;  %1079 = vmatpush1.bf16.msra.mxu1 %v3329_v57  ;;  %v3348_v61 = vld [vmem:[#allocation7 + $0xa8] ss:$20 sps:$4 sm:$0xff]   ;;  %v3368_v57 = vld [vmem:[#allocation7 + $0x124] ss:$20 sps:$4 sm:$0xff]  }
 0x45c   :  { %685 = vmin.xlane.f32.xlu0 %v655_v20  ;;  %v624_v49 = vpop.xlane.xlu1 %623  ;;  %1192 = vmatpush1.bf16.msra.mxu0 %v3330_v27  ;;  %v3351_v20 = vld [vmem:[#allocation7 + $0xcc] ss:$20 sps:$4 sm:$0xff]   ;;  %v3363_v55 = vld [vmem:[#allocation7 + $0x11c] ss:$20 sps:$4 sm:$0xff]  }
 0x45d   :  { %vm640_vm13 = vcmp.eq.f32.partialorder %v4214_v60, %v624_v49  ;;  %v3335_v60 = vld [vmem:[#allocation7 + $0x50] ss:$20 sps:$4 sm:$0xff]   ;;  %1080 = vmatprep.subr.bf16.mxu1 %v3333_v58  ;;  %1193 = vmatprep.subr.bf16.mxu0 %v3338_v31  ;;  %v3356_v49 = vld [vmem:[#allocation7 + $0xd4] ss:$20 sps:$4 sm:$0xff]   ;;  %v3365_v31 = vld [vmem:[#allocation7 + $0x118] ss:$20 sps:$4 sm:$0xff]  }
 0x45e   :  { %v656_v51 = vsel %vm640_vm13, %v4007_v16, 128.0  ;;  %v1935_v27 = vld [vmem:[#allocation10] sm:$0xff]  ;;  %v1936_v58 = vld [vmem:[#allocation10 + $0x8] sm:$0xff]  ;;  %vm5120_vm13 = vcmp.eq.f32.partialorder %v4007_v16, %v4184_v52 }
 0x45f   :  { %687 = vmin.xlane.f32.xlu1 %v656_v51  ;;  %1081 = vmatpush1.bf16.msra.mxu1 %v3335_v60  ;;  %v3353_v51 = vld [vmem:[#allocation7 + $0xc8] ss:$20 sps:$4 sm:$0xff]   ;;  %v3366_v60 = vld [vmem:[#allocation7 + $0x120] ss:$20 sps:$4 sm:$0xff]   ;;  %v574_v44 = vsel %vm5120_vm13, %v3992_v15, 0.0 }
 0x460   :  { %1194 = vmatpush1.bf16.msra.mxu0 %v3336_v32  ;;  %1082 = vmatprep.subr.bf16.mxu1 %v3339_v2  ;;  %v3215_v32 = vpack.c.bf16 %v1936_v58, %v1935_v27  ;;  %v1937_v2 = vld [vmem:[#allocation10 + $0x10] sm:$0xff]  ;;  %v1943_v58 = vld [vmem:[#allocation10 + $0x40] sm:$0xff] }
 0x461   :  { %1195 = vmatprep.subr.bf16.mxu0 %v3344_v3  ;;  %v1938_v3 = vld [vmem:[#allocation10 + $0x18] sm:$0xff] }
 0x463   :  { %1083 = vmatpush1.bf16.msra.mxu1 %v3341_v38  ;;  %v3219_v38 = vpack.c.bf16 %v1938_v3, %v1937_v2  ;;  %v1945_v3 = vld [vmem:[#allocation10 + $0x50] sm:$0xff] }
 0x464   :  { %1196 = vmatpush1.bf16.msra.mxu0 %v3342_v5  ;;  %1084 = vmatprep.subr.bf16.mxu1 %v3345_v9  ;;  %v1939_v5 = vld [vmem:[#allocation10 + $0x20] sm:$0xff]  ;;  %v1940_v9 = vld [vmem:[#allocation10 + $0x28] sm:$0xff] }
 0x465   :  { %1197 = vmatprep.subr.bf16.mxu0 %v3350_v43  ;;  %v3223_v43 = vpack.c.bf16 %v1940_v9, %v1939_v5 }
 0x467   :  { %1085 = vmatpush1.bf16.msra.mxu1 %v3347_v47  ;;  %v1941_v47 = vld [vmem:[#allocation10 + $0x30] sm:$0xff] }
 0x468   :  { %1198 = vmatpush1.bf16.msra.mxu0 %v3348_v61  ;;  %1086 = vmatprep.subr.bf16.mxu1 %v3351_v20  ;;  %v1942_v61 = vld [vmem:[#allocation10 + $0x38] sm:$0xff] }
 0x469   :  { %1199 = vmatprep.subr.bf16.mxu0 %v3356_v49  ;;  %v3227_v20 = vpack.c.bf16 %v1942_v61, %v1941_v47  ;;  %v1947_v47 = vld [vmem:[#allocation10 + $0x60] sm:$0xff]  ;;  %v1948_v61 = vld [vmem:[#allocation10 + $0x68] sm:$0xff] }
 0x46b   :  { %1087 = vmatpush1.bf16.msra.mxu1 %v3353_v51  ;;  %v561_v51 = vsel %vm545_vm0, %v3927_v39, 0.0 }
 0x46c   :  { %1200 = vmatpush1.bf16.msra.mxu0 %v3354_v22  ;;  %1088 = vmatprep.subr.bf16.mxu1 %v3357_v63 }
 0x46d   :  { %1201 = vmatprep.subr.bf16.mxu0 %v3362_v0  ;;  %v563_v0 = vsel %vm547_vm1, %v3932_v45, 0.0 }
 0x46f   :  { %1089 = vmatpush1.bf16.msra.mxu1 %v3359_v12 }
 0x470   :  { %1202 = vmatpush1.bf16.msra.mxu0 %v3360_v18  ;;  %1090 = vmatprep.subr.bf16.mxu1 %v3363_v55  ;;  %v564_v18 = vsel %vm548_vm3, %v3942_v50, 0.0 }
 0x471   :  { %1203 = vmatprep.subr.bf16.mxu0 %v3368_v57  ;;  %v566_v57 = vsel %vm550_vm5, %v3952_v56, 0.0 }
 0x473   :  { %1091 = vmatpush1.bf16.msra.mxu1 %v3365_v31  ;;  %v1944_v31 = vld [vmem:[#allocation10 + $0x48] sm:$0xff] }
 0x474   :  { %1204 = vmatpush1.bf16.msra.mxu0 %v3366_v60 }
 0x475   :  { %3216 = vmatprep.subr.bf16.mxu0 %v3215_v32 }
 0x476   :  { %1109 = vmatmul.mubr.bf16.vlgmr.msra.gmra.mrb[0].mxu1 %v3827_v13 }
 0x477   :  { %1222 = vmatmul.mubr.bf16.vlgmr.msra.gmra.mrb[16].mxu0 %v3827_v13  ;;  %1118 = vmatprep.mubr.bf16.mxu1 %v5109_v40 }
 0x478   :  { %1231 = vmatprep.mubr.bf16.mxu0 %v5109_v40  ;;  %3218 = vmatpush3.bf16.msra.mxu0 %v3215_v32 }
 0x479   :  { %3220 = vmatprep.subr.bf16.mxu0 %v3219_v38 }
 0x47c   :  { %3222 = vmatpush3.bf16.msra.mxu0 %v3219_v38  ;;  %v1946_v38 = vld [vmem:[#allocation10 + $0x58] sm:$0xff] }
 0x47d   :  { %3224 = vmatprep.subr.bf16.mxu0 %v3223_v43  ;;  %v3235_v5 = vpack.c.bf16 %v1946_v38, %v1945_v3  ;;  %v3383_v38 = vld [vmem:[#allocation8 + $0x50] sm:$0xff]  }
 0x47e   :  { %1119 = vmatmul.mubr.bf16.gmra.mrb[4].mxu1 %v3829_v17 }
 0x47f   :  { %1232 = vmatmul.mubr.bf16.gmra.mrb[20].mxu0 %v3829_v17  ;;  %1128 = vmatprep.mubr.bf16.mxu1 %v5109_v40 }
 0x480   :  { %1241 = vmatprep.mubr.bf16.mxu0 %v5109_v40  ;;  %3226 = vmatpush3.bf16.msra.mxu0 %v3223_v43 }
 0x481   :  { %3228 = vmatprep.subr.bf16.mxu0 %v3227_v20 }
 0x484   :  { %3230 = vmatpush3.bf16.msra.mxu0 %v3227_v20  ;;  %v3239_v20 = vpack.c.bf16 %v1948_v61, %v1947_v47 }
 0x486   :  { %1129 = vmatmul.mubr.bf16.gmra.mrb[8].mxu1 %v3831_v23 }
 0x487   :  { %1242 = vmatmul.mubr.bf16.gmra.mrb[24].mxu0 %v3831_v23  ;;  %1138 = vmatprep.mubr.bf16.mxu1 %v5109_v40 }
 0x488   :  { %1251 = vmatprep.mubr.bf16.mxu0 %v5109_v40 }
 0x48e   :  { %1139 = vmatmul.mubr.bf16.gmra.mrb[12].mxu1 %v3833_v24 }
 0x48f   :  { %1252 = vmatmul.mubr.bf16.gmra.mrb[28].mxu0 %v3833_v24  ;;  %1148 = vmatprep.mubr.bf16.mxu1 %v5109_v40 }
 0x490   :  { %1261 = vmatprep.mubr.bf16.mxu0 %v5109_v40 }
 0x496   :  { %1149 = vmatmul.mubr.bf16.gmra.mrb[16].mxu1 %v3835_v29 }
 0x497   :  { %1262 = vmatmul.mubr.bf16.gmra.mrb[32].mxu0 %v3835_v29  ;;  %1158 = vmatprep.mubr.bf16.mxu1 %v5109_v40 }
 0x498   :  { %1271 = vmatprep.mubr.bf16.mxu0 %v5109_v40 }
 0x49e   :  { %1159 = vmatmul.mubr.bf16.gmra.mrb[20].mxu1 %v3837_v33 }
 0x49f   :  { %1168 = vmatprep.mubr.bf16.mxu1 %v5109_v40  ;;  %1272 = vmatmul.mubr.bf16.gmra.mrb[36].mxu0 %v3837_v33 }
 0x4a0   :  { %1281 = vmatprep.mubr.bf16.mxu0 %v5109_v40 }
 0x4a6   :  { %1169 = vmatmul.mubr.bf16.gmra.mrb[24].mxu1 %v3839_v34 }
 0x4a7   :  { %1282 = vmatmul.mubr.bf16.gmra.mrb[40].mxu0 %v3839_v34  ;;  %1178 = vmatprep.mubr.bf16.mxu1 %v5109_v40 }
 0x4a8   :  { %1291 = vmatprep.mubr.bf16.mxu0 %v5109_v40 }
 0x4ae   :  { %1179 = vmatmul.mubr.bf16.gmra.mrb[28].mxu1 %v3841_v37 }
 0x4af   :  { %1292 = vmatmul.mubr.bf16.gmra.mrb[44].mxu0 %v3841_v37  ;;  %3079 = vmatprep.mubr.bf16.mxu1 %v3827_v13 }
 0x4cb   :  { %v658_v49 = vpop.xlane.xlu0 %657 }
 0x4cc   :  { %vm689_vm12 = vcmp.eq.f32.partialorder %v4007_v16, %v658_v49 }
 0x4cd   :  { %v4288_v22 = vsel %vm689_vm12, %v3927_v39, %v561_v51 }
 0x4ce   :  { %721 = vadd.xlane.f32.xlu0 %v4288_v22 }
 0x4cf   :  { %v662_v63 = vpop.xlane.xlu0 %661 }
 0x4d0   :  { %v660_v13 = vpop.xlane.xlu1 %659  ;;  %vm691_vm14 = vcmp.eq.f32.partialorder %v4007_v16, %v662_v63  ;;  %v1949_v63 = vld [vmem:[#allocation10 + $0x70] sm:$0xff] }
 0x4d1   :  { %vm690_vm0 = vcmp.eq.f32.partialorder %v4007_v16, %v660_v13  ;;  %v4302_v39 = vsel %vm691_vm14, %v3932_v45, %v563_v0  ;;  %v565_v45 = vsel %vm549_vm4, %v3945_v53, 0.0  ;;  %v1950_v0 = vld [vmem:[#allocation10 + $0x78] sm:$0xff]  ;;  %vm5121_vm14 = vcmp.eq.f32.partialorder %v4007_v16, %v4186_v54 }
 0x4d2   :  { %v4305_v12 = vsel %vm690_vm0, %v3935_v46, %v562_v7  ;;  %725 = vadd.xlane.f32.xlu0 %v4302_v39  ;;  %v3243_v13 = vpack.c.bf16 %v1950_v0, %v1949_v63  ;;  %v3387_v63 = vld [vmem:[#allocation8 + $0x58] sm:$0xff]  }
 0x4d3   :  { %723 = vadd.xlane.f32.xlu1 %v4305_v12 }
 0x4d4   :  { %v664_v11 = vpop.xlane.xlu1 %663 }
 0x4d5   :  { %vm692_vm1 = vcmp.eq.f32.partialorder %v4007_v16, %v664_v11  ;;  %v666_v14 = vpop.xlane.xlu0 %665 }
 0x4d6   :  { %vm693_vm2 = vcmp.eq.f32.partialorder %v4007_v16, %v666_v14  ;;  %v4320_v46 = vsel %vm692_vm1, %v3942_v50, %v564_v18  ;;  %v567_v50 = vsel %vm551_vm6, %v3955_v59, 0.0  ;;  %v5122_v18 = vld [vmem:[#allocation19_spill] sm:$0xff]  ;;  %v5113_v14 = vmov 2  }
 0x4d7   :  { %727 = vadd.xlane.f32.xlu1 %v4320_v46  ;;  %v4324_v55 = vsel %vm693_vm2, %v3945_v53, %v565_v45  ;;  %vm5123_vm1 = vcmp.eq.f32.partialorder %v4007_v16, %v5122_v18  ;;  %3267 = vset.pattern.permute.xlu0 %v5113_v14  ;;  %v3369_v45 = vld [vmem:[#allocation7 + $0x10] ss:$20 sps:$4 sm:$0xff]  }
 0x4d8   :  { %729 = vadd.xlane.f32.xlu0 %v4324_v55  ;;  %v668_v25 = vpop.xlane.xlu1 %667  ;;  %v576_v54 = vsel %vm5123_vm1, %v4002_v21, 0.0  ;;  %3063 = vmatprep.subr.bf16.mxu1 %v3369_v45 }
 0x4d9   :  { %vm694_vm3 = vcmp.eq.f32.partialorder %v4007_v16, %v668_v25  ;;  %v670_v26 = vpop.xlane.xlu0 %669  ;;  %3064 = vmatpush3.bf16.msra.mxu1 %v3369_v45  ;;  %v3370_v25 = vld [vmem:[#allocation7 + $0x38] ss:$20 sps:$4 sm:$0xff]   ;;  %v3391_v45 = vld [vmem:[#allocation8 + $0x60] sm:$0xff]  }
 0x4da   :  { %vm695_vm4 = vcmp.eq.f32.partialorder %v4007_v16, %v670_v26  ;;  %v4338_v53 = vsel %vm694_vm3, %v3952_v56, %v566_v57  ;;  %v3231_v56 = vpack.c.bf16 %v1944_v31, %v1943_v58  ;;  %3065 = vmatprep.subr.bf16.mxu1 %v3370_v25  ;;  %v3371_v57 = vld [vmem:[#allocation7 + $0x60] ss:$20 sps:$4 sm:$0xff]   ;;  %v3374_v26 = vld [vmem:[#allocation7 + $0xd8] ss:$20 sps:$4 sm:$0xff]  }
 0x4db   :  { %731 = vadd.xlane.f32.xlu1 %v4338_v53  ;;  %v4342_v27 = vsel %vm695_vm4, %v3955_v59, %v567_v50  ;;  %v569_v59 = vsel %vm553_vm8, %v3965_v1, 0.0  ;;  %v3375_v50 = vld [vmem:[#allocation7 + $0x100] ss:$20 sps:$4 sm:$0xff]  }
 0x4dc   :  { %733 = vadd.xlane.f32.xlu0 %v4342_v27  ;;  %v672_v28 = vpop.xlane.xlu1 %671  ;;  %3232 = vmatprep.subr.bf16.mxu0 %v3231_v56 }
 0x4dd   :  { %vm696_vm5 = vcmp.eq.f32.partialorder %v4007_v16, %v672_v28  ;;  %v674_v60 = vpop.xlane.xlu0 %673  ;;  %3234 = vmatpush3.bf16.msra.mxu0 %v3231_v56  ;;  %3066 = vmatpush3.bf16.msra.mxu1 %v3370_v25  ;;  %v3376_v28 = vld [vmem:[#allocation7 + $0x128] ss:$20 sps:$4 sm:$0xff]   ;;  %v3389_v25 = vld [vmem:[#allocation8 + $0xd0] sm:$0xff]  }
 0x4de   :  { %vm697_vm6 = vcmp.eq.f32.partialorder %v4007_v16, %v674_v60  ;;  %v4356_v32 = vsel %vm696_vm5, %v3962_v62, %v568_v30  ;;  %3236 = vmatprep.subr.bf16.mxu0 %v3235_v5  ;;  %3067 = vmatprep.subr.bf16.mxu1 %v3371_v57  ;;  %v3377_v60 = vld [vmem:[#allocation8 + $0x40] sm:$0xff]   ;;  %v3379_v56 = vld [vmem:[#allocation8 + $0x48] sm:$0xff]  }
 0x4df   :  { %735 = vadd.xlane.f32.xlu1 %v4356_v32  ;;  %v4360_v2 = vsel %vm697_vm6, %v3965_v1, %v569_v59  ;;  %v571_v1 = vsel %vm555_vm10, %v3975_v6, 0.0  ;;  %v3381_v59 = vld [vmem:[#allocation8 + $0xc0] sm:$0xff]  }
 0x4e0   :  { %737 = vadd.xlane.f32.xlu0 %v4360_v2  ;;  %v676_v35 = vpop.xlane.xlu1 %675 }
 0x4e1   :  { %vm698_vm7 = vcmp.eq.f32.partialorder %v4007_v16, %v676_v35  ;;  %v678_v62 = vpop.xlane.xlu0 %677  ;;  %3238 = vmatpush3.bf16.msra.mxu0 %v3235_v5  ;;  %3068 = vmatpush3.bf16.msra.mxu1 %v3371_v57  ;;  %v3384_v5 = vld [vmem:[#allocation8 + $0x10] sm:$0xff]   ;;  %v3392_v57 = vld [vmem:[#allocation8 + $0x20] sm:$0xff]  }
 0x4e2   :  { %vm699_vm8 = vcmp.eq.f32.partialorder %v4007_v16, %v678_v62  ;;  %v4374_v9 = vsel %vm698_vm7, %v3972_v4, %v570_v36  ;;  %3240 = vmatprep.subr.bf16.mxu0 %v3239_v20 }
 0x4e3   :  { %739 = vadd.xlane.f32.xlu1 %v4374_v9  ;;  %v4378_v43 = vsel %vm699_vm8, %v3975_v6, %v571_v1  ;;  %v573_v6 = vsel %vm5119_vm15, %v3985_v8, 0.0 }
 0x4e4   :  { %741 = vadd.xlane.f32.xlu0 %v4378_v43  ;;  %v680_v41 = vpop.xlane.xlu1 %679 }
 0x4e5   :  { %vm700_vm10 = vcmp.eq.f32.partialorder %v4007_v16, %v680_v41  ;;  %v682_v4 = vpop.xlane.xlu0 %681  ;;  %3242 = vmatpush3.bf16.msra.mxu0 %v3239_v20 }
 0x4e6   :  { %vm701_vm11 = vcmp.eq.f32.partialorder %v4007_v16, %v682_v4  ;;  %v4392_v49 = vsel %vm700_vm10, %v3982_v10, %v572_v42  ;;  %3244 = vmatprep.subr.bf16.mxu0 %v3243_v13 }
 0x4e7   :  { %743 = vadd.xlane.f32.xlu1 %v4392_v49  ;;  %v4396_v51 = vsel %vm701_vm11, %v3985_v8, %v573_v6  ;;  %v575_v8 = vsel %vm5121_vm14, %v3995_v19, 0.0 }
 0x4e8   :  { %745 = vadd.xlane.f32.xlu0 %v4396_v51  ;;  %v684_v48 = vpop.xlane.xlu1 %683 }
 0x4e9   :  { %vm702_vm12 = vcmp.eq.f32.partialorder %v4007_v16, %v684_v48  ;;  %v686_v10 = vpop.xlane.xlu0 %685  ;;  %3246 = vmatpush3.bf16.msra.mxu0 %v3243_v13  ;;  %v3382_v48 = vld [vmem:[#allocation8 + $0x80] sm:$0xff]  }
 0x4ea   :  { %vm703_vm0 = vcmp.eq.f32.partialorder %v4007_v16, %v686_v10  ;;  %v4410_v7 = vsel %vm702_vm12, %v3992_v15, %v574_v44  ;;  %2927 = vmatprep.subr.bf16.mxu0 %v3381_v59  ;;  %v3385_v44 = vld [vmem:[#allocation8 + $0xc8] sm:$0xff]   ;;  %v3388_v10 = vld [vmem:[#allocation8 + $0x18] sm:$0xff]  }
 0x4eb   :  { %747 = vadd.xlane.f32.xlu1 %v4410_v7  ;;  %v4414_v11 = vsel %vm703_vm0, %v3995_v19, %v575_v8  ;;  %v5115_v19 = vmov 1  }
 0x4ec   :  { %749 = vadd.xlane.f32.xlu0 %v4414_v11  ;;  %v688_v52 = vpop.xlane.xlu1 %687  ;;  %3264 = vset.pattern.permute.xlu1 %v5115_v19 }
 0x4ed   :  { %vm704_vm2 = vcmp.eq.f32.partialorder %v4007_v16, %v688_v52  ;;  %v3372_v16 = vld [vmem:[#allocation7 + $0x88] ss:$20 sps:$4 sm:$0xff]  }
 0x4ee   :  { %v4423_v15 = vsel %vm704_vm2, %v4002_v21, %v576_v54  ;;  %3069 = vmatprep.subr.bf16.mxu1 %v3372_v16  ;;  %v3373_v21 = vld [vmem:[#allocation7 + $0xb0] ss:$20 sps:$4 sm:$0xff]   ;;  %v3386_v54 = vld [vmem:[#allocation8 + $0x88] sm:$0xff]  }
 0x4ef   :  { %751 = vadd.xlane.f32.xlu1 %v4423_v15  ;;  %3070 = vmatpush3.bf16.msra.mxu1 %v3372_v16 }
 0x4f0   :  { %3071 = vmatprep.subr.bf16.mxu1 %v3373_v21 }
 0x4f3   :  { %3072 = vmatpush3.bf16.msra.mxu1 %v3373_v21 }
 0x4f4   :  { %3073 = vmatprep.subr.bf16.mxu1 %v3374_v26 }
 0x4f7   :  { %3074 = vmatpush3.bf16.msra.mxu1 %v3374_v26 }
 0x4f8   :  { %3075 = vmatprep.subr.bf16.mxu1 %v3375_v50 }
 0x4fb   :  { %3076 = vmatpush3.bf16.msra.mxu1 %v3375_v50 }
 0x4fc   :  { %3077 = vmatprep.subr.bf16.mxu1 %v3376_v28 }
 0x4ff   :  { %3078 = vmatpush3.bf16.msra.mxu1 %v3376_v28 }
 0x500   :  { %2863 = vmatprep.subr.bf16.mxu1 %v3377_v60 }
 0x502   :  { %3080 = vmatmul.mubr.bf16.vlgmr.msra.gmra.mrb[32].mxu1 %v3829_v17  ;;  %v3378_v17 = vld [vmem:[#allocation8] sm:$0xff]  }
 0x503   :  { %3083 = vmatprep.mubr.bf16.mxu1 %v3831_v23  ;;  %2864 = vmatpush3.bf16.msra.mxu1 %v3378_v17  ;;  %v3393_v17 = vld [vmem:[#allocation8 + $0xd8] sm:$0xff]  }
 0x504   :  { %2865 = vmatprep.subr.bf16.mxu1 %v3379_v56 }
 0x50a   :  { %3084 = vmatmul.mubr.bf16.gmra.mrb[36].mxu1 %v3833_v24 }
 0x50b   :  { %3087 = vmatprep.mubr.bf16.mxu1 %v3835_v29 }
 0x512   :  { %3088 = vmatmul.mubr.bf16.gmra.mrb[40].mxu1 %v3837_v33 }
 0x513   :  { %3091 = vmatprep.mubr.bf16.mxu1 %v3839_v34  ;;  %v3380_v34 = vld [vmem:[#allocation8 + $0x8] sm:$0xff]  }
 0x514   :  { %2866 = vmatpush3.bf16.msra.mxu1 %v3380_v34 }
 0x515   :  { %2867 = vmatprep.subr.bf16.mxu1 %v3383_v38  ;;  %v3396_v38 = vld [vmem:[#allocation8 + $0x28] sm:$0xff]  }
 0x518   :  { %2868 = vmatpush3.bf16.msra.mxu1 %v3384_v5 }
 0x519   :  { %2869 = vmatprep.subr.bf16.mxu1 %v3387_v63 }
 0x51a   :  { %3092 = vmatmul.mubr.bf16.gmra.mrb[44].mxu1 %v3841_v37 }
 0x51c   :  { %2870 = vmatpush3.bf16.msra.mxu1 %v3388_v10 }
 0x51d   :  { %2871 = vmatprep.subr.bf16.mxu1 %v3391_v45  ;;  %v3398_v45 = vld [vmem:[#allocation8 + $0xa0] sm:$0xff]  }
 0x520   :  { %2872 = vmatpush3.bf16.msra.mxu1 %v3392_v57  ;;  %v3401_v57 = vld [vmem:[#allocation8 + $0xe8] sm:$0xff]  }
 0x549   :  { %v4435_v33 = vpop.f32.mrb[0].mxu1 }
 0x54a   :  { %v4440_v37 = vpop.f32.mrb[1].mxu1  ;;  %v4442_v3 = vpop.f32.mrb[16].mxu0 }
 0x54b   :  { %v4444_v62 = vpop.f32.mrb[2].mxu1  ;;  %v4447_v41 = vpop.f32.mrb[17].mxu0 }
 0x54c   :  { %v4449_v47 = vpop.f32.mrb[3].mxu1  ;;  %v4451_v61 = vpop.f32.mrb[18].mxu0 }
 0x54d   :  { %v4481_v28 = vpop.f32.mrb[19].mxu0 }
 0x55b   :  { %v722_v58 = vpop.xlane.xlu0 %721 }
 0x55c   :  { %3481 = vrcp.f32 %v722_v58  ;;  %v3390_v58 = vld [vmem:[#allocation8 + $0x90] sm:$0xff]  }
 0x55f   :  { %v726_v31 = vpop.xlane.xlu0 %725 }
 0x560   :  { %v724_v30 = vpop.xlane.xlu1 %723  ;;  %3483 = vrcp.f32 %v726_v31  ;;  %v4485_v31 = vpop.f32.mrb[4].mxu1 }
 0x561   :  { %3485 = vrcp.f32 %v724_v30  ;;  %v3395_v30 = vld [vmem:[#allocation8 + $0x68] sm:$0xff]  }
 0x562   :  { %2873 = vmatprep.subr.bf16.mxu1 %v3395_v30 }
 0x563   :  { %2874 = vmatpush3.bf16.msra.mxu1 %v3396_v38  ;;  %v3406_v38 = vld [vmem:[#allocation8 + $0xb0] sm:$0xff]  }
 0x564   :  { %v728_v23 = vpop.xlane.xlu1 %727 }
 0x565   :  { %3487 = vrcp.f32 %v728_v23  ;;  %v730_v24 = vpop.xlane.xlu0 %729  ;;  %v4491_v23 = vpop.f32.mrb[5].mxu1 }
 0x566   :  { %v3482_v29 = vpop.eup %3481  ;;  %3489 = vrcp.f32 %v730_v24 }
 0x567   :  { %v4438_v35 = vmul.f32 %v3482_v29, %v4288_v22 }
 0x568   :  { %v732_v36 = vpop.xlane.xlu1 %731 }
 0x569   :  { %3491 = vrcp.f32 %v732_v36  ;;  %v734_v1 = vpop.xlane.xlu0 %733  ;;  %3127 = vmatprep.mubr.f32.mxu0 %v4438_v35 }
 0x56a   :  { %v3484_v22 = vpop.eup %3483  ;;  %3493 = vrcp.f32 %v734_v1  ;;  %v4505_v1 = vpop.f32.mrb[6].mxu1 }
 0x56b   :  { %v3486_v42 = vpop.eup %3485  ;;  %v4454_v4 = vmul.f32 %v3484_v22, %v4302_v39 }
 0x56c   :  { %v736_v20 = vpop.xlane.xlu1 %735  ;;  %v4457_v6 = vmul.f32 %v3486_v42, %v4305_v12  ;;  %v4509_v42 = vpop.f32.mrb[7].mxu1 }
 0x56d   :  { %3495 = vrcp.f32 %v736_v20  ;;  %v738_v0 = vpop.xlane.xlu0 %737 }
 0x56e   :  { %3497 = vrcp.f32 %v738_v0  ;;  %1580 = vperm.xlu1 %3264, %v4457_v6   ;;  %1660 = vperm.xlu0 %3267, %v4457_v6  }
 0x56f   :  { %v3488_v13 = vpop.eup %3487  ;;  %3128 = vmatmul.mubr.f32.vlgmr.msra.gmra.mrb[48].mxu0 %v4457_v6 }
 0x570   :  { %v3490_v39 = vpop.eup %3489  ;;  %3130 = vmatprep.mubr.f32.mxu0 %v4454_v4  ;;  %v740_v12 = vpop.xlane.xlu1 %739  ;;  %v4464_v8 = vmul.f32 %v3488_v13, %v4320_v46  ;;  %2928 = vmatpush3.bf16.msra.mxu0 %v3382_v48 }
 0x571   :  { %v4467_v52 = vmul.f32 %v3490_v39, %v4324_v55  ;;  %3499 = vrcp.f32 %v740_v12  ;;  %v742_v18 = vpop.xlane.xlu0 %741  ;;  %2929 = vmatprep.subr.bf16.mxu0 %v3385_v44  ;;  %v3399_v44 = vld [vmem:[#allocation8 + $0x70] sm:$0xff]  }
 0x572   :  { %3501 = vrcp.f32 %v742_v18  ;;  %3265 = vset.pattern.permute.xlu1 %v5109_v40  ;;  %3268 = vset.pattern.permute.xlu0 %v5115_v19  ;;  %v3400_v39 = vld [vmem:[#allocation8 + $0x30] sm:$0xff]  }
 0x573   :  { %v3492_v16 = vpop.eup %3491  ;;  %3131 = vmatmul.mubr.f32.gmra.mrb[50].mxu0 %v4464_v8  ;;  %1486 = vperm.xlu1 %3265, %v4457_v6  }
 0x574   :  { %v3494_v46 = vpop.eup %3493  ;;  %v4474_v55 = vmul.f32 %v3492_v16, %v4338_v53  ;;  %1576 = vperm.xlu0 %3268, %v4438_v35   ;;  %3133 = vmatprep.mubr.f32.mxu0 %v4467_v52  ;;  %v744_v21 = vpop.xlane.xlu1 %743  ;;  %v3403_v16 = vld [vmem:[#allocation8 + $0x78] sm:$0xff]  }
 0x575   :  { %v4479_v26 = vmul.f32 %v3494_v46, %v4342_v27  ;;  %3503 = vrcp.f32 %v744_v21  ;;  %v746_v50 = vpop.xlane.xlu0 %745  ;;  %2930 = vmatpush3.bf16.msra.mxu0 %v3386_v54  ;;  %v4483_v53 = vpop.f32.mrb[20].mxu0  ;;  %v5111_v27 = vmov 3   ;;  %2875 = vmatprep.subr.bf16.mxu1 %v3399_v44  ;;  %v3404_v46 = vld [vmem:[#allocation8 + $0x38] sm:$0xff]  }
 0x576   :  { %3505 = vrcp.f32 %v746_v50  ;;  %2931 = vmatprep.subr.bf16.mxu0 %v3389_v25  ;;  %v4489_v56 = vpop.f32.mrb[21].mxu0  ;;  %2876 = vmatpush3.bf16.msra.mxu1 %v3400_v39 }
 0x577   :  { %v3496_v60 = vpop.eup %3495  ;;  %3134 = vmatmul.mubr.f32.gmra.mrb[52].mxu0 %v4474_v55  ;;  %3266 = vset.pattern.permute.xlu1 %v5111_v27  ;;  %v4498_v59 = vpop.f32.mrb[22].mxu0 }
 0x578   :  { %v3498_v24 = vpop.eup %3497  ;;  %v4494_v29 = vmul.f32 %v3496_v60, %v4356_v32  ;;  %3270 = vset.pattern.permute.xlu0 %v5111_v27  ;;  %3136 = vmatprep.mubr.f32.mxu0 %v4479_v26  ;;  %v748_v34 = vpop.xlane.xlu1 %747  ;;  %v3394_v32 = vld [vmem:[#allocation8 + $0x98] sm:$0xff]  }
 0x579   :  { %v4501_v36 = vmul.f32 %v3498_v24, %v4360_v2  ;;  %1740 = vperm.xlu1 %3266, %v4457_v6   ;;  %3507 = vrcp.f32 %v748_v34  ;;  %1736 = vperm.xlu0 %3270, %v4438_v35   ;;  %v750_v5 = vpop.xlane.xlu0 %749  ;;  %v4507_v22 = vpop.f32.mrb[23].mxu0  ;;  %v3397_v2 = vld [vmem:[#allocation8 + $0xe0] sm:$0xff]  }
 0x57a   :  { %3509 = vrcp.f32 %v750_v5  ;;  %2932 = vmatpush3.bf16.msra.mxu0 %v3390_v58  ;;  %v4512_v6 = vpop.f32.mrb[8].mxu1  ;;  %v3402_v58 = vld [vmem:[#allocation8 + $0xa8] sm:$0xff]   ;;  %2877 = vmatprep.subr.bf16.mxu1 %v3403_v16  ;;  %v4550_v30 = vpop.f32.mrb[24].mxu0 }
 0x57b   :  { %v3500_v20 = vpop.eup %3499  ;;  %3137 = vmatmul.mubr.f32.gmra.mrb[54].mxu0 %v4494_v29  ;;  %2933 = vmatprep.subr.bf16.mxu0 %v3393_v17  ;;  %v4518_v10 = vpop.f32.mrb[9].mxu1 }
 0x57c   :  { %v3502_v48 = vpop.eup %3501  ;;  %v4515_v63 = vmul.f32 %v3500_v20, %v4374_v9  ;;  %3139 = vmatprep.mubr.f32.mxu0 %v4501_v36  ;;  %v752_v0 = vpop.xlane.xlu1 %751  ;;  %2878 = vmatpush3.bf16.msra.mxu1 %v3404_v46  ;;  %v3408_v20 = vld [vmem:[#allocation8 + $0xb8] sm:$0xff]  }
 0x57d   :  { %v4521_v13 = vmul.f32 %v3502_v48, %v4378_v43  ;;  %3269 = vset.pattern.permute.xlu1 %v5109_v40  ;;  %3511 = vrcp.f32 %v752_v0  ;;  %1748 = vperm.xlu0 %3270, %v4464_v8   ;;  %v4525_v12 = vpop.f32.mrb[10].mxu1  ;;  %v4553_v60 = vpop.f32.mrb[25].mxu0 }
 0x57e   :  { %1481 = vperm.xlu1 %3269, %v4438_v35   ;;  %2934 = vmatpush3.bf16.msra.mxu0 %v3394_v32  ;;  %v4528_v9 = vpop.f32.mrb[11].mxu1  ;;  %v3407_v32 = vld [vmem:[#allocation8 + $0xf8] sm:$0xff]  }
 0x57f   :  { %v3504_v18 = vpop.eup %3503  ;;  %3140 = vmatmul.mubr.f32.gmra.mrb[56].mxu0 %v4515_v63  ;;  %2935 = vmatprep.subr.bf16.mxu0 %v3397_v2  ;;  %v4580_v2 = vpop.f32.mrb[12].mxu1 }
 0x580   :  { %v3506_v54 = vpop.eup %3505  ;;  %v4532_v43 = vmul.f32 %v3504_v18, %v4392_v49  ;;  %3142 = vmatprep.mubr.f32.mxu0 %v4521_v13  ;;  %v4595_v18 = vpop.f32.mrb[13].mxu1 }
 0x581   :  { %v4536_v25 = vmul.f32 %v3506_v54, %v4396_v51  ;;  %3279 = vset.pattern.permute.xlu0 %v5115_v19  ;;  %v4602_v54 = vpop.f32.mrb[14].mxu1 }
 0x582   :  { %3271 = vset.pattern.permute.xlu1 %v5113_v14  ;;  %1596 = vperm.xlu0 %3279, %v4474_v55  }
 0x583   :  { %v3508_v21 = vpop.eup %3507  ;;  %1656 = vperm.xlu1 %3271, %v4438_v35   ;;  %3143 = vmatmul.mubr.f32.gmra.mrb[58].mxu0 %v4532_v43  ;;  %v3405_v35 = vld [vmem:[#allocation8 + $0xf0] sm:$0xff]  }
 0x584   :  { %v3510_v49 = vpop.eup %3509  ;;  %v4544_v50 = vmul.f32 %v3508_v21, %v4410_v7  ;;  %3145 = vmatprep.mubr.f32.mxu0 %v4536_v25  ;;  %2936 = vmatpush3.bf16.msra.mxu0 %v3398_v45  ;;  %v4557_v7 = vpop.f32.mrb[26].mxu0 }
 0x585   :  { %v4548_v51 = vmul.f32 %v3510_v49, %v4414_v11  ;;  %2937 = vmatprep.subr.bf16.mxu0 %v3401_v57  ;;  %v4564_v24 = vpop.f32.mrb[27].mxu0  ;;  %v4605_v45 = vpop.f32.mrb[15].mxu1 }
 0x586   :  { %3280 = vset.pattern.permute.xlu0 %v5109_v40  ;;  %v4567_v34 = vpop.f32.mrb[28].mxu0  ;;  %v4607_v57 = vpop.f32.mrb[16].mxu1 }
 0x587   :  { %v3512_v17 = vpop.eup %3511  ;;  %3272 = vset.pattern.permute.xlu1 %v5115_v19  ;;  %1506 = vperm.xlu0 %3280, %v4474_v55   ;;  %v4569_v5 = vpop.f32.mrb[29].mxu0 }
 0x588   :  { %v4560_v11 = vmul.f32 %v3512_v17, %v4423_v15  ;;  %3146 = vmatmul.mubr.f32.gmra.mrb[60].mxu0 %v4544_v50  ;;  %1588 = vperm.xlu1 %3272, %v4464_v8   ;;  %v4572_v15 = vpop.f32.mrb[30].mxu0  ;;  %v4609_v16 = vpop.f32.mrb[17].mxu1 }
 0x589   :  { %3148 = vmatprep.mubr.f32.mxu0 %v4548_v51  ;;  %2938 = vmatpush3.bf16.msra.mxu0 %v3402_v58  ;;  %v4586_v48 = vpop.f32.mrb[31].mxu0  ;;  %5128 = vst [vmem:[#allocation23_spill] sm:$0xff] %v4609_v16  ;;  %v4612_v46 = vpop.f32.mrb[18].mxu1 }
 0x58a   :  { %2939 = vmatprep.subr.bf16.mxu0 %v3405_v35  ;;  %v4589_v0 = vpop.f32.mrb[32].mxu0  ;;  %5129 = vst [vmem:[#allocation24_spill] sm:$0xff] %v4612_v46  ;;  %v4615_v21 = vpop.f32.mrb[19].mxu1 }
 0x58b   :  { %3286 = vset.pattern.permute.xlu0 %v5113_v14  ;;  %5124 = vst [vmem:[#allocation19_spill] sm:$0xff] %v4589_v0  ;;  %v4591_v44 = vpop.f32.mrb[33].mxu0  ;;  %5130 = vst [vmem:[#allocation25_spill] sm:$0xff] %v4615_v21  ;;  %v4618_v49 = vpop.f32.mrb[20].mxu1 }
 0x58c   :  { %3149 = vmatmul.mubr.f32.gmra.mrb[62].mxu0 %v4560_v11  ;;  %3273 = vset.pattern.permute.xlu1 %v5109_v40  ;;  %5125 = vst [vmem:[#allocation20_spill] sm:$0xff] %v4591_v44  ;;  %v4593_v39 = vpop.f32.mrb[34].mxu0  ;;  %5131 = vst [vmem:[#allocation26_spill] sm:$0xff] %v4618_v49  ;;  %v4620_v58 = vpop.f32.mrb[21].mxu1 }
 0x58d   :  { %1672 = vperm.xlu0 %3286, %v4467_v52   ;;  %1496 = vperm.xlu1 %3273, %v4464_v8   ;;  %5126 = vst [vmem:[#allocation21_spill] sm:$0xff] %v4593_v39  ;;  %5132 = vst [vmem:[#allocation27_spill] sm:$0xff] %v4620_v58  ;;  %v4623_v35 = vpop.f32.mrb[22].mxu1  ;;  %v5141_v39 = vmov 3  }
 0x58e   :  { %2940 = vmatpush3.bf16.msra.mxu0 %v3406_v38  ;;  %5133 = vst [vmem:[#allocation28_spill] sm:$0xff] %v4623_v35  ;;  %v4629_v17 = vpop.f32.mrb[23].mxu1  ;;  %v3409_v35 = vld [vmem:[#allocation8 + $0x100] sm:$0xff]  }
 0x58f   :  { %2941 = vmatprep.subr.bf16.mxu0 %v3407_v32  ;;  %5134 = vst [vmem:[#allocation29_spill] sm:$0xff] %v4629_v17  ;;  %v4631_v38 = vpop.f32.mrb[24].mxu1  ;;  %3151 = vmatprep.subr.bf16.mxu1 %v3409_v35 }
 0x590   :  { %5135 = vst [vmem:[#allocation30_spill] sm:$0xff] %v4631_v38  ;;  %v4634_v32 = vpop.f32.mrb[25].mxu1 }
 0x591   :  { %1684 = vperm.xlu0 %3286, %v4494_v29   ;;  %3274 = vset.pattern.permute.xlu1 %v5113_v14  ;;  %5136 = vst [vmem:[#allocation31_spill] sm:$0xff] %v4634_v32 }
 0x592   :  { %1668 = vperm.xlu1 %3274, %v4464_v8   ;;  %2942 = vmatpush3.bf16.msra.mxu0 %v3408_v20  ;;  %v4598_v8 = vpop.f32.mrb[35].mxu0  ;;  %v4637_v20 = vpop.f32.mrb[26].mxu1 }
 0x593   :  { %5127 = vst [vmem:[#allocation22_spill] sm:$0xff] %v4598_v8  ;;  %5137 = vst [vmem:[#allocation32_spill] sm:$0xff] %v4637_v20 }
 0x595   :  { %3291 = vset.pattern.permute.xlu0 %v5109_v40 }
 0x596   :  { %1511 = vperm.xlu0 %3291, %v4479_v26   ;;  %3275 = vset.pattern.permute.xlu1 %v5115_v19 }
 0x597   :  { %1584 = vperm.xlu1 %3275, %v4454_v4  }
 0x59a   :  { %3292 = vset.pattern.permute.xlu0 %v5111_v27 }
 0x59b   :  { %1760 = vperm.xlu0 %3292, %v4479_v26   ;;  %3276 = vset.pattern.permute.xlu1 %v5109_v40 }
 0x59c   :  { %1491 = vperm.xlu1 %3276, %v4454_v4  }
 0x59f   :  { %1772 = vperm.xlu0 %3292, %v4515_v63  }
 0x5a0   :  { %3277 = vset.pattern.permute.xlu1 %v5111_v27 }
 0x5a1   :  { %1744 = vperm.xlu1 %3277, %v4454_v4  }
 0x5a3   :  { %3297 = vset.pattern.permute.xlu0 %v5109_v40  ;;  %v4640_v40 = vpop.f32.mrb[27].mxu1 }
 0x5a4   :  { %1521 = vperm.xlu0 %3297, %v4501_v36   ;;  %5138 = vst [vmem:[#allocation33_spill] sm:$0xff] %v4640_v40  ;;  %v4654_v0 = vpop.f32.mrb[28].mxu1 }
 0x5a5   :  { %3278 = vset.pattern.permute.xlu1 %v5113_v14  ;;  %5142 = vst [vmem:[#allocation36_spill] sm:$0xff] %v4654_v0 }
 0x5a6   :  { %1664 = vperm.xlu1 %3278, %v4454_v4   ;;  %v4643_v4 = vpop.f32.mrb[36].mxu0 }
 0x5a7   :  { %5139 = vst [vmem:[#allocation34_spill] sm:$0xff] %v4643_v4 }
 0x5a8   :  { %1536 = vperm.xlu0 %3297, %v4532_v43  }
 0x5aa   :  { %3281 = vset.pattern.permute.xlu1 %v5111_v27  ;;  %v4648_v27 = vpop.f32.mrb[37].mxu0 }
 0x5ab   :  { %1756 = vperm.xlu1 %3281, %v4474_v55   ;;  %5140 = vst [vmem:[#allocation35_spill] sm:$0xff] %v4648_v27  ;;  %v4656_v20 = vpop.f32.mrb[38].mxu0 }
 0x5ac   :  { %3301 = vset.pattern.permute.xlu0 %v5115_v19  ;;  %5143 = vst [vmem:[#allocation37_spill] sm:$0xff] %v4656_v20  ;;  %v4658_v4 = vpop.f32.mrb[39].mxu0  ;;  %v5150_v20 = vmov 2  }
 0x5ad   :  { %1616 = vperm.xlu0 %3301, %v4521_v13   ;;  %5144 = vst [vmem:[#allocation38_spill] sm:$0xff] %v4658_v4 }
 0x5af   :  { %3282 = vset.pattern.permute.xlu1 %v5113_v14  ;;  %v5145_v14 = vmov 0  }
 0x5b0   :  { %1676 = vperm.xlu1 %3282, %v4474_v55   ;;  %v4664_v55 = vpop.f32.mrb[40].mxu0 }
 0x5b1   :  { %1628 = vperm.xlu0 %3301, %v4544_v50   ;;  %5146 = vst [vmem:[#allocation39_spill] sm:$0xff] %v4664_v55 }
 0x5b4   :  { %3283 = vset.pattern.permute.xlu1 %v5115_v19  ;;  %v4666_v19 = vpop.f32.mrb[41].mxu0 }
 0x5b5   :  { %3309 = vset.pattern.permute.xlu0 %v5141_v39  ;;  %1592 = vperm.xlu1 %3283, %v4467_v52   ;;  %5147 = vst [vmem:[#allocation40_spill] sm:$0xff] %v4666_v19  ;;  %v4668_v27 = vpop.f32.mrb[42].mxu0  ;;  %v5155_v19 = vmov 1  }
 0x5b6   :  { %1776 = vperm.xlu0 %3309, %v4521_v13   ;;  %5148 = vst [vmem:[#allocation41_spill] sm:$0xff] %v4668_v27  ;;  %v4671_v0 = vpop.f32.mrb[43].mxu0 }
 0x5b7   :  { %5149 = vst [vmem:[#allocation42_spill] sm:$0xff] %v4671_v0  ;;  %v4675_v4 = vpop.f32.mrb[44].mxu0 }
 0x5b8   :  { %5151 = vst [vmem:[#allocation43_spill] sm:$0xff] %v4675_v4  ;;  %v4678_v38 = vpop.f32.mrb[45].mxu0  ;;  %v4711_v4 = vld [vmem:[%s5096_s4] sm:$0x1f]  ;;  %s3692_s4 = smov [#allocation12]  }
 0x5b9   :  { %3284 = vset.pattern.permute.xlu1 %v5145_v14  ;;  %5152 = vst [vmem:[#allocation44_spill] sm:$0xff] %v4678_v38  ;;  %v4680_v40 = vpop.f32.mrb[46].mxu0  ;;  %s2683_s1 = sshll.u32 %s3692_s4, 4  ;;  %s2684_s1 = int_to_ptr.vmem [resolvable:$true] %s2683_s1 }
 0x5ba   :  { %3311 = vset.pattern.permute.xlu0 %v5145_v14  ;;  %1501 = vperm.xlu1 %3284, %v4467_v52   ;;  %5153 = vst [vmem:[#allocation45_spill] sm:$0xff] %v4680_v40  ;;  %v4682_v55 = vpop.f32.mrb[47].mxu0  ;;  %s3623_s10 = scalar_lea.vmem %s2684_s1, 2048  ;;  %p3628_p13 = scmp.lt.s32.totalorder %s2684_s1, %s2684_s1 }
 0x5bb   :  { %1551 = vperm.xlu0 %3311, %v4548_v51   ;;  %5154 = vst [vmem:[#allocation46_spill] sm:$0xff] %v4682_v55  ;;  %p3624_p12 = scmp.ne.s32.totalorder %s2684_s1, %s3623_s10  ;;  %p3629_p0 = scmp.lt.s32.totalorder %s3623_s10, %s3623_s10 }
 0x5bd   :  { %p3630_p1 = por %p3629_p0, %p3628_p13 }
 0x5be   :  { %3285 = vset.pattern.permute.xlu1 %v5141_v39 }
 0x5bf   :  { %3312 = vset.pattern.permute.xlu0 %v5150_v20  ;;  %1752 = vperm.xlu1 %3285, %v4467_v52   ;;  %v5156_v52 = vlaneseq  ;;  %p3631_p2 = pnand %p3630_p1, %p3624_p12 }
 0x5c0   :  { %1696 = vperm.xlu0 %3312, %v4521_v13  }
 0x5c1   :  { %v4703_v40 = vshrl.u32 %v5156_v52, 7 }
 0x5c3   :  { %3287 = vset.pattern.permute.xlu1 %v5155_v19  ;;  %v857_v52 = vsub.s32 3, %v4703_v40  ;;  %v853_v8 = vsub.s32 2, %v4703_v40 }
 0x5c4   :  { %3315 = vset.pattern.permute.xlu0 %v5141_v39  ;;  %1604 = vperm.xlu1 %3287, %v4494_v29  }
 0x5c5   :  { %1788 = vperm.xlu0 %3315, %v4544_v50   ;;  %v4726_v27 = vrot.slane %v4711_v4, %v857_v52 }
 0x5c8   :  { %3288 = vset.pattern.permute.xlu1 %v5145_v14 }
 0x5c9   :  { %1792 = vperm.xlu0 %3315, %v4548_v51   ;;  %1516 = vperm.xlu1 %3288, %v4494_v29  }
 0x5cd   :  { %3318 = vset.pattern.permute.xlu0 %v5150_v20  ;;  %3289 = vset.pattern.permute.xlu1 %v5141_v39 }
 0x5ce   :  { %1712 = vperm.xlu0 %3318, %v4548_v51   ;;  %1764 = vperm.xlu1 %3289, %v4494_v29   ;;  %v849_v29 = vsub.s32 1, %v4703_v40 }
 0x5d2   :  { %3290 = vset.pattern.permute.xlu1 %v5155_v19  ;;  %3320 = vset.pattern.permute.xlu0 %v5141_v39 }
 0x5d3   :  { %1600 = vperm.xlu1 %3290, %v4479_v26  }
 0x5d7   :  { %3293 = vset.pattern.permute.xlu1 %v5150_v20 }
 0x5d8   :  { %1680 = vperm.xlu1 %3293, %v4479_v26   ;;  %v4716_v26 = vrot.slane %v4711_v4, %v849_v29  ;;  %v845_v29 = vsub.s32 0, %v4703_v40 }
 0x5da   :  { %v1113_v55 = vadd.f32 %v4440_v37, %v4716_v26  ;;  %v1117_v38 = vadd.f32 %v4449_v47, %v4716_v26  ;;  %v1226_v37 = vadd.f32 %v4447_v41, %v4726_v27  ;;  %v1230_v47 = vadd.f32 %v4481_v28, %v4726_v27 }
 0x5db   :  { %v4736_v52 = vrot.slane %v4711_v4, %v845_v29  ;;  %v4746_v29 = vrot.slane %v4711_v4, %v853_v8 }
 0x5dc   :  { %3294 = vset.pattern.permute.xlu1 %v5155_v19  ;;  %v1400_v49 = vmax.f32 %v1113_v55, 0.0  ;;  %v1405_v17 = vmax.f32 %v1117_v38, 0.0  ;;  %v1402_v21 = vmax.f32 %v1226_v37, 0.0  ;;  %v1407_v16 = vmax.f32 %v1230_v47, 0.0 }
 0x5dd   :  { %1612 = vperm.xlu1 %3294, %v4515_v63   ;;  %v1111_v41 = vadd.f32 %v4435_v33, %v4736_v52  ;;  %v1224_v33 = vadd.f32 %v4442_v3, %v4746_v29 }
 0x5e1   :  { %3295 = vset.pattern.permute.xlu1 %v5145_v14 }
 0x5e2   :  { %1526 = vperm.xlu1 %3295, %v4515_v63  }
 0x5e6   :  { %3296 = vset.pattern.permute.xlu1 %v5155_v19 }
 0x5e7   :  { %1608 = vperm.xlu1 %3296, %v4501_v36  }
 0x5eb   :  { %3298 = vset.pattern.permute.xlu1 %v5141_v39 }
 0x5ec   :  { %1768 = vperm.xlu1 %3298, %v4501_v36  }
 0x5ed   :  { %v1581_v0 = vpop.permute.xlu1 %1580  ;;  %v1661_v32 = vpop.permute.xlu0 %1660 }
 0x5ee   :  { %v1640_v55 = vmul.f32 %v1581_v0, %v1405_v17  ;;  %v1399_v17 = vmax.f32 %v1111_v41, 0.0 }
 0x5f0   :  { %3299 = vset.pattern.permute.xlu1 %v5150_v20 }
 0x5f1   :  { %1688 = vperm.xlu1 %3299, %v4501_v36   ;;  %v1115_v36 = vadd.f32 %v4444_v62, %v4736_v52  ;;  %v1228_v62 = vadd.f32 %v4451_v61, %v4746_v29  ;;  %v3411_v61 = vld [vmem:[#allocation8 + $0x110] sm:$0xff]  }
 0x5f2   :  { %v1487_v58 = vpop.permute.xlu1 %1486 }
 0x5f3   :  { %v1577_v44 = vpop.permute.xlu0 %1576  ;;  %v1404_v37 = vmax.f32 %v1115_v36, 0.0 }
 0x5f4   :  { %v1639_v38 = vmul.f32 %v1577_v44, %v1400_v49 }
 0x5f5   :  { %3300 = vset.pattern.permute.xlu1 %v5155_v19 }
 0x5f6   :  { %v1816_v28 = vpack.c.bf16 %v1640_v55, %v1639_v38  ;;  %1620 = vperm.xlu1 %3300, %v4532_v43   ;;  %v1560_v55 = vmul.f32 %v1487_v58, %v1404_v37  ;;  %v4757_v58 = vpop.f32.mrb[29].mxu1  ;;  %v1123_v37 = vadd.f32 %v4491_v23, %v4716_v26  ;;  %v1125_v23 = vadd.f32 %v4505_v1, %v4736_v52 }
 0x5f8   :  { %v1741_v46 = vpop.permute.xlu1 %1740  ;;  %2368 = vmatprep.mubr.bf16.mxu1 %v1816_v28  ;;  %v1737_v0 = vpop.permute.xlu0 %1736  ;;  %v1401_v28 = vmax.f32 %v1224_v33, 0.0  ;;  %v1127_v33 = vadd.f32 %v4509_v42, %v4716_v26 }
 0x5f9   :  { %v1800_v44 = vmul.f32 %v1741_v46, %v1407_v16  ;;  %v1799_v49 = vmul.f32 %v1737_v0, %v1402_v21  ;;  %v1406_v16 = vmax.f32 %v1228_v62, 0.0  ;;  %v3410_v21 = vld [vmem:[#allocation8 + $0x108] sm:$0xff]  }
 0x5fa   :  { %3302 = vset.pattern.permute.xlu1 %v5145_v14 }
 0x5fb   :  { %v1818_v47 = vpack.c.bf16 %v1800_v44, %v1799_v49  ;;  %1531 = vperm.xlu1 %3302, %v4521_v13   ;;  %v1720_v36 = vmul.f32 %v1661_v32, %v1406_v16  ;;  %v4759_v44 = vpop.f32.mrb[30].mxu1  ;;  %v3412_v32 = vld [vmem:[#allocation8 + $0x118] sm:$0xff]  }
 0x5fc   :  { %v4763_v49 = vpop.f32.mrb[31].mxu1  ;;  %v1749_v1 = vpop.permute.xlu0 %1748 }
 0x5fd   :  { %v1482_v8 = vpop.permute.xlu1 %1481  ;;  %2465 = vmatprep.mubr.bf16.mxu0 %v1818_v47  ;;  %v1410_v47 = vmax.f32 %v1123_v37, 0.0 }
 0x5fe   :  { %v1559_v38 = vmul.f32 %v1482_v8, %v1399_v17  ;;  %v3413_v17 = vld [vmem:[#allocation8 + $0x120] sm:$0xff]   ;;  %v1415_v8 = vmax.f32 %v1127_v33, 0.0 }
 0x5ff   :  { %1546 = vperm.xlu1 %3302, %v4544_v50  }
 0x600   :  { %v1815_v46 = vpack.c.bf16 %v1560_v55, %v1559_v38  ;;  %v1121_v55 = vadd.f32 %v4485_v31, %v4736_v52  ;;  %v3414_v38 = vld [vmem:[#allocation8 + $0x128] sm:$0xff]   ;;  %v1240_v31 = vadd.f32 %v4507_v22, %v4726_v27 }
 0x602   :  { %v1657_v41 = vpop.permute.xlu1 %1656  ;;  %2369 = vmatmul.mubr.bf16.vlgmr.msra.gmra.mrb[48].mxu1 %v1815_v46  ;;  %v1409_v46 = vmax.f32 %v1121_v55, 0.0 }
 0x603   :  { %v1719_v3 = vmul.f32 %v1657_v41, %v1401_v28  ;;  %3303 = vset.pattern.permute.xlu1 %v5155_v19  ;;  %3152 = vmatpush3.bf16.msra.mxu1 %v3409_v35 }
 0x604   :  { %1624 = vperm.xlu1 %3303, %v4536_v25   ;;  %3153 = vmatprep.subr.bf16.mxu1 %v3410_v21 }
 0x605   :  { %v1817_v13 = vpack.c.bf16 %v1720_v36, %v1719_v3  ;;  %v861_v36 = vsub.s32 4, %v4703_v40  ;;  %v1417_v40 = vmax.f32 %v1240_v31, 0.0 }
 0x607   :  { %v1589_v0 = vpop.permute.xlu1 %1588  ;;  %2466 = vmatmul.mubr.bf16.vlgmr.msra.gmra.mrb[64].mxu0 %v1817_v13  ;;  %3154 = vmatpush3.bf16.msra.mxu1 %v3410_v21  ;;  %v1236_v21 = vadd.f32 %v4489_v56, %v4726_v27  ;;  %v1234_v56 = vadd.f32 %v4483_v53, %v4746_v29 }
 0x608   :  { %3304 = vset.pattern.permute.xlu1 %v5145_v14  ;;  %3155 = vmatprep.subr.bf16.mxu1 %v3411_v61  ;;  %v1642_v42 = vmul.f32 %v1589_v0, %v1415_v8 }
 0x609   :  { %1541 = vperm.xlu1 %3304, %v4536_v25   ;;  %v1412_v22 = vmax.f32 %v1236_v21, 0.0 }
 0x60b   :  { %3156 = vmatpush3.bf16.msra.mxu1 %v3411_v61  ;;  %v3081_v61 = vpop.f32.mrb[32].mxu1 }
 0x60c   :  { %v1497_v35 = vpop.permute.xlu1 %1496  ;;  %3157 = vmatprep.subr.bf16.mxu1 %v3412_v32  ;;  %v1336_v0 = vpop.f32.mrb[33].mxu1 }
 0x60d   :  { %3305 = vset.pattern.permute.xlu1 %v5155_v19  ;;  %v3082_v37 = vpop.f32.mrb[34].mxu1 }
 0x60e   :  { %1636 = vperm.xlu1 %3305, %v4560_v11   ;;  %v1339_v8 = vpop.f32.mrb[35].mxu1 }
 0x60f   :  { %3158 = vmatpush3.bf16.msra.mxu1 %v3412_v32  ;;  %v3415_v32 = vld [vmem:[#allocation8 + $0x130] sm:$0xff]  }
 0x610   :  { %3159 = vmatprep.subr.bf16.mxu1 %v3413_v17 }
 0x611   :  { %v4771_v62 = vpop.permute.xlu1 %1668 }
 0x612   :  { %3306 = vset.pattern.permute.xlu1 %v5145_v14  ;;  %v1414_v14 = vmax.f32 %v1125_v23, 0.0 }
 0x613   :  { %1556 = vperm.xlu1 %3306, %v4560_v11   ;;  %3160 = vmatpush3.bf16.msra.mxu1 %v3413_v17  ;;  %v1238_v17 = vadd.f32 %v4498_v59, %v4746_v29 }
 0x614   :  { %3161 = vmatprep.subr.bf16.mxu1 %v3414_v38 }
 0x615   :  { %v1416_v21 = vmax.f32 %v1238_v17, 0.0 }
 0x616   :  { %v1585_v28 = vpop.permute.xlu1 %1584 }
 0x617   :  { %v1641_v16 = vmul.f32 %v1585_v28, %v1410_v47  ;;  %3307 = vset.pattern.permute.xlu1 %v5155_v19  ;;  %3162 = vmatpush3.bf16.msra.mxu1 %v3414_v38  ;;  %v1562_v19 = vmul.f32 %v1497_v35, %v1414_v14  ;;  %v3416_v28 = vld [vmem:[#allocation8 + $0x138] sm:$0xff]   ;;  %v1411_v14 = vmax.f32 %v1234_v56, 0.0 }
 0x618   :  { %1632 = vperm.xlu1 %3307, %v4548_v51   ;;  %v4788_v51 = vrot.slane %v4711_v4, %v861_v36  ;;  %3163 = vmatprep.subr.bf16.mxu1 %v3415_v32 }
 0x619   :  { %v1821_v41 = vpack.c.bf16 %v1642_v42, %v1641_v16  ;;  %v4799_v42 = vpop.permute.xlu0 %1596 }
 0x61a   :  { %v1345_v33 = vadd.f32 %v3081_v61, %v4788_v51  ;;  %v1337_v47 = vadd.f32 %v1336_v0, %v4788_v51  ;;  %v1348_v4 = vadd.f32 %v3082_v37, %v4788_v51  ;;  %v1340_v55 = vadd.f32 %v1339_v8, %v4788_v51 }
 0x61b   :  { %v1492_v3 = vpop.permute.xlu1 %1491  ;;  %2376 = vmatprep.mubr.bf16.mxu1 %v1821_v41  ;;  %3164 = vmatpush3.bf16.msra.mxu1 %v3415_v32  ;;  %v1722_v32 = vmul.f32 %v4771_v62, %v1416_v21  ;;  %v1248_v62 = vadd.f32 %v4557_v7, %v4746_v29 }
 0x61c   :  { %v1561_v13 = vmul.f32 %v1492_v3, %v1409_v46  ;;  %3308 = vset.pattern.permute.xlu1 %v5150_v20  ;;  %v1413_v23 = vmax.f32 %v1345_v33, 0.0  ;;  %v1403_v59 = vmax.f32 %v1337_v47, 0.0  ;;  %v1418_v38 = vmax.f32 %v1348_v4, 0.0  ;;  %3165 = vmatprep.subr.bf16.mxu1 %v3416_v28  ;;  %v3085_v3 = vpop.f32.mrb[36].mxu1 }
 0x61d   :  { %1692 = vperm.xlu1 %3308, %v4515_v63   ;;  %v1802_v63 = vmul.f32 %v1749_v1, %v1417_v40  ;;  %v1408_v46 = vmax.f32 %v1340_v55, 0.0  ;;  %v1361_v1 = vadd.f32 %v3085_v3, %v4788_v51  ;;  %v1352_v61 = vpop.f32.mrb[37].mxu1  ;;  %v4812_v37 = vpop.permute.xlu0 %1506  ;;  %v1244_v47 = vadd.f32 %v4550_v30, %v4746_v29 }
 0x61e   :  { %v1820_v35 = vpack.c.bf16 %v1562_v19, %v1561_v13  ;;  %v4803_v31 = vpack.c.bf16 %v1418_v38, %v1413_v23  ;;  %v1353_v13 = vadd.f32 %v1352_v61, %v4788_v51  ;;  %v3086_v0 = vpop.f32.mrb[38].mxu1 }
 0x61f   :  { %v4805_v36 = vpack.c.bf16 %v1408_v46, %v1403_v59  ;;  %3166 = vmatpush3.bf16.msra.mxu1 %v3416_v28  ;;  %v1364_v17 = vadd.f32 %v3086_v0, %v4788_v51  ;;  %v1355_v40 = vpop.f32.mrb[39].mxu1  ;;  %v1421_v38 = vmax.f32 %v1244_v47, 0.0  ;;  %v1426_v28 = vmax.f32 %v1248_v62, 0.0 }
 0x620   :  { %v1745_v53 = vpop.permute.xlu1 %1744  ;;  %2377 = vmatmul.mubr.bf16.gmra.mrb[52].mxu1 %v1820_v35  ;;  %v1423_v35 = vmax.f32 %v1353_v13, 0.0  ;;  %v1356_v33 = vadd.f32 %v1355_v40, %v4788_v51  ;;  %v3089_v59 = vpop.f32.mrb[40].mxu1  ;;  %v1135_v40 = vadd.f32 %v4525_v12, %v4736_v52 }
 0x621   :  { %v1801_v16 = vmul.f32 %v1745_v53, %v1412_v22  ;;  %3310 = vset.pattern.permute.xlu1 %v5141_v39  ;;  %v1433_v22 = vmax.f32 %v1361_v1, 0.0  ;;  %v1438_v8 = vmax.f32 %v1364_v17, 0.0  ;;  %v1377_v30 = vadd.f32 %v3089_v59, %v4788_v51  ;;  %v1368_v7 = vpop.f32.mrb[41].mxu1  ;;  %v1673_v46 = vpop.permute.xlu0 %1672 }
 0x622   :  { %1780 = vperm.xlu1 %3310, %v4532_v43   ;;  %v1428_v55 = vmax.f32 %v1356_v33, 0.0  ;;  %v3090_v21 = vpop.f32.mrb[42].mxu1  ;;  %v1723_v0 = vmul.f32 %v1673_v46, %v1421_v38  ;;  %v1424_v12 = vmax.f32 %v1135_v40, 0.0  ;;  %v1250_v46 = vadd.f32 %v4564_v24, %v4726_v27 }
 0x623   :  { %v1823_v41 = vpack.c.bf16 %v1802_v63, %v1801_v16  ;;  %v4822_v23 = vpack.c.bf16 %v1438_v8, %v1433_v22  ;;  %v1133_v63 = vadd.f32 %v4518_v10, %v4716_v26  ;;  %v1137_v16 = vadd.f32 %v4528_v9, %v4716_v26  ;;  %v1371_v1 = vpop.f32.mrb[43].mxu1 }
 0x624   :  { %v1380_v3 = vadd.f32 %v3090_v21, %v4788_v51  ;;  %v1372_v13 = vadd.f32 %v1371_v1, %v4788_v51  ;;  %v1131_v9 = vadd.f32 %v4512_v6, %v4736_v52  ;;  %v3093_v62 = vpop.f32.mrb[44].mxu1  ;;  %v1564_v1 = vmul.f32 %v4812_v37, %v1424_v12 }
 0x625   :  { %v1665_v19 = vpop.permute.xlu1 %1664  ;;  %2473 = vmatprep.mubr.bf16.mxu0 %v1823_v41  ;;  %v1453_v41 = vmax.f32 %v1377_v30, 0.0  ;;  %v1425_v22 = vmax.f32 %v1137_v16, 0.0  ;;  %v1393_v8 = vadd.f32 %v3093_v62, %v4788_v51  ;;  %v1246_v30 = vadd.f32 %v4553_v60, %v4726_v27 }
 0x626   :  { %v1721_v56 = vmul.f32 %v1665_v19, %v1411_v14  ;;  %3313 = vset.pattern.permute.xlu1 %v5150_v20  ;;  %v1369_v14 = vadd.f32 %v1368_v7, %v4788_v51  ;;  %v1458_v10 = vmax.f32 %v1380_v3, 0.0  ;;  %v1448_v17 = vmax.f32 %v1372_v13, 0.0 }
 0x627   :  { %1700 = vperm.xlu1 %3313, %v4532_v43   ;;  %v4825_v43 = vpack.c.bf16 %v1428_v55, %v1423_v35  ;;  %v1384_v55 = vpop.f32.mrb[45].mxu1  ;;  %v1419_v59 = vmax.f32 %v1131_v9, 0.0  ;;  %v1644_v6 = vmul.f32 %v4799_v42, %v1425_v22  ;;  %v1473_v7 = vmax.f32 %v1393_v8, 0.0 }
 0x628   :  { %v1822_v4 = vpack.c.bf16 %v1722_v32, %v1721_v56  ;;  %v1443_v19 = vmax.f32 %v1369_v14, 0.0  ;;  %v1420_v56 = vmax.f32 %v1133_v63, 0.0  ;;  %v4842_v33 = vpack.c.bf16 %v1458_v10, %v1453_v41 }
 0x629   :  { %v1427_v13 = vmax.f32 %v1250_v46, 0.0  ;;  %v1141_v37 = vadd.f32 %v4580_v2, %v4736_v52  ;;  %v1145_v9 = vadd.f32 %v4602_v54, %v4736_v52  ;;  %v1260_v2 = vadd.f32 %v4586_v48, %v4726_v27 }
 0x62a   :  { %v4820_v53 = vpop.permute.xlu1 %1756  ;;  %2474 = vmatmul.mubr.bf16.gmra.mrb[68].mxu0 %v1822_v4  ;;  %v4844_v47 = vpack.c.bf16 %v1448_v17, %v1443_v19  ;;  %v1422_v19 = vmax.f32 %v1246_v30, 0.0 }
 0x62b   :  { %3314 = vset.pattern.permute.xlu1 %v5141_v39 }
 0x62c   :  { %1784 = vperm.xlu1 %3314, %v4536_v25  }
 0x62f   :  { %v1677_v61 = vpop.permute.xlu1 %1676 }
 0x630   :  { %v1724_v32 = vmul.f32 %v1677_v61, %v1426_v28  ;;  %3316 = vset.pattern.permute.xlu1 %v5150_v20  ;;  %v3094_v28 = vpop.f32.mrb[46].mxu1 }
 0x631   :  { %1704 = vperm.xlu1 %3316, %v4536_v25   ;;  %v1385_v25 = vadd.f32 %v1384_v55, %v4788_v51  ;;  %v1396_v63 = vadd.f32 %v3094_v28, %v4788_v51  ;;  %v1387_v16 = vpop.f32.mrb[47].mxu1 }
 0x632   :  { %v1827_v35 = vpack.c.bf16 %v1724_v32, %v1723_v0  ;;  %v1388_v42 = vadd.f32 %v1387_v16, %v4788_v51  ;;  %v1685_v51 = vpop.permute.xlu0 %1684 }
 0x633   :  { %v1463_v21 = vmax.f32 %v1385_v25, 0.0  ;;  %v1478_v41 = vmax.f32 %v1396_v63, 0.0 }
 0x634   :  { %v1593_v4 = vpop.permute.xlu1 %1592  ;;  %v1468_v3 = vmax.f32 %v1388_v42, 0.0  ;;  %v1254_v42 = vadd.f32 %v4567_v34, %v4746_v29 }
 0x635   :  { %v1643_v38 = vmul.f32 %v1593_v4, %v1420_v56  ;;  %1708 = vperm.xlu1 %3316, %v4544_v50   ;;  %v4859_v61 = vpack.c.bf16 %v1478_v41, %v1473_v7 }
 0x636   :  { %v4861_v24 = vpack.c.bf16 %v1468_v3, %v1463_v21  ;;  %v1512_v62 = vpop.permute.xlu0 %1511 }
 0x637   :  { %v1826_v14 = vpack.c.bf16 %v1644_v6, %v1643_v38  ;;  %v1437_v38 = vmax.f32 %v1260_v2, 0.0 }
 0x639   :  { %v1502_v50 = vpop.permute.xlu1 %1501  ;;  %3317 = vset.pattern.permute.xlu1 %v5141_v39  ;;  %2384 = vmatprep.mubr.bf16.mxu1 %v1826_v14  ;;  %v1804_v39 = vmul.f32 %v4820_v53, %v1427_v13  ;;  %v1434_v53 = vmax.f32 %v1145_v9, 0.0  ;;  %v1151_v9 = vadd.f32 %v4607_v57, %v4736_v52 }
 0x63a   :  { %v1563_v60 = vmul.f32 %v1502_v50, %v1419_v59  ;;  %1796 = vperm.xlu1 %3317, %v4560_v11   ;;  %v1761_v28 = vpop.permute.xlu0 %1760 }
 0x63b   :  { %v1439_v2 = vmax.f32 %v1151_v9, 0.0  ;;  %v5162_v9 = vld [vmem:[#allocation27_spill] sm:$0xff] }
 0x63c   :  { %v1825_v0 = vpack.c.bf16 %v1564_v1, %v1563_v60 }
 0x63e   :  { %v1753_v32 = vpop.permute.xlu1 %1752  ;;  %3319 = vset.pattern.permute.xlu1 %v5150_v20  ;;  %2385 = vmatmul.mubr.bf16.gmra.mrb[56].mxu1 %v1825_v0  ;;  %v1429_v20 = vmax.f32 %v1141_v37, 0.0  ;;  %v1773_v37 = vpop.permute.xlu0 %1772 }
 0x63f   :  { %v1803_v10 = vmul.f32 %v1753_v32, %v1422_v19  ;;  %1716 = vperm.xlu1 %3319, %v4560_v11   ;;  %v1256_v11 = vadd.f32 %v4569_v5, %v4726_v27  ;;  %v1147_v5 = vadd.f32 %v4605_v45, %v4716_v26  ;;  %v1431_v19 = vmax.f32 %v1254_v42, 0.0 }
 0x640   :  { %v1565_v55 = vmul.f32 %v1512_v62, %v1429_v20 }
 0x641   :  { %v1828_v56 = vpack.c.bf16 %v1804_v39, %v1803_v10  ;;  %v1432_v6 = vmax.f32 %v1256_v11, 0.0  ;;  %v1435_v14 = vmax.f32 %v1147_v5, 0.0 }
 0x642   :  { %v4870_v22 = vpop.f32.mrb[48].mxu0 }
 0x643   :  { %v4872_v17 = vpop.f32.mrb[49].mxu0  ;;  %v1605_v40 = vpop.permute.xlu1 %1604  ;;  %2481 = vmatprep.mubr.bf16.mxu0 %v1828_v56  ;;  %v1805_v7 = vmul.f32 %v1761_v28, %v1432_v6  ;;  %v5157_v56 = vld [vmem:[#allocation24_spill] sm:$0xff] }
 0x644   :  { %2482 = vmatmul.mubr.bf16.gmra.mrb[72].mxu0 %v1827_v35  ;;  %v1143_v35 = vadd.f32 %v4595_v18, %v4716_v26  ;;  %v1258_v18 = vadd.f32 %v4572_v15, %v4746_v29  ;;  %v1646_v3 = vmul.f32 %v1605_v40, %v1435_v14  ;;  %v1155_v40 = vadd.f32 %v5157_v56, %v4736_v52  ;;  %v5161_v14 = vld [vmem:[#allocation22_spill] sm:$0xff] }
 0x645   :  { %v1270_v42 = vadd.f32 %v5161_v14, %v4726_v27  ;;  %v1163_v56 = vadd.f32 %v5162_v9, %v4716_v26  ;;  %v5169_v9 = vld [vmem:[#allocation32_spill] sm:$0xff] }
 0x646   :  { %v4878_v4 = vpop.f32.mrb[50].mxu0  ;;  %v1430_v46 = vmax.f32 %v1143_v35, 0.0  ;;  %v1436_v13 = vmax.f32 %v1258_v18, 0.0 }
 0x647   :  { %v4880_v54 = vpop.f32.mrb[51].mxu0 }
 0x648   :  { %v1517_v8 = vpop.permute.xlu1 %1516  ;;  %v1726_v34 = vmul.f32 %v1685_v51, %v1436_v13  ;;  %v5158_v51 = vld [vmem:[#allocation23_spill] sm:$0xff] }
 0x649   :  { %v1566_v59 = vmul.f32 %v1517_v8, %v1434_v53  ;;  %v1444_v8 = vmax.f32 %v1155_v40, 0.0  ;;  %v5163_v40 = vld [vmem:[#allocation29_spill] sm:$0xff] }
 0x64a   :  { %v4882_v25 = vpop.f32.mrb[52].mxu0 }
 0x64b   :  { %v1830_v12 = vpack.c.bf16 %v1566_v59, %v1565_v55  ;;  %v4888_v48 = vpop.f32.mrb[53].mxu0  ;;  %v1153_v55 = vadd.f32 %v5158_v51, %v4716_v26  ;;  %v5159_v59 = vld [vmem:[#allocation25_spill] sm:$0xff] }
 0x64c   :  { %v1157_v6 = vadd.f32 %v5159_v59, %v4716_v26 }
 0x64d   :  { %v1765_v30 = vpop.permute.xlu1 %1764 }
 0x64e   :  { %v1806_v63 = vmul.f32 %v1765_v30, %v1437_v38  ;;  %v4890_v16 = vpop.f32.mrb[54].mxu0  ;;  %v1522_v38 = vpop.permute.xlu0 %1521  ;;  %v1440_v30 = vmax.f32 %v1153_v55, 0.0  ;;  %v5164_v55 = vld [vmem:[#allocation26_spill] sm:$0xff] }
 0x64f   :  { %v4892_v21 = vpop.f32.mrb[55].mxu0  ;;  %v1567_v5 = vmul.f32 %v1522_v38, %v1439_v2  ;;  %v1161_v59 = vadd.f32 %v5164_v55, %v4736_v52 }
 0x650   :  { %v1833_v41 = vpack.c.bf16 %v1806_v63, %v1805_v7  ;;  %v1445_v7 = vmax.f32 %v1157_v6, 0.0  ;;  %v5160_v63 = vld [vmem:[#allocation20_spill] sm:$0xff] }
 0x652   :  { %v1601_v45 = vpop.permute.xlu1 %1600  ;;  %v4898_v50 = vpop.f32.mrb[56].mxu0  ;;  %2489 = vmatprep.mubr.bf16.mxu0 %v1833_v41 }
 0x653   :  { %v1645_v1 = vmul.f32 %v1601_v45, %v1430_v46  ;;  %v4900_v60 = vpop.f32.mrb[57].mxu0  ;;  %v1266_v46 = vadd.f32 %v5160_v63, %v4726_v27 }
 0x655   :  { %v1831_v0 = vpack.c.bf16 %v1646_v3, %v1645_v1  ;;  %v1442_v1 = vmax.f32 %v1266_v46, 0.0 }
 0x656   :  { %v4902_v32 = vpop.f32.mrb[58].mxu0 }
 0x657   :  { %v1681_v39 = vpop.permute.xlu1 %1680  ;;  %v4904_v10 = vpop.f32.mrb[59].mxu0  ;;  %2392 = vmatprep.mubr.bf16.mxu1 %v1831_v0 }
 0x658   :  { %v1725_v15 = vmul.f32 %v1681_v39, %v1431_v19  ;;  %2393 = vmatmul.mubr.bf16.gmra.mrb[60].mxu1 %v1830_v12  ;;  %v1447_v19 = vmax.f32 %v1270_v42, 0.0 }
 0x65a   :  { %v1832_v20 = vpack.c.bf16 %v1726_v34, %v1725_v15  ;;  %v1808_v39 = vmul.f32 %v1773_v37, %v1447_v19  ;;  %v1537_v15 = vpop.permute.xlu0 %1536  ;;  %v5165_v37 = vld [vmem:[#allocation28_spill] sm:$0xff] }
 0x65b   :  { %v4910_v62 = vpop.f32.mrb[60].mxu0  ;;  %v1165_v6 = vadd.f32 %v5165_v37, %v4736_v52 }
 0x65c   :  { %v4912_v53 = vpop.f32.mrb[61].mxu0  ;;  %v1613_v11 = vpop.permute.xlu1 %1612  ;;  %2490 = vmatmul.mubr.bf16.gmra.mrb[76].mxu0 %v1832_v20  ;;  %v1167_v20 = vadd.f32 %v5163_v40, %v4716_v26 }
 0x65d   :  { %v1648_v45 = vmul.f32 %v1613_v11, %v1445_v7  ;;  %v1450_v11 = vmax.f32 %v1163_v56, 0.0  ;;  %v1454_v7 = vmax.f32 %v1165_v6, 0.0  ;;  %v1175_v56 = vadd.f32 %v5169_v9, %v4736_v52 }
 0x65e   :  { %v1455_v51 = vmax.f32 %v1167_v20, 0.0  ;;  %v1617_v38 = vpop.permute.xlu0 %1616 }
 0x65f   :  { %v4918_v57 = vpop.f32.mrb[62].mxu0  ;;  %v1570_v14 = vmul.f32 %v1537_v15, %v1454_v7 }
 0x660   :  { %v4920_v35 = vpop.f32.mrb[63].mxu0 }
 0x661   :  { %v1527_v28 = vpop.permute.xlu1 %1526 }
 0x662   :  { %v1568_v12 = vmul.f32 %v1527_v28, %v1444_v8  ;;  %v1629_v40 = vpop.permute.xlu0 %1628 }
 0x664   :  { %v1835_v18 = vpack.c.bf16 %v1568_v12, %v1567_v5  ;;  %v1649_v5 = vmul.f32 %v1617_v38, %v1450_v11 }
 0x666   :  { %v1609_v41 = vpop.permute.xlu1 %1608  ;;  %v1777_v38 = vpop.permute.xlu0 %1776 }
 0x667   :  { %v1647_v3 = vmul.f32 %v1609_v41, %v1440_v30  ;;  %v1449_v30 = vmax.f32 %v1161_v59, 0.0 }
 0x669   :  { %v1836_v13 = vpack.c.bf16 %v1648_v45, %v1647_v3  ;;  %v5167_v45 = vld [vmem:[#allocation33_spill] sm:$0xff] }
 0x66a   :  { %v1177_v3 = vadd.f32 %v5167_v45, %v4716_v26 }
 0x66b   :  { %v1769_v0 = vpop.permute.xlu1 %1768  ;;  %2400 = vmatprep.mubr.bf16.mxu1 %v1836_v13 }
 0x66c   :  { %v1807_v34 = vmul.f32 %v1769_v0, %v1442_v1  ;;  %2401 = vmatmul.mubr.bf16.gmra.mrb[64].mxu1 %v1835_v18  ;;  %v5166_v18 = vld [vmem:[#allocation31_spill] sm:$0xff]  ;;  %v1465_v0 = vmax.f32 %v1177_v3, 0.0 }
 0x66d   :  { %v1173_v41 = vadd.f32 %v5166_v18, %v4716_v26  ;;  %v1187_v18 = vadd.f32 %v4763_v49, %v4716_v26  ;;  %v5174_v49 = vld [vmem:[#allocation38_spill] sm:$0xff] }
 0x66e   :  { %v1838_v2 = vpack.c.bf16 %v1808_v39, %v1807_v34  ;;  %v5168_v39 = vld [vmem:[#allocation30_spill] sm:$0xff]  ;;  %v1652_v20 = vmul.f32 %v1629_v40, %v1465_v0 }
 0x66f   :  { %v1460_v13 = vmax.f32 %v1173_v41, 0.0  ;;  %v1171_v34 = vadd.f32 %v5168_v39, %v4736_v52 }
 0x670   :  { %v4930_v8 = vpop.permute.xlu1 %1688  ;;  %2497 = vmatprep.mubr.bf16.mxu0 %v1838_v2 }
 0x671   :  { %v1459_v11 = vmax.f32 %v1171_v34, 0.0 }
 0x675   :  { %v1621_v28 = vpop.permute.xlu1 %1620 }
 0x676   :  { %v1650_v12 = vmul.f32 %v1621_v28, %v1455_v51  ;;  %v1464_v51 = vmax.f32 %v1175_v56, 0.0  ;;  %v5170_v28 = vld [vmem:[#allocation36_spill] sm:$0xff] }
 0x678   :  { %v1841_v63 = vpack.c.bf16 %v1650_v12, %v1649_v5  ;;  %v1181_v5 = vadd.f32 %v5170_v28, %v4736_v52  ;;  %v1185_v12 = vadd.f32 %v4759_v44, %v4736_v52  ;;  %v5172_v44 = vld [vmem:[#allocation21_spill] sm:$0xff] }
 0x679   :  { %v1268_v0 = vadd.f32 %v5172_v44, %v4746_v29 }
 0x67a   :  { %v1532_v46 = vpop.permute.xlu1 %1531  ;;  %2408 = vmatprep.mubr.bf16.mxu1 %v1841_v63  ;;  %v1469_v63 = vmax.f32 %v1181_v5, 0.0  ;;  %v5176_v5 = vld [vmem:[#allocation37_spill] sm:$0xff] }
 0x67b   :  { %v1569_v42 = vmul.f32 %v1532_v46, %v1449_v30  ;;  %v1474_v46 = vmax.f32 %v1185_v12, 0.0  ;;  %v1278_v12 = vadd.f32 %v5176_v5, %v4746_v29 }
 0x67d   :  { %v1840_v1 = vpack.c.bf16 %v1570_v14, %v1569_v42  ;;  %v1552_v14 = vpop.permute.xlu0 %1551  ;;  %v1183_v42 = vadd.f32 %v4757_v58, %v4716_v26  ;;  %v1446_v58 = vmax.f32 %v1268_v0, 0.0 }
 0x67e   :  { %v1547_v19 = vpop.permute.xlu1 %1546  ;;  %v1573_v45 = vmul.f32 %v1552_v14, %v1469_v63 }
 0x67f   :  { %2409 = vmatmul.mubr.bf16.gmra.mrb[68].mxu1 %v1840_v1  ;;  %v1572_v37 = vmul.f32 %v1547_v19, %v1464_v51  ;;  %v1470_v1 = vmax.f32 %v1183_v42, 0.0  ;;  %v1475_v19 = vmax.f32 %v1187_v18, 0.0  ;;  %v1456_v42 = vmax.f32 %v1278_v12, 0.0  ;;  %v5177_v18 = vld [vmem:[#allocation40_spill] sm:$0xff] }
 0x683   :  { %v1625_v15 = vpop.permute.xlu1 %1624 }
 0x684   :  { %v1651_v2 = vmul.f32 %v1625_v15, %v1460_v13  ;;  %v5171_v13 = vld [vmem:[#allocation19_spill] sm:$0xff] }
 0x685   :  { %v1264_v52 = vadd.f32 %v5171_v13, %v4746_v29  ;;  %v5173_v15 = vld [vmem:[#allocation35_spill] sm:$0xff] }
 0x686   :  { %v1846_v55 = vpack.c.bf16 %v1652_v20, %v1651_v2  ;;  %v1276_v26 = vadd.f32 %v5173_v15, %v4726_v27  ;;  %v1280_v20 = vadd.f32 %v5174_v49, %v4726_v27  ;;  %v5181_v49 = vld [vmem:[#allocation44_spill] sm:$0xff] }
 0x687   :  { %v1441_v40 = vmax.f32 %v1264_v52, 0.0 }
 0x688   :  { %v1542_v59 = vpop.permute.xlu1 %1541  ;;  %2416 = vmatprep.mubr.bf16.mxu1 %v1846_v55 }
 0x689   :  { %v1571_v6 = vmul.f32 %v1542_v59, %v1459_v11  ;;  %v1727_v51 = vmul.f32 %v4930_v8, %v1441_v40  ;;  %v1452_v59 = vmax.f32 %v1276_v26, 0.0  ;;  %v1697_v8 = vpop.permute.xlu0 %1696 }
 0x68b   :  { %v1845_v30 = vpack.c.bf16 %v1572_v37, %v1571_v6  ;;  %v1457_v37 = vmax.f32 %v1280_v20, 0.0  ;;  %v5175_v6 = vld [vmem:[#allocation34_spill] sm:$0xff]  ;;  %v1809_v63 = vmul.f32 %v1777_v38, %v1452_v59  ;;  %v1296_v20 = vadd.f32 %v5181_v49, %v4726_v27 }
 0x68c   :  { %v1274_v28 = vadd.f32 %v5175_v6, %v4746_v29 }
 0x68d   :  { %v1637_v7 = vpop.permute.xlu1 %1636  ;;  %2417 = vmatmul.mubr.bf16.gmra.mrb[72].mxu1 %v1845_v30  ;;  %v1789_v44 = vpop.permute.xlu0 %1788 }
 0x68e   :  { %v1654_v9 = vmul.f32 %v1637_v7, %v1475_v19  ;;  %v1451_v14 = vmax.f32 %v1274_v28, 0.0  ;;  %v5183_v28 = vld [vmem:[#allocation43_spill] sm:$0xff] }
 0x68f   :  { %v1294_v5 = vadd.f32 %v5183_v28, %v4746_v29 }
 0x690   :  { %v1729_v19 = vmul.f32 %v1697_v8, %v1451_v14 }
 0x691   :  { %v1793_v6 = vpop.permute.xlu0 %1792  ;;  %v1471_v14 = vmax.f32 %v1294_v5, 0.0 }
 0x692   :  { %v1557_v41 = vpop.permute.xlu1 %1556 }
 0x693   :  { %v1574_v3 = vmul.f32 %v1557_v41, %v1474_v46  ;;  %v1286_v41 = vadd.f32 %v5177_v18, %v4726_v27 }
 0x695   :  { %v1850_v39 = vpack.c.bf16 %v1574_v3, %v1573_v45  ;;  %v5178_v45 = vld [vmem:[#allocation42_spill] sm:$0xff]  ;;  %v1462_v38 = vmax.f32 %v1286_v41, 0.0 }
 0x697   :  { %v1633_v34 = vpop.permute.xlu1 %1632 }
 0x698   :  { %v1653_v56 = vmul.f32 %v1633_v34, %v1470_v1 }
 0x69a   :  { %v1851_v2 = vpack.c.bf16 %v1654_v9, %v1653_v56  ;;  %v5179_v56 = vld [vmem:[#allocation39_spill] sm:$0xff] }
 0x69b   :  { %v1284_v40 = vadd.f32 %v5179_v56, %v4746_v29 }
 0x69c   :  { %v1693_v11 = vpop.permute.xlu1 %1692  ;;  %2424 = vmatprep.mubr.bf16.mxu1 %v1851_v2  ;;  %v5182_v2 = vld [vmem:[#allocation46_spill] sm:$0xff] }
 0x69d   :  { %v1728_v55 = vmul.f32 %v1693_v11, %v1446_v58  ;;  %2425 = vmatmul.mubr.bf16.gmra.mrb[76].mxu1 %v1850_v39  ;;  %v1461_v26 = vmax.f32 %v1284_v40, 0.0  ;;  %v1300_v11 = vadd.f32 %v5182_v2, %v4726_v27 }
 0x69e   :  { %3167 = vmatprep.mubr.bf16.mxu1 %v4805_v36  ;;  %v1290_v36 = vadd.f32 %v5178_v45, %v4726_v27 }
 0x69f   :  { %v1837_v30 = vpack.c.bf16 %v1728_v55, %v1727_v51 }
 0x6a0   :  { %v1467_v52 = vmax.f32 %v1290_v36, 0.0 }
 0x6a1   :  { %v1781_v7 = vpop.permute.xlu1 %1780  ;;  %2498 = vmatmul.mubr.bf16.gmra.mrb[80].mxu0 %v1837_v30  ;;  %v5184_v30 = vld [vmem:[#allocation45_spill] sm:$0xff] }
 0x6a2   :  { %v1810_v46 = vmul.f32 %v1781_v7, %v1457_v37  ;;  %v1812_v34 = vmul.f32 %v1789_v44, %v1467_v52  ;;  %v1298_v7 = vadd.f32 %v5184_v30, %v4746_v29 }
 0x6a4   :  { %v1843_v3 = vpack.c.bf16 %v1810_v46, %v1809_v63 }
 0x6a5   :  { %3168 = vmatmul.mubr.bf16.vlgmr.msra.gmra.mrb[80].mxu1 %v4803_v31 }
 0x6a6   :  { %v1701_v1 = vpop.permute.xlu1 %1700  ;;  %2505 = vmatprep.mubr.bf16.mxu0 %v1843_v3  ;;  %3171 = vmatprep.mubr.bf16.mxu1 %v4825_v43  ;;  %v5180_v43 = vld [vmem:[#allocation41_spill] sm:$0xff] }
 0x6a7   :  { %v1730_v13 = vmul.f32 %v1701_v1, %v1456_v42  ;;  %v1288_v58 = vadd.f32 %v5180_v43, %v4746_v29  ;;  %v1713_v42 = vpop.permute.xlu0 %1712 }
 0x6a9   :  { %v1842_v0 = vpack.c.bf16 %v1730_v13, %v1729_v19  ;;  %v1466_v51 = vmax.f32 %v1288_v58, 0.0 }
 0x6ab   :  { %v1785_v39 = vpop.permute.xlu1 %1784  ;;  %2506 = vmatmul.mubr.bf16.gmra.mrb[84].mxu0 %v1842_v0 }
 0x6ac   :  { %v1811_v9 = vmul.f32 %v1785_v39, %v1462_v38 }
 0x6ad   :  { %3172 = vmatmul.mubr.bf16.gmra.mrb[84].mxu1 %v4822_v23  ;;  %v1472_v23 = vmax.f32 %v1296_v20, 0.0 }
 0x6ae   :  { %v1848_v31 = vpack.c.bf16 %v1812_v34, %v1811_v9  ;;  %3175 = vmatprep.mubr.bf16.mxu1 %v4844_v47  ;;  %v1477_v47 = vmax.f32 %v1300_v11, 0.0 }
 0x6af   :  { %v1813_v27 = vmul.f32 %v1793_v6, %v1472_v23 }
 0x6b0   :  { %v1705_v15 = vpop.permute.xlu1 %1704  ;;  %2513 = vmatprep.mubr.bf16.mxu0 %v1848_v31 }
 0x6b1   :  { %v1731_v59 = vmul.f32 %v1705_v15, %v1461_v26 }
 0x6b4   :  { %v1709_v55 = vpop.permute.xlu1 %1708 }
 0x6b5   :  { %v1732_v37 = vmul.f32 %v1709_v55, %v1466_v51  ;;  %3176 = vmatmul.mubr.bf16.gmra.mrb[88].mxu1 %v4842_v33  ;;  %v1476_v33 = vmax.f32 %v1298_v7, 0.0 }
 0x6b6   :  { %3179 = vmatprep.mubr.bf16.mxu1 %v4861_v24  ;;  %v1733_v24 = vmul.f32 %v1713_v42, %v1471_v14 }
 0x6b7   :  { %v1847_v12 = vpack.c.bf16 %v1732_v37, %v1731_v59 }
 0x6b9   :  { %v1797_v63 = vpop.permute.xlu1 %1796  ;;  %2514 = vmatmul.mubr.bf16.gmra.mrb[88].mxu0 %v1847_v12 }
 0x6ba   :  { %v1814_v46 = vmul.f32 %v1797_v63, %v1477_v47 }
 0x6bc   :  { %v1853_v8 = vpack.c.bf16 %v1814_v46, %v1813_v27 }
 0x6bd   :  { %3180 = vmatmul.mubr.bf16.gmra.mrb[92].mxu1 %v4859_v61 }
 0x6be   :  { %v1717_v18 = vpop.permute.xlu1 %1716  ;;  %2521 = vmatprep.mubr.bf16.mxu0 %v1853_v8 }
 0x6bf   :  { %v1734_v41 = vmul.f32 %v1717_v18, %v1476_v33 }
 0x6c1   :  { %v1852_v45 = vpack.c.bf16 %v1734_v41, %v1733_v24 }
 0x6c3   :  { %2522 = vmatmul.mubr.bf16.gmra.mrb[92].mxu0 %v1852_v45 }
 0x6d5   :  { %v2879_v36 = vpop.f32.mrb[48].mxu1 }
 0x6d6   :  { %v2880_v3 = vpop.f32.mrb[49].mxu1 }
 0x6d7   :  { %v2881_v1 = vadd.f32 %v2880_v3, %v2879_v36  ;;  %v2882_v29 = vpop.f32.mrb[50].mxu1 }
 0x6d8   :  { %v2883_v19 = vpop.f32.mrb[51].mxu1 }
 0x6d9   :  { %v2371_v13 = vadd.f32 %v2881_v1, %v4872_v17  ;;  %v2884_v38 = vadd.f32 %v2883_v19, %v2882_v29 }
 0x6da   :  { %v2943_v52 = vpop.f32.mrb[64].mxu0 }
 0x6db   :  { %v2374_v44 = vadd.f32 %v4870_v22, %v2884_v38  ;;  %v2944_v0 = vpop.f32.mrb[65].mxu0 }
 0x6dc   :  { %v2945_v39 = vadd.f32 %v2944_v0, %v2943_v52  ;;  %v2946_v61 = vpop.f32.mrb[66].mxu0 }
 0x6dd   :  { %v2947_v34 = vpop.f32.mrb[67].mxu0 }
 0x6de   :  { %v2948_v9 = vadd.f32 %v2947_v34, %v2946_v61  ;;  %v4991_v56 = vadd.f32 %v2945_v39, %v2371_v13 }
 0x6e0   :  { %v4993_v40 = vadd.f32 %v2948_v9, %v2374_v44 }
 0x6f3   :  { %v2885_v31 = vpop.f32.mrb[52].mxu1 }
 0x6f4   :  { %v2886_v43 = vpop.f32.mrb[53].mxu1 }
 0x6f5   :  { %v2887_v58 = vadd.f32 %v2886_v43, %v2885_v31  ;;  %v2888_v15 = vpop.f32.mrb[54].mxu1 }
 0x6f6   :  { %v2889_v26 = vpop.f32.mrb[55].mxu1 }
 0x6f7   :  { %v2379_v17 = vadd.f32 %v2887_v58, %v4880_v54  ;;  %v2890_v49 = vadd.f32 %v2889_v26, %v2888_v15 }
 0x6f9   :  { %v2382_v20 = vadd.f32 %v4878_v4, %v2890_v49 }
 0x6fd   :  { %v2949_v22 = vpop.f32.mrb[68].mxu0 }
 0x6fe   :  { %v2950_v2 = vpop.f32.mrb[69].mxu0 }
 0x6ff   :  { %v2951_v11 = vadd.f32 %v2950_v2, %v2949_v22  ;;  %v2952_v51 = vpop.f32.mrb[70].mxu0 }
 0x700   :  { %v2953_v55 = vpop.f32.mrb[71].mxu0 }
 0x701   :  { %v2954_v59 = vadd.f32 %v2953_v55, %v2952_v51  ;;  %v4997_v37 = vadd.f32 %v2951_v11, %v2379_v17 }
 0x703   :  { %v4999_v23 = vadd.f32 %v2954_v59, %v2382_v20 }
 0x711   :  { %v2891_v47 = vpop.f32.mrb[56].mxu1 }
 0x712   :  { %v2892_v6 = vpop.f32.mrb[57].mxu1 }
 0x713   :  { %v2893_v28 = vadd.f32 %v2892_v6, %v2891_v47  ;;  %v2894_v5 = vpop.f32.mrb[58].mxu1 }
 0x714   :  { %v2895_v12 = vpop.f32.mrb[59].mxu1 }
 0x715   :  { %v2387_v54 = vadd.f32 %v2893_v28, %v4888_v48  ;;  %v2896_v30 = vadd.f32 %v2895_v12, %v2894_v5 }
 0x717   :  { %v2390_v4 = vadd.f32 %v4882_v25, %v2896_v30  ;;  %v2955_v7 = vpop.f32.mrb[72].mxu0 }
 0x718   :  { %v2956_v63 = vpop.f32.mrb[73].mxu0 }
 0x719   :  { %v2957_v27 = vadd.f32 %v2956_v63, %v2955_v7  ;;  %v2958_v46 = vpop.f32.mrb[74].mxu0 }
 0x71a   :  { %v2959_v14 = vpop.f32.mrb[75].mxu0 }
 0x71b   :  { %v2960_v42 = vadd.f32 %v2959_v14, %v2958_v46  ;;  %v5003_v8 = vadd.f32 %v2957_v27, %v2387_v54 }
 0x71d   :  { %v5005_v33 = vadd.f32 %v2960_v42, %v2390_v4 }
 0x71e   :  { %3634 = shalt.err (!%p3631_p2)
}
 0x71f   :  { %s3635_s16 = scalar_lea.hbm %s5101_s9, 2048 }
 0x720   :  { %p3636_p3 = scmp.ne.s32.totalorder %s5101_s9, %s3635_s16  ;;  %p3639_p4 = scmp.lt.u32.totalorder %s3635_s16, %s5101_s9 }
 0x722   :  { %p3641_p5 = pnand %p3639_p4, %p3636_p3 }
 0x724   :  { %3644 = shalt.err (!%p3641_p5)
}
 0x725   :  { %2689 = dma.vmem_to_hbm [thread:$0]  %s2684_s1, 2048, %s5101_s9, [#allocation13], %s3679_s21, %s3679_s21, %s3680_s22  }
 0x726   :  { %v5047_v42 = vld [vmem:[%s5099_s7] ss:$0 sm:$0xff]  ;;  %s3693_s7 = smov [#allocation11]  }
 0x727   :  { %s2671_s26 = sshll.u32 %s3693_s7, 4  ;;  %s2672_s26 = int_to_ptr.vmem [resolvable:$true] %s2671_s26 }
 0x728   :  { %s3645_s27 = scalar_lea.vmem %s2672_s26, 2048  ;;  %p3650_p7 = scmp.lt.s32.totalorder %s2672_s26, %s2672_s26 }
 0x729   :  { %p3646_p6 = scmp.ne.s32.totalorder %s2672_s26, %s3645_s27  ;;  %p3651_p8 = scmp.lt.s32.totalorder %s3645_s27, %s3645_s27 }
 0x72b   :  { %v2897_v25 = vpop.f32.mrb[60].mxu1  ;;  %p3652_p9 = por %p3651_p8, %p3650_p7 }
 0x72c   :  { %v2898_v48 = vpop.f32.mrb[61].mxu1 }
 0x72d   :  { %v2899_v18 = vadd.f32 %v2898_v48, %v2897_v25  ;;  %v2900_v24 = vpop.f32.mrb[62].mxu1  ;;  %p3653_p10 = pnand %p3652_p9, %p3646_p6 }
 0x72e   :  { %v2901_v41 = vpop.f32.mrb[63].mxu1 }
 0x72f   :  { %v2395_v45 = vadd.f32 %v2899_v18, %v4892_v21  ;;  %v2902_v36 = vadd.f32 %v2901_v41, %v2900_v24  ;;  %v2961_v3 = vpop.f32.mrb[76].mxu0 }
 0x730   :  { %v2962_v1 = vpop.f32.mrb[77].mxu0 }
 0x731   :  { %v2398_v29 = vadd.f32 %v4890_v16, %v2902_v36  ;;  %v2963_v19 = vadd.f32 %v2962_v1, %v2961_v3  ;;  %v2964_v13 = vpop.f32.mrb[78].mxu0 }
 0x732   :  { %v2965_v38 = vpop.f32.mrb[79].mxu0 }
 0x733   :  { %v2966_v52 = vadd.f32 %v2965_v38, %v2964_v13  ;;  %v5024_v44 = vadd.f32 %v2963_v19, %v2395_v45 }
 0x735   :  { %v5026_v0 = vadd.f32 %v2966_v52, %v2398_v29 }
 0x73f   :  { %v2903_v39 = vpop.f32.mrb[64].mxu1 }
 0x740   :  { %v2904_v61 = vpop.f32.mrb[65].mxu1 }
 0x741   :  { %v2905_v34 = vadd.f32 %v2904_v61, %v2903_v39  ;;  %v2906_v9 = vpop.f32.mrb[66].mxu1 }
 0x742   :  { %v2907_v31 = vpop.f32.mrb[67].mxu1 }
 0x743   :  { %v2403_v21 = vadd.f32 %v2905_v34, %v4900_v60  ;;  %v2908_v43 = vadd.f32 %v2907_v31, %v2906_v9 }
 0x745   :  { %v2406_v58 = vadd.f32 %v4898_v50, %v2908_v43 }
 0x752   :  { %v2909_v15 = vpop.f32.mrb[68].mxu1 }
 0x753   :  { %v2910_v16 = vpop.f32.mrb[69].mxu1 }
 0x754   :  { %v2911_v26 = vadd.f32 %v2910_v16, %v2909_v15  ;;  %v2912_v17 = vpop.f32.mrb[70].mxu1 }
 0x755   :  { %v2913_v49 = vpop.f32.mrb[71].mxu1 }
 0x756   :  { %v2411_v20 = vadd.f32 %v2911_v26, %v4904_v10  ;;  %v2914_v22 = vadd.f32 %v2913_v49, %v2912_v17 }
 0x758   :  { %v2414_v2 = vadd.f32 %v4902_v32, %v2914_v22 }
 0x760   :  { %v2915_v11 = vpop.f32.mrb[72].mxu1 }
 0x761   :  { %v2916_v51 = vpop.f32.mrb[73].mxu1 }
 0x762   :  { %v2917_v55 = vadd.f32 %v2916_v51, %v2915_v11  ;;  %v2918_v59 = vpop.f32.mrb[74].mxu1 }
 0x763   :  { %v2919_v47 = vpop.f32.mrb[75].mxu1 }
 0x764   :  { %v5033_v60 = vadd.f32 %v2917_v55, %v4912_v53  ;;  %v2920_v6 = vadd.f32 %v2919_v47, %v2918_v59 }
 0x766   :  { %v5036_v50 = vadd.f32 %v4910_v62, %v2920_v6 }
 0x770   :  { %v2921_v28 = vpop.f32.mrb[76].mxu1 }
 0x771   :  { %v2922_v5 = vpop.f32.mrb[77].mxu1 }
 0x772   :  { %v2923_v12 = vadd.f32 %v2922_v5, %v2921_v28  ;;  %v2924_v54 = vpop.f32.mrb[78].mxu1 }
 0x773   :  { %v2925_v10 = vpop.f32.mrb[79].mxu1 }
 0x774   :  { %v5039_v30 = vadd.f32 %v2923_v12, %v4920_v35  ;;  %v2926_v32 = vadd.f32 %v2925_v10, %v2924_v54  ;;  %v2967_v4 = vpop.f32.mrb[80].mxu0 }
 0x775   :  { %v2968_v7 = vpop.f32.mrb[81].mxu0 }
 0x776   :  { %v5042_v63 = vadd.f32 %v4918_v57, %v2926_v32  ;;  %v2969_v53 = vadd.f32 %v2968_v7, %v2967_v4  ;;  %v2970_v27 = vpop.f32.mrb[82].mxu0 }
 0x777   :  { %v2971_v46 = vpop.f32.mrb[83].mxu0 }
 0x778   :  { %v2972_v14 = vadd.f32 %v2971_v46, %v2970_v27  ;;  %v3169_v62 = vpop.f32.mrb[80].mxu1  ;;  %v2500_v25 = vadd.f32 %v2969_v53, %v2403_v21 }
 0x779   :  { %v2573_v35 = vadd.f32 %v3169_v62, %v4997_v37  ;;  %v2564_v48 = vpop.f32.mrb[81].mxu1 }
 0x77a   :  { %v2565_v18 = vadd.f32 %v2564_v48, %v4991_v56  ;;  %v3170_v24 = vpop.f32.mrb[82].mxu1  ;;  %v2503_v41 = vadd.f32 %v2972_v14, %v2406_v58 }
 0x77b   :  { %v2636_v57 = vadd.f32 %v5047_v42, %v2573_v35  ;;  %v2576_v45 = vadd.f32 %v3170_v24, %v4999_v23  ;;  %v2567_v36 = vpop.f32.mrb[83].mxu1 }
 0x77c   :  { %v2634_v3 = vadd.f32 %v5047_v42, %v2565_v18  ;;  %v2568_v1 = vadd.f32 %v2567_v36, %v4993_v40 }
 0x77d   :  { %2652 = vst [vmem:[#allocation11 + $0x10] sm:$0xff] %v2636_v57  ;;  %v2637_v29 = vadd.f32 %v5047_v42, %v2576_v45 }
 0x77e   :  { %2650 = vst [vmem:[#allocation11] sm:$0xff] %v2634_v3  ;;  %v2635_v37 = vadd.f32 %v5047_v42, %v2568_v1  ;;  %v2973_v19 = vpop.f32.mrb[84].mxu0 }
 0x77f   :  { %2653 = vst [vmem:[#allocation11 + $0x18] sm:$0xff] %v2637_v29  ;;  %v2974_v56 = vpop.f32.mrb[85].mxu0 }
 0x780   :  { %2651 = vst [vmem:[#allocation11 + $0x8] sm:$0xff] %v2635_v37  ;;  %v2975_v13 = vadd.f32 %v2974_v56, %v2973_v19  ;;  %v2976_v38 = vpop.f32.mrb[86].mxu0  ;;  %v3173_v52 = vpop.f32.mrb[84].mxu1 }
 0x781   :  { %v2589_v23 = vadd.f32 %v3173_v52, %v5024_v44  ;;  %v2977_v39 = vpop.f32.mrb[87].mxu0  ;;  %v2580_v61 = vpop.f32.mrb[85].mxu1 }
 0x782   :  { %v2978_v34 = vadd.f32 %v2977_v39, %v2976_v38  ;;  %v2581_v40 = vadd.f32 %v2580_v61, %v5003_v8  ;;  %v3174_v9 = vpop.f32.mrb[86].mxu1  ;;  %v2508_v31 = vadd.f32 %v2975_v13, %v2411_v20 }
 0x783   :  { %v2640_v21 = vadd.f32 %v5047_v42, %v2589_v23  ;;  %v2592_v43 = vadd.f32 %v3174_v9, %v5026_v0  ;;  %v2583_v58 = vpop.f32.mrb[87].mxu1 }
 0x784   :  { %v2638_v15 = vadd.f32 %v5047_v42, %v2581_v40  ;;  %v2584_v16 = vadd.f32 %v2583_v58, %v5005_v33  ;;  %v2511_v26 = vadd.f32 %v2978_v34, %v2414_v2 }
 0x785   :  { %2656 = vst [vmem:[#allocation11 + $0x30] sm:$0xff] %v2640_v21  ;;  %v2641_v44 = vadd.f32 %v5047_v42, %v2592_v43 }
 0x786   :  { %2654 = vst [vmem:[#allocation11 + $0x20] sm:$0xff] %v2638_v15  ;;  %v2639_v17 = vadd.f32 %v5047_v42, %v2584_v16 }
 0x787   :  { %2657 = vst [vmem:[#allocation11 + $0x38] sm:$0xff] %v2641_v44 }
 0x788   :  { %2655 = vst [vmem:[#allocation11 + $0x28] sm:$0xff] %v2639_v17  ;;  %v3177_v8 = vpop.f32.mrb[88].mxu1 }
 0x789   :  { %v2605_v49 = vadd.f32 %v3177_v8, %v2508_v31  ;;  %v2596_v20 = vpop.f32.mrb[89].mxu1 }
 0x78a   :  { %v2597_v22 = vadd.f32 %v2596_v20, %v2500_v25  ;;  %v3178_v11 = vpop.f32.mrb[90].mxu1 }
 0x78b   :  { %v2644_v0 = vadd.f32 %v5047_v42, %v2605_v49  ;;  %v2608_v51 = vadd.f32 %v3178_v11, %v2511_v26  ;;  %v2599_v55 = vpop.f32.mrb[91].mxu1 }
 0x78c   :  { %v2642_v33 = vadd.f32 %v5047_v42, %v2597_v22  ;;  %v2600_v2 = vadd.f32 %v2599_v55, %v2503_v41  ;;  %v2979_v59 = vpop.f32.mrb[88].mxu0 }
 0x78d   :  { %2660 = vst [vmem:[#allocation11 + $0x50] sm:$0xff] %v2644_v0  ;;  %v2645_v47 = vadd.f32 %v5047_v42, %v2608_v51  ;;  %v2980_v6 = vpop.f32.mrb[89].mxu0 }
 0x78e   :  { %2658 = vst [vmem:[#allocation11 + $0x40] sm:$0xff] %v2642_v33  ;;  %v2643_v28 = vadd.f32 %v5047_v42, %v2600_v2  ;;  %v2981_v5 = vadd.f32 %v2980_v6, %v2979_v59  ;;  %v2982_v12 = vpop.f32.mrb[90].mxu0 }
 0x78f   :  { %2661 = vst [vmem:[#allocation11 + $0x58] sm:$0xff] %v2645_v47  ;;  %v2983_v54 = vpop.f32.mrb[91].mxu0 }
 0x790   :  { %2659 = vst [vmem:[#allocation11 + $0x48] sm:$0xff] %v2643_v28  ;;  %v2984_v10 = vadd.f32 %v2983_v54, %v2982_v12  ;;  %v3181_v32 = vpop.f32.mrb[92].mxu1  ;;  %v2516_v4 = vadd.f32 %v2981_v5, %v5033_v60 }
 0x791   :  { %v2612_v7 = vpop.f32.mrb[93].mxu1 }
 0x792   :  { %v2613_v53 = vadd.f32 %v2612_v7, %v2516_v4  ;;  %v3182_v27 = vpop.f32.mrb[94].mxu1  ;;  %v2519_v46 = vadd.f32 %v2984_v10, %v5036_v50 }
 0x793   :  { %v2615_v14 = vpop.f32.mrb[95].mxu1 }
 0x794   :  { %v2646_v62 = vadd.f32 %v5047_v42, %v2613_v53  ;;  %v2616_v25 = vadd.f32 %v2615_v14, %v2519_v46 }
 0x796   :  { %2662 = vst [vmem:[#allocation11 + $0x60] sm:$0xff] %v2646_v62  ;;  %v2647_v35 = vadd.f32 %v5047_v42, %v2616_v25  ;;  %v2985_v48 = vpop.f32.mrb[92].mxu0 }
 0x797   :  { %v2986_v18 = vpop.f32.mrb[93].mxu0 }
 0x798   :  { %2663 = vst [vmem:[#allocation11 + $0x68] sm:$0xff] %v2647_v35  ;;  %v2987_v24 = vadd.f32 %v2986_v18, %v2985_v48  ;;  %v2988_v41 = vpop.f32.mrb[94].mxu0 }
 0x799   :  { %v2989_v57 = vpop.f32.mrb[95].mxu0 }
 0x79a   :  { %v2524_v60 = vadd.f32 %v2987_v24, %v5039_v30  ;;  %v2990_v45 = vadd.f32 %v2989_v57, %v2988_v41 }
 0x79c   :  { %v2621_v36 = vadd.f32 %v3181_v32, %v2524_v60  ;;  %v2527_v3 = vadd.f32 %v2990_v45, %v5042_v63 }
 0x79e   :  { %v2648_v50 = vadd.f32 %v5047_v42, %v2621_v36  ;;  %v2624_v1 = vadd.f32 %v3182_v27, %v2527_v3 }
 0x7a0   :  { %2664 = vst [vmem:[#allocation11 + $0x70] sm:$0xff] %v2648_v50  ;;  %v2649_v29 = vadd.f32 %v5047_v42, %v2624_v1 }
 0x7a2   :  { %2665 = vst [vmem:[#allocation11 + $0x78] sm:$0xff] %v2649_v29 }
 0x7a3   :  { %3656 = shalt.err (!%p3653_p10)
}
 0x7a4   :  { %s3657_s12 = scalar_lea.hbm %s5100_s8, 2048 }
 0x7a5   :  { %p3658_p11 = scmp.ne.s32.totalorder %s5100_s8, %s3657_s12  ;;  %p3661_p12 = scmp.lt.u32.totalorder %s3657_s12, %s5100_s8 }
 0x7a7   :  { %p3663_p13 = pnand %p3661_p12, %p3658_p11 }
 0x7a9   :  { %3666 = shalt.err (!%p3663_p13)
}
 0x7aa   :  { %2677 = dma.vmem_to_hbm [thread:$0]  %s2672_s26, 2048, %s5100_s8, [#allocation4], %s3679_s21, %s3679_s21, %s3680_s22  }
 0x7ab   :  { %3673 = dma.done.wait [#allocation4], 2048  }
 0x7ac   :  { %3674 = vsyncadd [#allocation4], 4294965248 }
 0x7ad   :  { %3675 = dma.done.wait [#allocation13], 2048  }
 0x7ae   :  { %3676 = vsyncadd [#allocation13], 4294965248 }
 0x7af   :  { %2696 = vsyncpa [#allocation3], 1 }
 0x7b0   :  { %2697 = vsyncpa [#allocation6], 1 }
 0x7b1   :  { %2698 = vsyncpa [#allocation9], 1 }
 0x7b2   :  { %2699 = vsyncpa [#allocation4], 1 }
 0x7b3   :  { %2700 = vsyncpa [#allocation13], 1 }

// kernel: tpu_custom_call.1
= control target key start
LH: loop header
LB: loop body
LE: loop exit
PB: predicated region body
PF: predicated region fallthrough
CT: control target
= control target key end

     0   :  { %15 = vsyncpa [#allocation3], 0  ;;  %s5092_s0 = inlined_call_operand.hbm [shape: f32[128,128], index: 0, kind: input, shape index: {}]   ;;  %s5093_s1 = inlined_call_operand.hbm [shape: f32[128,128], index: 1, kind: input, shape index: {}]   ;;  %s5094_s2 = inlined_call_operand.vmem [shape: f32[1,128], index: 2, kind: input, shape index: {}]   ;;  %s5095_s3 = inlined_call_operand.hbm [shape: bf16[128,640], index: 3, kind: input, shape index: {}]   ;;  %s5096_s4 = inlined_call_operand.vmem [shape: f32[1,640], index: 4, kind: input, shape index: {}]   ;;  %s5097_s5 = inlined_call_operand.hbm [shape: bf16[640,128], index: 5, kind: input, shape index: {}]   ;;  %s5098_s6 = inlined_call_operand.hbm [shape: f32[128,128], index: 6, kind: input, shape index: {}]   ;;  %s5099_s7 = inlined_call_operand.vmem [shape: f32[1,128], index: 7, kind: input, shape index: {}]   ;;  %s5100_s8 = inlined_call_operand.hbm [shape: f32[128,128], index: 8, kind: output, shape index: {0}]   ;;  %s5101_s9 = inlined_call_operand.hbm [shape: f32[128,128], index: 9, kind: output, shape index: {1}]  }
   0x1   :  { %16 = vsyncpa [#allocation6], 0 }
   0x2   :  { %17 = vsyncpa [#allocation9], 0 }
   0x3   :  { %18 = vsyncpa [#allocation4], 0 }
   0x4   :  { %19 = vsyncpa [#allocation13], 0  ;;  %s3677_s30 = smov [#allocation5]   ;;  %s3678_s11 = smov [#allocation8]  }
   0x5   :  { %s37_s10 = sshll.u32 %s3677_s30, 4  ;;  %s65_s12 = sshll.u32 %s3678_s11, 4  ;;  %s38_s10 = int_to_ptr.vmem [resolvable:$true] %s37_s10  ;;  %s3744_s12 = int_to_ptr.vmem [resolvable:$true] %s65_s12 }
   0x6   :  { %s3513_s15 = scalar_lea.hbm %s5093_s1, 2048 }
   0x7   :  { %p3514_p0 = scmp.ne.s32.totalorder %s5093_s1, %s3513_s15  ;;  %p3517_p1 = scmp.lt.u32.totalorder %s3513_s15, %s5093_s1 }
   0x9   :  { %p3519_p2 = pnand %p3517_p1, %p3514_p0 }
   0xb   :  { %3522 = shalt.err (!%p3519_p2)
}
   0xc   :  { %s3523_s20 = scalar_lea.vmem %s38_s10, 2048  ;;  %p3528_p4 = scmp.lt.s32.totalorder %s38_s10, %s38_s10 }
   0xd   :  { %p3524_p3 = scmp.ne.s32.totalorder %s38_s10, %s3523_s20  ;;  %p3529_p5 = scmp.lt.s32.totalorder %s3523_s20, %s3523_s20 }
   0xf   :  { %p3530_p6 = por %p3529_p5, %p3528_p4 }
  0x11   :  { %p3531_p7 = pnand %p3530_p6, %p3524_p3 }
  0x13   :  { %3534 = shalt.err (!%p3531_p7)
}
  0x14   :  { %s3679_s21 = smov 128   ;;  %s3680_s22 = smov 8  }
  0x15   :  { %43 = dma.hbm_to_vmem [thread:$0]  %s5093_s1, 2048, %s38_s10, [#allocation6], %s3679_s21, %s3679_s21, %s3680_s22  }
  0x16   :  { %s3535_s27 = scalar_lea.hbm %s5097_s5, 5120 }
  0x17   :  { %p3536_p8 = scmp.ne.s32.totalorder %s5097_s5, %s3535_s27  ;;  %p3539_p9 = scmp.lt.u32.totalorder %s3535_s27, %s5097_s5 }
  0x19   :  { %p3541_p10 = pnand %p3539_p9, %p3536_p8 }
  0x1b   :  { %3544 = shalt.err (!%p3541_p10)
}
  0x1c   :  { %s3545_s13 = scalar_lea.vmem %s3744_s12, 5120  ;;  %p3550_p12 = scmp.lt.s32.totalorder %s3744_s12, %s3744_s12 }
  0x1d   :  { %p3546_p11 = scmp.ne.s32.totalorder %s3744_s12, %s3545_s13  ;;  %p3551_p13 = scmp.lt.s32.totalorder %s3545_s13, %s3545_s13 }
  0x1f   :  { %p3552_p0 = por %p3551_p13, %p3550_p12 }
  0x21   :  { %p3553_p1 = pnand %p3552_p0, %p3546_p11 }
  0x23   :  { %3556 = shalt.err (!%p3553_p1)
}
  0x24   :  { %s3681_s1 = smov 64   ;;  %s3682_s10 = smov 4  }
  0x25   :  { %71 = dma.hbm_to_vmem [thread:$0]  %s5097_s5, 5120, %s3744_s12, [#allocation9], %s3681_s1, %s3681_s1, %s3682_s10  }
  0x26   :  { %s3683_s16 = smov [#allocation2]   ;;  %s3684_s18 = smov [#allocation7]  }
  0x27   :  { %s25_s17 = sshll.u32 %s3683_s16, 4  ;;  %s51_s19 = sshll.u32 %s3684_s18, 4  ;;  %s26_s17 = int_to_ptr.vmem [resolvable:$true] %s25_s17  ;;  %s3778_s19 = int_to_ptr.vmem [resolvable:$true] %s51_s19 }
  0x28   :  { %s3557_s24 = scalar_lea.hbm %s5092_s0, 2048 }
  0x29   :  { %p3558_p2 = scmp.ne.s32.totalorder %s5092_s0, %s3557_s24  ;;  %p3561_p3 = scmp.lt.u32.totalorder %s3557_s24, %s5092_s0 }
  0x2b   :  { %p3563_p4 = pnand %p3561_p3, %p3558_p2 }
  0x2d   :  { %3566 = shalt.err (!%p3563_p4)
}
  0x2e   :  { %s3567_s5 = scalar_lea.vmem %s26_s17, 2048  ;;  %p3572_p6 = scmp.lt.s32.totalorder %s26_s17, %s26_s17 }
  0x2f   :  { %p3568_p5 = scmp.ne.s32.totalorder %s26_s17, %s3567_s5  ;;  %p3573_p7 = scmp.lt.s32.totalorder %s3567_s5, %s3567_s5 }
  0x31   :  { %p3574_p8 = por %p3573_p7, %p3572_p6 }
  0x33   :  { %p3575_p9 = pnand %p3574_p8, %p3568_p5 }
  0x35   :  { %3578 = shalt.err (!%p3575_p9)
}
  0x36   :  { %31 = dma.hbm_to_vmem [thread:$0]  %s5092_s0, 2048, %s26_s17, [#allocation3], %s3679_s21, %s3679_s21, %s3680_s22  }
  0x37   :  { %s3579_s13 = scalar_lea.hbm %s5095_s3, 5120 }
  0x38   :  { %p3580_p10 = scmp.ne.s32.totalorder %s5095_s3, %s3579_s13  ;;  %p3583_p11 = scmp.lt.u32.totalorder %s3579_s13, %s5095_s3 }
  0x3a   :  { %p3585_p12 = pnand %p3583_p11, %p3580_p10 }
  0x3c   :  { %3588 = shalt.err (!%p3585_p12)
}
  0x3d   :  { %s3589_s16 = scalar_lea.vmem %s3778_s19, 5120  ;;  %p3594_p0 = scmp.lt.s32.totalorder %s3778_s19, %s3778_s19 }
  0x3e   :  { %p3590_p13 = scmp.ne.s32.totalorder %s3778_s19, %s3589_s16  ;;  %p3595_p1 = scmp.lt.s32.totalorder %s3589_s16, %s3589_s16 }
  0x40   :  { %p3596_p2 = por %p3595_p1, %p3594_p0 }
  0x42   :  { %p3597_p3 = pnand %p3596_p2, %p3590_p13 }
  0x44   :  { %3600 = shalt.err (!%p3597_p3)
}
  0x45   :  { %s3685_s0 = smov 320   ;;  %s3686_s17 = smov 20  }
  0x46   :  { %57 = dma.hbm_to_vmem [thread:$0]  %s5095_s3, 5120, %s3778_s19, [#allocation6], %s3685_s0, %s3685_s0, %s3686_s17  }
  0x47   :  { %s3687_s23 = smov [#allocation10]   ;;  %s3601_s27 = scalar_lea.hbm %s5098_s6, 2048 }
  0x48   :  { %s77_s24 = sshll.u32 %s3687_s23, 4  ;;  %p3602_p4 = scmp.ne.s32.totalorder %s5098_s6, %s3601_s27  ;;  %s78_s24 = int_to_ptr.vmem [resolvable:$true] %s77_s24 }
  0x49   :  { %p3605_p5 = scmp.lt.u32.totalorder %s3601_s27, %s5098_s6 }
  0x4b   :  { %p3607_p6 = pnand %p3605_p5, %p3602_p4 }
  0x4d   :  { %3610 = shalt.err (!%p3607_p6)
}
  0x4e   :  { %s3611_s30 = scalar_lea.vmem %s78_s24, 2048  ;;  %p3616_p8 = scmp.lt.s32.totalorder %s78_s24, %s78_s24 }
  0x4f   :  { %p3612_p7 = scmp.ne.s32.totalorder %s78_s24, %s3611_s30  ;;  %p3617_p9 = scmp.lt.s32.totalorder %s3611_s30, %s3611_s30 }
  0x51   :  { %p3618_p10 = por %p3617_p9, %p3616_p8 }
  0x53   :  { %p3619_p11 = pnand %p3618_p10, %p3612_p7 }
  0x55   :  { %3622 = shalt.err (!%p3619_p11)
}
  0x56   :  { %83 = dma.hbm_to_vmem [thread:$0]  %s5098_s6, 2048, %s78_s24, [#allocation9], %s3679_s21, %s3679_s21, %s3680_s22  }
  0x57   :  { %3667 = dma.done.wait [#allocation3], 2048  }
  0x58   :  { %3668 = vsyncadd [#allocation3], 4294965248 }
  0x59   :  { %3669 = dma.done.wait [#allocation6], 7168  }
  0x5a   :  { %3670 = vsyncadd [#allocation6], 4294960128 }
  0x5b   :  { %3671 = dma.done.wait [#allocation9], 7168  }
  0x5c   :  { %3672 = vsyncadd [#allocation9], 4294960128  ;;  %v118_v0 = vld [vmem:[#allocation5] sm:$0xff]  ;;  %v119_v1 = vld [vmem:[#allocation5 + $0x8] sm:$0xff] }
  0x5d   :  { %v120_v2 = vld [vmem:[#allocation5 + $0x10] sm:$0xff]  ;;  %v3183_v3 = vpack.c.bf16 %v119_v1, %v118_v0  ;;  %v121_v4 = vld [vmem:[#allocation5 + $0x18] sm:$0xff]  ;;  %v122_v6 = vld [vmem:[#allocation5 + $0x20] sm:$0xff] }
  0x5e   :  { %v3187_v5 = vpack.c.bf16 %v121_v4, %v120_v2  ;;  %v123_v7 = vld [vmem:[#allocation5 + $0x28] sm:$0xff]  ;;  %v124_v8 = vld [vmem:[#allocation5 + $0x30] sm:$0xff]  ;;  %v125_v10 = vld [vmem:[#allocation5 + $0x38] sm:$0xff] }
  0x5f   :  { %3184 = vmatprep.subr.bf16.mxu0 %v3183_v3  ;;  %v3191_v9 = vpack.c.bf16 %v123_v7, %v122_v6  ;;  %v102_v11 = vld [vmem:[#allocation2] sm:$0xff]  ;;  %v103_v12 = vld [vmem:[#allocation2 + $0x8] sm:$0xff]  ;;  %v104_v14 = vld [vmem:[#allocation2 + $0x10] sm:$0xff]  ;;  %v3195_v28 = vpack.c.bf16 %v125_v10, %v124_v8 }
  0x60   :  { %3186 = vmatpush3.bf16.msra.mxu0 %v3183_v3  ;;  %3039 = vmatprep.mubr.f32.mxu0 %v102_v11  ;;  %v3827_v13 = vpack.c.bf16 %v103_v12, %v102_v11  ;;  %v105_v15 = vld [vmem:[#allocation2 + $0x18] sm:$0xff]  ;;  %v106_v16 = vld [vmem:[#allocation2 + $0x20] sm:$0xff]  ;;  %v107_v18 = vld [vmem:[#allocation2 + $0x28] sm:$0xff] }
  0x61   :  { %3188 = vmatprep.subr.bf16.mxu0 %v3187_v5  ;;  %v3829_v17 = vpack.c.bf16 %v105_v15, %v104_v14  ;;  %v108_v19 = vld [vmem:[#allocation2 + $0x30] sm:$0xff]  ;;  %v109_v20 = vld [vmem:[#allocation2 + $0x38] sm:$0xff]  ;;  %v126_v21 = vld [vmem:[#allocation5 + $0x40] sm:$0xff]  ;;  %v3831_v23 = vpack.c.bf16 %v107_v18, %v106_v16 }
  0x62   :  { %v127_v22 = vld [vmem:[#allocation5 + $0x48] sm:$0xff]  ;;  %v3833_v24 = vpack.c.bf16 %v109_v20, %v108_v19  ;;  %v110_v25 = vld [vmem:[#allocation2 + $0x40] sm:$0xff]  ;;  %v112_v27 = vld [vmem:[#allocation2 + $0x50] sm:$0xff] }
  0x63   :  { %v111_v26 = vld [vmem:[#allocation2 + $0x48] sm:$0xff]  ;;  %v113_v30 = vld [vmem:[#allocation2 + $0x58] sm:$0xff]  ;;  %v114_v31 = vld [vmem:[#allocation2 + $0x60] sm:$0xff]  ;;  %v3199_v40 = vpack.c.bf16 %v127_v22, %v126_v21 }
  0x64   :  { %3190 = vmatpush3.bf16.msra.mxu0 %v3187_v5  ;;  %v3835_v29 = vpack.c.bf16 %v111_v26, %v110_v25  ;;  %v115_v32 = vld [vmem:[#allocation2 + $0x68] sm:$0xff]  ;;  %v3837_v33 = vpack.c.bf16 %v113_v30, %v112_v27  ;;  %v116_v35 = vld [vmem:[#allocation2 + $0x70] sm:$0xff]  ;;  %v117_v36 = vld [vmem:[#allocation2 + $0x78] sm:$0xff] }
  0x65   :  { %3192 = vmatprep.subr.bf16.mxu0 %v3191_v9  ;;  %v3839_v34 = vpack.c.bf16 %v115_v32, %v114_v31  ;;  %v3841_v37 = vpack.c.bf16 %v117_v36, %v116_v35  ;;  %v128_v38 = vld [vmem:[#allocation5 + $0x50] sm:$0xff]  ;;  %v129_v39 = vld [vmem:[#allocation5 + $0x58] sm:$0xff]  ;;  %v130_v41 = vld [vmem:[#allocation5 + $0x60] sm:$0xff] }
  0x66   :  { %v131_v42 = vld [vmem:[#allocation5 + $0x68] sm:$0xff]  ;;  %v3203_v43 = vpack.c.bf16 %v129_v39, %v128_v38  ;;  %v132_v44 = vld [vmem:[#allocation5 + $0x70] sm:$0xff]  ;;  %v133_v45 = vld [vmem:[#allocation5 + $0x78] sm:$0xff] }
  0x67   :  { %v3207_v46 = vpack.c.bf16 %v131_v42, %v130_v41  ;;  %v3211_v47 = vpack.c.bf16 %v133_v45, %v132_v44  ;;  %v2701_v48 = vld [vmem:[%s5094_s2] ss:$0 sm:$0xff] }
  0x68   :  { %3194 = vmatpush3.bf16.msra.mxu0 %v3191_v9 }
  0x69   :  { %3196 = vmatprep.subr.bf16.mxu0 %v3195_v28 }
  0x6c   :  { %3198 = vmatpush3.bf16.msra.mxu0 %v3195_v28 }
  0x6d   :  { %3200 = vmatprep.subr.bf16.mxu0 %v3199_v40 }
  0x70   :  { %3202 = vmatpush3.bf16.msra.mxu0 %v3199_v40 }
  0x71   :  { %3204 = vmatprep.subr.bf16.mxu0 %v3203_v43 }
  0x74   :  { %3206 = vmatpush3.bf16.msra.mxu0 %v3203_v43 }
  0x75   :  { %3208 = vmatprep.subr.bf16.mxu0 %v3207_v46 }
  0x78   :  { %3210 = vmatpush3.bf16.msra.mxu0 %v3207_v46 }
  0x79   :  { %3212 = vmatprep.subr.bf16.mxu0 %v3211_v47 }
  0x7c   :  { %3214 = vmatpush3.bf16.msra.mxu0 %v3211_v47 }
  0x7f   :  { %3040 = vmatmul.mubr.f32.vlgmr.msra.gmra.mrb[0].mxu0 %v103_v12 }
  0x80   :  { %3042 = vmatprep.mubr.f32.mxu0 %v104_v14 }
  0x83   :  { %3043 = vmatmul.mubr.f32.gmra.mrb[2].mxu0 %v105_v15 }
  0x84   :  { %3045 = vmatprep.mubr.f32.mxu0 %v106_v16 }
  0x87   :  { %3046 = vmatmul.mubr.f32.gmra.mrb[4].mxu0 %v107_v18 }
  0x88   :  { %3048 = vmatprep.mubr.f32.mxu0 %v108_v19 }
  0x8b   :  { %3049 = vmatmul.mubr.f32.gmra.mrb[6].mxu0 %v109_v20 }
  0x8c   :  { %3051 = vmatprep.mubr.f32.mxu0 %v110_v25 }
  0x8f   :  { %3052 = vmatmul.mubr.f32.gmra.mrb[8].mxu0 %v111_v26 }
  0x90   :  { %3054 = vmatprep.mubr.f32.mxu0 %v112_v27 }
  0x93   :  { %3055 = vmatmul.mubr.f32.gmra.mrb[10].mxu0 %v113_v30 }
  0x94   :  { %3057 = vmatprep.mubr.f32.mxu0 %v114_v31 }
  0x97   :  { %3058 = vmatmul.mubr.f32.gmra.mrb[12].mxu0 %v115_v32 }
  0x98   :  { %3060 = vmatprep.mubr.f32.mxu0 %v116_v35 }
  0x9b   :  { %3061 = vmatmul.mubr.f32.gmra.mrb[14].mxu0 %v117_v36 }
 0x152   :  { %v3041_v49 = vpop.f32.mrb[0].mxu0 }
 0x153   :  { %v207_v50 = vpop.f32.mrb[1].mxu0  ;;  %v213_v54 = vadd.f32 %v3041_v49, %v2701_v48 }
 0x154   :  { %v208_v51 = vadd.f32 %v2701_v48, %v207_v50 }
 0x156   :  { %v3044_v52 = vpop.f32.mrb[2].mxu0  ;;  %286 = vmax.xlane.f32.xlu0 %v208_v51 }
 0x157   :  { %v217_v53 = vpop.f32.mrb[3].mxu0  ;;  %v223_v56 = vadd.f32 %v3044_v52, %v2701_v48 }
 0x158   :  { %v218_v55 = vadd.f32 %v2701_v48, %v217_v53 }
 0x15a   :  { %v3047_v57 = vpop.f32.mrb[4].mxu0  ;;  %290 = vmax.xlane.f32.xlu1 %v218_v55  ;;  %288 = vmax.xlane.f32.xlu0 %v213_v54 }
 0x15b   :  { %v227_v58 = vpop.f32.mrb[5].mxu0  ;;  %v233_v60 = vadd.f32 %v3047_v57, %v2701_v48 }
 0x15c   :  { %v228_v59 = vadd.f32 %v2701_v48, %v227_v58 }
 0x15e   :  { %v3050_v61 = vpop.f32.mrb[6].mxu0  ;;  %292 = vmax.xlane.f32.xlu1 %v223_v56  ;;  %294 = vmax.xlane.f32.xlu0 %v228_v59 }
 0x15f   :  { %v237_v62 = vpop.f32.mrb[7].mxu0  ;;  %v3846_v0 = vadd.f32 %v3050_v61, %v2701_v48 }
 0x160   :  { %v238_v63 = vadd.f32 %v2701_v48, %v237_v62 }
 0x162   :  { %v3053_v1 = vpop.f32.mrb[8].mxu0  ;;  %296 = vmax.xlane.f32.xlu1 %v233_v60  ;;  %298 = vmax.xlane.f32.xlu0 %v238_v63 }
 0x163   :  { %v247_v2 = vpop.f32.mrb[9].mxu0  ;;  %v3848_v4 = vadd.f32 %v3053_v1, %v2701_v48 }
 0x164   :  { %v248_v3 = vadd.f32 %v2701_v48, %v247_v2 }
 0x166   :  { %v3056_v5 = vpop.f32.mrb[10].mxu0  ;;  %300 = vmax.xlane.f32.xlu1 %v3846_v0  ;;  %302 = vmax.xlane.f32.xlu0 %v248_v3 }
 0x167   :  { %v257_v6 = vpop.f32.mrb[11].mxu0  ;;  %v3853_v8 = vadd.f32 %v3056_v5, %v2701_v48 }
 0x168   :  { %v3851_v7 = vadd.f32 %v2701_v48, %v257_v6 }
 0x16a   :  { %v3059_v9 = vpop.f32.mrb[12].mxu0  ;;  %304 = vmax.xlane.f32.xlu1 %v3848_v4  ;;  %306 = vmax.xlane.f32.xlu0 %v3851_v7 }
 0x16b   :  { %v267_v10 = vpop.f32.mrb[13].mxu0  ;;  %v3859_v12 = vadd.f32 %v3059_v9, %v2701_v48 }
 0x16c   :  { %v3857_v11 = vadd.f32 %v2701_v48, %v267_v10 }
 0x16e   :  { %v3062_v14 = vpop.f32.mrb[14].mxu0  ;;  %308 = vmax.xlane.f32.xlu1 %v3853_v8  ;;  %310 = vmax.xlane.f32.xlu0 %v3857_v11 }
 0x16f   :  { %v277_v15 = vpop.f32.mrb[15].mxu0  ;;  %v3865_v18 = vadd.f32 %v3062_v14, %v2701_v48 }
 0x170   :  { %v3863_v16 = vadd.f32 %v2701_v48, %v277_v15 }
 0x172   :  { %312 = vmax.xlane.f32.xlu1 %v3859_v12  ;;  %314 = vmax.xlane.f32.xlu0 %v3863_v16 }
 0x176   :  { %316 = vmax.xlane.f32.xlu1 %v3865_v18 }
 0x1e3   :  { %v287_v19 = vpop.xlane.xlu0 %286 }
 0x1e4   :  { %v318_v20 = vsub.f32 %v208_v51, %v287_v19 }
 0x1e6   :  { %v334_v21 = vmul.f32 1.442695, %v318_v20 }
 0x1e7   :  { %v291_v22 = vpop.xlane.xlu1 %290  ;;  %v289_v25 = vpop.xlane.xlu0 %288 }
 0x1e8   :  { %3417 = vpow2.f32 %v334_v21  ;;  %v320_v26 = vsub.f32 %v218_v55, %v291_v22  ;;  %v319_v27 = vsub.f32 %v213_v54, %v289_v25 }
 0x1ea   :  { %v338_v28 = vmul.f32 1.442695, %v320_v26  ;;  %v336_v30 = vmul.f32 1.442695, %v319_v27 }
 0x1eb   :  { %v293_v31 = vpop.xlane.xlu1 %292  ;;  %v295_v32 = vpop.xlane.xlu0 %294 }
 0x1ec   :  { %3419 = vpow2.f32 %v338_v28  ;;  %v321_v35 = vsub.f32 %v223_v56, %v293_v31  ;;  %v322_v36 = vsub.f32 %v228_v59, %v295_v32 }
 0x1ed   :  { %3421 = vpow2.f32 %v336_v30 }
 0x1ee   :  { %v340_v38 = vmul.f32 1.442695, %v321_v35  ;;  %v342_v39 = vmul.f32 1.442695, %v322_v36 }
 0x1ef   :  { %v297_v40 = vpop.xlane.xlu1 %296  ;;  %v299_v41 = vpop.xlane.xlu0 %298 }
 0x1f0   :  { %3423 = vpow2.f32 %v340_v38  ;;  %v323_v42 = vsub.f32 %v233_v60, %v297_v40  ;;  %v324_v43 = vsub.f32 %v238_v63, %v299_v41 }
 0x1f1   :  { %3425 = vpow2.f32 %v342_v39 }
 0x1f2   :  { %v3870_v44 = vpop.eup %3417  ;;  %v344_v45 = vmul.f32 1.442695, %v323_v42  ;;  %v346_v46 = vmul.f32 1.442695, %v324_v43 }
 0x1f3   :  { %v301_v47 = vpop.xlane.xlu1 %300  ;;  %366 = vadd.xlane.f32.xlu0 %v3870_v44  ;;  %v303_v48 = vpop.xlane.xlu0 %302 }
 0x1f4   :  { %3427 = vpow2.f32 %v344_v45  ;;  %v325_v49 = vsub.f32 %v3846_v0, %v301_v47  ;;  %v326_v50 = vsub.f32 %v248_v3, %v303_v48 }
 0x1f5   :  { %3429 = vpow2.f32 %v346_v46 }
 0x1f6   :  { %v3874_v51 = vpop.eup %3419  ;;  %v348_v52 = vmul.f32 1.442695, %v325_v49  ;;  %v350_v53 = vmul.f32 1.442695, %v326_v50 }
 0x1f7   :  { %v3876_v54 = vpop.eup %3421  ;;  %v305_v55 = vpop.xlane.xlu1 %304  ;;  %370 = vadd.xlane.f32.xlu0 %v3874_v51 }
 0x1f8   :  { %v307_v56 = vpop.xlane.xlu0 %306  ;;  %3431 = vpow2.f32 %v348_v52  ;;  %v327_v57 = vsub.f32 %v3848_v4, %v305_v55  ;;  %368 = vadd.xlane.f32.xlu1 %v3876_v54 }
 0x1f9   :  { %v328_v58 = vsub.f32 %v3851_v7, %v307_v56  ;;  %3433 = vpow2.f32 %v350_v53 }
 0x1fa   :  { %v3882_v59 = vpop.eup %3423  ;;  %v352_v60 = vmul.f32 1.442695, %v327_v57 }
 0x1fb   :  { %v354_v61 = vmul.f32 1.442695, %v328_v58  ;;  %v3884_v62 = vpop.eup %3425  ;;  %v309_v63 = vpop.xlane.xlu1 %308 }
 0x1fc   :  { %v311_v0 = vpop.xlane.xlu0 %310  ;;  %3435 = vpow2.f32 %v352_v60  ;;  %v329_v1 = vsub.f32 %v3853_v8, %v309_v63  ;;  %372 = vadd.xlane.f32.xlu1 %v3882_v59  ;;  %374 = vadd.xlane.f32.xlu0 %v3884_v62 }
 0x1fd   :  { %v330_v2 = vsub.f32 %v3857_v11, %v311_v0  ;;  %3437 = vpow2.f32 %v354_v61 }
 0x1fe   :  { %v3890_v3 = vpop.eup %3427  ;;  %v356_v4 = vmul.f32 1.442695, %v329_v1 }
 0x1ff   :  { %v358_v5 = vmul.f32 1.442695, %v330_v2  ;;  %v3892_v6 = vpop.eup %3429  ;;  %v313_v7 = vpop.xlane.xlu1 %312 }
 0x200   :  { %v315_v9 = vpop.xlane.xlu0 %314  ;;  %3439 = vpow2.f32 %v356_v4  ;;  %v331_v10 = vsub.f32 %v3859_v12, %v313_v7  ;;  %376 = vadd.xlane.f32.xlu1 %v3890_v3  ;;  %378 = vadd.xlane.f32.xlu0 %v3892_v6 }
 0x201   :  { %v332_v8 = vsub.f32 %v3863_v16, %v315_v9  ;;  %3441 = vpow2.f32 %v358_v5 }
 0x202   :  { %v3898_v11 = vpop.eup %3431  ;;  %v360_v14 = vmul.f32 1.442695, %v331_v10 }
 0x203   :  { %v362_v15 = vmul.f32 1.442695, %v332_v8  ;;  %v3900_v19 = vpop.eup %3433  ;;  %v317_v20 = vpop.xlane.xlu1 %316 }
 0x204   :  { %3443 = vpow2.f32 %v360_v14  ;;  %v333_v21 = vsub.f32 %v3865_v18, %v317_v20  ;;  %380 = vadd.xlane.f32.xlu1 %v3898_v11  ;;  %382 = vadd.xlane.f32.xlu0 %v3900_v19 }
 0x205   :  { %3445 = vpow2.f32 %v362_v15 }
 0x206   :  { %v3905_v12 = vpop.eup %3435  ;;  %v364_v22 = vmul.f32 1.442695, %v333_v21 }
 0x207   :  { %v3907_v16 = vpop.eup %3437 }
 0x208   :  { %3447 = vpow2.f32 %v364_v22  ;;  %384 = vadd.xlane.f32.xlu1 %v3905_v12  ;;  %386 = vadd.xlane.f32.xlu0 %v3907_v16 }
 0x20a   :  { %v3911_v25 = vpop.eup %3439 }
 0x20b   :  { %v3913_v26 = vpop.eup %3441 }
 0x20c   :  { %388 = vadd.xlane.f32.xlu1 %v3911_v25  ;;  %390 = vadd.xlane.f32.xlu0 %v3913_v26 }
 0x20e   :  { %v3917_v18 = vpop.eup %3443 }
 0x20f   :  { %v3919_v27 = vpop.eup %3445 }
 0x210   :  { %392 = vadd.xlane.f32.xlu1 %v3917_v18  ;;  %394 = vadd.xlane.f32.xlu0 %v3919_v27 }
 0x212   :  { %v3923_v28 = vpop.eup %3447 }
 0x214   :  { %396 = vadd.xlane.f32.xlu1 %v3923_v28 }
 0x280   :  { %v367_v30 = vpop.xlane.xlu0 %366 }
 0x281   :  { %3449 = vrcp.f32 %v367_v30 }
 0x284   :  { %v371_v31 = vpop.xlane.xlu0 %370 }
 0x285   :  { %v369_v32 = vpop.xlane.xlu1 %368  ;;  %3451 = vrcp.f32 %v371_v31 }
 0x286   :  { %3453 = vrcp.f32 %v369_v32 }
 0x289   :  { %v373_v35 = vpop.xlane.xlu1 %372  ;;  %v375_v36 = vpop.xlane.xlu0 %374 }
 0x28a   :  { %3455 = vrcp.f32 %v373_v35 }
 0x28b   :  { %v3450_v38 = vpop.eup %3449  ;;  %3457 = vrcp.f32 %v375_v36 }
 0x28c   :  { %v3927_v39 = vmul.f32 %v3450_v38, %v3870_v44 }
 0x28d   :  { %v377_v40 = vpop.xlane.xlu1 %376  ;;  %v379_v41 = vpop.xlane.xlu0 %378 }
 0x28e   :  { %430 = vst [vmem:[#allocation12] sm:$0xff] %v3927_v39  ;;  %3459 = vrcp.f32 %v377_v40  ;;  %449 = vmax.xlane.f32.xlu0 %v3927_v39 }
 0x28f   :  { %v3452_v42 = vpop.eup %3451  ;;  %3461 = vrcp.f32 %v379_v41 }
 0x290   :  { %v3454_v43 = vpop.eup %3453  ;;  %v3932_v45 = vmul.f32 %v3452_v42, %v3874_v51 }
 0x291   :  { %v3935_v46 = vmul.f32 %v3454_v43, %v3876_v54  ;;  %v381_v47 = vpop.xlane.xlu1 %380  ;;  %v383_v48 = vpop.xlane.xlu0 %382 }
 0x292   :  { %432 = vst [vmem:[#allocation12 + $0x10] sm:$0xff] %v3932_v45  ;;  %3463 = vrcp.f32 %v381_v47  ;;  %453 = vmax.xlane.f32.xlu0 %v3932_v45 }
 0x293   :  { %431 = vst [vmem:[#allocation12 + $0x8] sm:$0xff] %v3935_v46  ;;  %3465 = vrcp.f32 %v383_v48  ;;  %451 = vmax.xlane.f32.xlu1 %v3935_v46 }
 0x294   :  { %v3456_v44 = vpop.eup %3455 }
 0x295   :  { %v3458_v49 = vpop.eup %3457  ;;  %v3942_v50 = vmul.f32 %v3456_v44, %v3882_v59  ;;  %v385_v51 = vpop.xlane.xlu1 %384 }
 0x296   :  { %v387_v52 = vpop.xlane.xlu0 %386  ;;  %v3945_v53 = vmul.f32 %v3458_v49, %v3884_v62  ;;  %3467 = vrcp.f32 %v385_v51 }
 0x297   :  { %433 = vst [vmem:[#allocation12 + $0x18] sm:$0xff] %v3942_v50  ;;  %3469 = vrcp.f32 %v387_v52  ;;  %455 = vmax.xlane.f32.xlu1 %v3942_v50 }
 0x298   :  { %v3460_v54 = vpop.eup %3459  ;;  %434 = vst [vmem:[#allocation12 + $0x20] sm:$0xff] %v3945_v53  ;;  %457 = vmax.xlane.f32.xlu0 %v3945_v53 }
 0x299   :  { %v3462_v55 = vpop.eup %3461  ;;  %v3952_v56 = vmul.f32 %v3460_v54, %v3890_v3  ;;  %v389_v57 = vpop.xlane.xlu1 %388 }
 0x29a   :  { %v391_v58 = vpop.xlane.xlu0 %390  ;;  %v3955_v59 = vmul.f32 %v3462_v55, %v3892_v6  ;;  %3471 = vrcp.f32 %v389_v57 }
 0x29b   :  { %435 = vst [vmem:[#allocation12 + $0x28] sm:$0xff] %v3952_v56  ;;  %3473 = vrcp.f32 %v391_v58  ;;  %459 = vmax.xlane.f32.xlu1 %v3952_v56 }
 0x29c   :  { %v3464_v60 = vpop.eup %3463  ;;  %436 = vst [vmem:[#allocation12 + $0x30] sm:$0xff] %v3955_v59  ;;  %461 = vmax.xlane.f32.xlu0 %v3955_v59 }
 0x29d   :  { %v3466_v61 = vpop.eup %3465  ;;  %v3962_v62 = vmul.f32 %v3464_v60, %v3898_v11  ;;  %v393_v63 = vpop.xlane.xlu1 %392 }
 0x29e   :  { %v395_v0 = vpop.xlane.xlu0 %394  ;;  %v3965_v1 = vmul.f32 %v3466_v61, %v3900_v19  ;;  %3475 = vrcp.f32 %v393_v63 }
 0x29f   :  { %437 = vst [vmem:[#allocation12 + $0x38] sm:$0xff] %v3962_v62  ;;  %3477 = vrcp.f32 %v395_v0  ;;  %463 = vmax.xlane.f32.xlu1 %v3962_v62 }
 0x2a0   :  { %v3468_v2 = vpop.eup %3467  ;;  %438 = vst [vmem:[#allocation12 + $0x40] sm:$0xff] %v3965_v1  ;;  %465 = vmax.xlane.f32.xlu0 %v3965_v1 }
 0x2a1   :  { %v3470_v3 = vpop.eup %3469  ;;  %v3972_v4 = vmul.f32 %v3468_v2, %v3905_v12  ;;  %v397_v5 = vpop.xlane.xlu1 %396  ;;  %v5105_v12 = vlaneseq }
 0x2a2   :  { %v3975_v6 = vmul.f32 %v3470_v3, %v3907_v16  ;;  %3479 = vrcp.f32 %v397_v5 }
 0x2a3   :  { %439 = vst [vmem:[#allocation12 + $0x48] sm:$0xff] %v3972_v4  ;;  %467 = vmax.xlane.f32.xlu1 %v3972_v4  ;;  %v447_v22 = vand.u32 127, %v5105_v12 }
 0x2a4   :  { %v3472_v7 = vpop.eup %3471  ;;  %440 = vst [vmem:[#allocation12 + $0x50] sm:$0xff] %v3975_v6  ;;  %469 = vmax.xlane.f32.xlu0 %v3975_v6 }
 0x2a5   :  { %v3474_v9 = vpop.eup %3473  ;;  %v3982_v10 = vmul.f32 %v3472_v7, %v3911_v25  ;;  %v4007_v16 = vcvt.s32.f32 %v447_v22 }
 0x2a6   :  { %v3985_v8 = vmul.f32 %v3474_v9, %v3913_v26 }
 0x2a7   :  { %441 = vst [vmem:[#allocation12 + $0x58] sm:$0xff] %v3982_v10  ;;  %471 = vmax.xlane.f32.xlu1 %v3982_v10 }
 0x2a8   :  { %v3476_v11 = vpop.eup %3475  ;;  %442 = vst [vmem:[#allocation12 + $0x60] sm:$0xff] %v3985_v8  ;;  %473 = vmax.xlane.f32.xlu0 %v3985_v8 }
 0x2a9   :  { %v3478_v14 = vpop.eup %3477  ;;  %v3992_v15 = vmul.f32 %v3476_v11, %v3917_v18 }
 0x2aa   :  { %v3995_v19 = vmul.f32 %v3478_v14, %v3919_v27 }
 0x2ab   :  { %443 = vst [vmem:[#allocation12 + $0x68] sm:$0xff] %v3992_v15  ;;  %475 = vmax.xlane.f32.xlu1 %v3992_v15 }
 0x2ac   :  { %v3480_v20 = vpop.eup %3479  ;;  %444 = vst [vmem:[#allocation12 + $0x70] sm:$0xff] %v3995_v19  ;;  %477 = vmax.xlane.f32.xlu0 %v3995_v19 }
 0x2ad   :  { %v4002_v21 = vmul.f32 %v3480_v20, %v3923_v28 }
 0x2af   :  { %445 = vst [vmem:[#allocation12 + $0x78] sm:$0xff] %v4002_v21  ;;  %479 = vmax.xlane.f32.xlu1 %v4002_v21 }
 0x31b   :  { %v450_v25 = vpop.xlane.xlu0 %449 }
 0x31c   :  { %vm481_vm0 = vcmp.eq.f32.partialorder %v3927_v39, %v450_v25 }
 0x31d   :  { %v497_v26 = vsel %vm481_vm0, %v4007_v16, 128.0 }
 0x31e   :  { %513 = vmin.xlane.f32.xlu0 %v497_v26 }
 0x31f   :  { %v454_v18 = vpop.xlane.xlu0 %453 }
 0x320   :  { %v452_v27 = vpop.xlane.xlu1 %451  ;;  %vm483_vm1 = vcmp.eq.f32.partialorder %v3932_v45, %v454_v18 }
 0x321   :  { %vm482_vm2 = vcmp.eq.f32.partialorder %v3935_v46, %v452_v27  ;;  %v499_v28 = vsel %vm483_vm1, %v4007_v16, 128.0 }
 0x322   :  { %v498_v30 = vsel %vm482_vm2, %v4007_v16, 128.0  ;;  %517 = vmin.xlane.f32.xlu0 %v499_v28 }
 0x323   :  { %515 = vmin.xlane.f32.xlu1 %v498_v30 }
 0x324   :  { %v456_v31 = vpop.xlane.xlu1 %455 }
 0x325   :  { %v458_v32 = vpop.xlane.xlu0 %457  ;;  %vm484_vm3 = vcmp.eq.f32.partialorder %v3942_v50, %v456_v31 }
 0x326   :  { %v500_v35 = vsel %vm484_vm3, %v4007_v16, 128.0  ;;  %vm485_vm4 = vcmp.eq.f32.partialorder %v3945_v53, %v458_v32 }
 0x327   :  { %519 = vmin.xlane.f32.xlu1 %v500_v35  ;;  %v501_v36 = vsel %vm485_vm4, %v4007_v16, 128.0 }
 0x328   :  { %521 = vmin.xlane.f32.xlu0 %v501_v36  ;;  %v460_v38 = vpop.xlane.xlu1 %459 }
 0x329   :  { %v462_v40 = vpop.xlane.xlu0 %461  ;;  %vm486_vm5 = vcmp.eq.f32.partialorder %v3952_v56, %v460_v38 }
 0x32a   :  { %v502_v41 = vsel %vm486_vm5, %v4007_v16, 128.0  ;;  %vm487_vm6 = vcmp.eq.f32.partialorder %v3955_v59, %v462_v40 }
 0x32b   :  { %523 = vmin.xlane.f32.xlu1 %v502_v41  ;;  %v503_v42 = vsel %vm487_vm6, %v4007_v16, 128.0 }
 0x32c   :  { %525 = vmin.xlane.f32.xlu0 %v503_v42  ;;  %v464_v43 = vpop.xlane.xlu1 %463 }
 0x32d   :  { %v466_v47 = vpop.xlane.xlu0 %465  ;;  %vm488_vm7 = vcmp.eq.f32.partialorder %v3962_v62, %v464_v43 }
 0x32e   :  { %v504_v48 = vsel %vm488_vm7, %v4007_v16, 128.0  ;;  %vm489_vm8 = vcmp.eq.f32.partialorder %v3965_v1, %v466_v47 }
 0x32f   :  { %527 = vmin.xlane.f32.xlu1 %v504_v48  ;;  %v505_v44 = vsel %vm489_vm8, %v4007_v16, 128.0 }
 0x330   :  { %529 = vmin.xlane.f32.xlu0 %v505_v44  ;;  %v468_v49 = vpop.xlane.xlu1 %467 }
 0x331   :  { %v470_v51 = vpop.xlane.xlu0 %469  ;;  %vm490_vm9 = vcmp.eq.f32.partialorder %v3972_v4, %v468_v49 }
 0x332   :  { %v506_v52 = vsel %vm490_vm9, %v4007_v16, 128.0  ;;  %vm491_vm10 = vcmp.eq.f32.partialorder %v3975_v6, %v470_v51 }
 0x333   :  { %531 = vmin.xlane.f32.xlu1 %v506_v52  ;;  %v507_v54 = vsel %vm491_vm10, %v4007_v16, 128.0 }
 0x334   :  { %533 = vmin.xlane.f32.xlu0 %v507_v54  ;;  %v472_v55 = vpop.xlane.xlu1 %471 }
 0x335   :  { %v474_v57 = vpop.xlane.xlu0 %473  ;;  %vm492_vm11 = vcmp.eq.f32.partialorder %v3982_v10, %v472_v55 }
 0x336   :  { %v508_v58 = vsel %vm492_vm11, %v4007_v16, 128.0  ;;  %vm493_vm12 = vcmp.eq.f32.partialorder %v3985_v8, %v474_v57 }
 0x337   :  { %535 = vmin.xlane.f32.xlu1 %v508_v58  ;;  %v509_v60 = vsel %vm493_vm12, %v4007_v16, 128.0 }
 0x338   :  { %537 = vmin.xlane.f32.xlu0 %v509_v60  ;;  %v476_v61 = vpop.xlane.xlu1 %475 }
 0x339   :  { %v478_v63 = vpop.xlane.xlu0 %477  ;;  %vm494_vm13 = vcmp.eq.f32.partialorder %v3992_v15, %v476_v61 }
 0x33a   :  { %v510_v0 = vsel %vm494_vm13, %v4007_v16, 128.0  ;;  %vm495_vm14 = vcmp.eq.f32.partialorder %v3995_v19, %v478_v63 }
 0x33b   :  { %539 = vmin.xlane.f32.xlu1 %v510_v0  ;;  %v511_v2 = vsel %vm495_vm14, %v4007_v16, 128.0 }
 0x33c   :  { %541 = vmin.xlane.f32.xlu0 %v511_v2  ;;  %v480_v3 = vpop.xlane.xlu1 %479 }
 0x33d   :  { %vm496_vm15 = vcmp.eq.f32.partialorder %v4002_v21, %v480_v3 }
 0x33e   :  { %v512_v5 = vsel %vm496_vm15, %v4007_v16, 128.0 }
 0x33f   :  { %543 = vmin.xlane.f32.xlu1 %v512_v5 }
 0x3ab   :  { %v4041_v7 = vpop.xlane.xlu0 %513 }
 0x3ac   :  { %vm545_vm0 = vcmp.eq.f32.partialorder %v4007_v16, %v4041_v7 }
 0x3ad   :  { %v4049_v9 = vsel %vm545_vm0, -inf, %v3927_v39 }
 0x3ae   :  { %593 = vmax.xlane.f32.xlu0 %v4049_v9 }
 0x3af   :  { %v4052_v11 = vpop.xlane.xlu0 %517 }
 0x3b0   :  { %v4054_v14 = vpop.xlane.xlu1 %515  ;;  %vm547_vm1 = vcmp.eq.f32.partialorder %v4007_v16, %v4052_v11 }
 0x3b1   :  { %vm546_vm2 = vcmp.eq.f32.partialorder %v4007_v16, %v4054_v14  ;;  %v4064_v20 = vsel %vm547_vm1, -inf, %v3932_v45 }
 0x3b2   :  { %v4070_v22 = vsel %vm546_vm2, -inf, %v3935_v46  ;;  %597 = vmax.xlane.f32.xlu0 %v4064_v20  ;;  %v562_v7 = vsel %vm546_vm2, %v3935_v46, 0.0 }
 0x3b3   :  { %595 = vmax.xlane.f32.xlu1 %v4070_v22 }
 0x3b4   :  { %v4074_v25 = vpop.xlane.xlu1 %519 }
 0x3b5   :  { %v4076_v26 = vpop.xlane.xlu0 %521  ;;  %vm548_vm3 = vcmp.eq.f32.partialorder %v4007_v16, %v4074_v25 }
 0x3b6   :  { %v4084_v18 = vsel %vm548_vm3, -inf, %v3942_v50  ;;  %vm549_vm4 = vcmp.eq.f32.partialorder %v4007_v16, %v4076_v26 }
 0x3b7   :  { %599 = vmax.xlane.f32.xlu1 %v4084_v18  ;;  %v4093_v27 = vsel %vm549_vm4, -inf, %v3945_v53 }
 0x3b8   :  { %601 = vmax.xlane.f32.xlu0 %v4093_v27  ;;  %v4096_v28 = vpop.xlane.xlu1 %523 }
 0x3b9   :  { %v4098_v30 = vpop.xlane.xlu0 %525  ;;  %vm550_vm5 = vcmp.eq.f32.partialorder %v4007_v16, %v4096_v28 }
 0x3ba   :  { %v4106_v31 = vsel %vm550_vm5, -inf, %v3952_v56  ;;  %vm551_vm6 = vcmp.eq.f32.partialorder %v4007_v16, %v4098_v30 }
 0x3bb   :  { %603 = vmax.xlane.f32.xlu1 %v4106_v31  ;;  %v4115_v32 = vsel %vm551_vm6, -inf, %v3955_v59 }
 0x3bc   :  { %605 = vmax.xlane.f32.xlu0 %v4115_v32  ;;  %v4118_v35 = vpop.xlane.xlu1 %527 }
 0x3bd   :  { %v4120_v36 = vpop.xlane.xlu0 %529  ;;  %vm552_vm7 = vcmp.eq.f32.partialorder %v4007_v16, %v4118_v35 }
 0x3be   :  { %vm553_vm8 = vcmp.eq.f32.partialorder %v4007_v16, %v4120_v36  ;;  %v4130_v38 = vsel %vm552_vm7, -inf, %v3962_v62  ;;  %v568_v30 = vsel %vm552_vm7, %v3962_v62, 0.0 }
 0x3bf   :  { %607 = vmax.xlane.f32.xlu1 %v4130_v38  ;;  %v4137_v40 = vsel %vm553_vm8, -inf, %v3965_v1 }
 0x3c0   :  { %609 = vmax.xlane.f32.xlu0 %v4137_v40  ;;  %v4140_v41 = vpop.xlane.xlu1 %531 }
 0x3c1   :  { %v4142_v42 = vpop.xlane.xlu0 %533  ;;  %vm554_vm9 = vcmp.eq.f32.partialorder %v4007_v16, %v4140_v41 }
 0x3c2   :  { %vm555_vm10 = vcmp.eq.f32.partialorder %v4007_v16, %v4142_v42  ;;  %v4152_v43 = vsel %vm554_vm9, -inf, %v3972_v4  ;;  %v570_v36 = vsel %vm554_vm9, %v3972_v4, 0.0 }
 0x3c3   :  { %611 = vmax.xlane.f32.xlu1 %v4152_v43  ;;  %v4159_v47 = vsel %vm555_vm10, -inf, %v3975_v6 }
 0x3c4   :  { %613 = vmax.xlane.f32.xlu0 %v4159_v47  ;;  %v4162_v48 = vpop.xlane.xlu1 %535 }
 0x3c5   :  { %v4164_v44 = vpop.xlane.xlu0 %537  ;;  %vm5108_vm11 = vcmp.eq.f32.partialorder %v4007_v16, %v4162_v48  ;;  %vm5118_vm9 = vcmp.eq.f32.partialorder %v4007_v16, %v4162_v48 }
 0x3c6   :  { %vm5104_vm12 = vcmp.eq.f32.partialorder %v4007_v16, %v4164_v44  ;;  %v4174_v49 = vsel %vm5108_vm11, -inf, %v3982_v10  ;;  %v572_v42 = vsel %vm5118_vm9, %v3982_v10, 0.0 }
 0x3c7   :  { %615 = vmax.xlane.f32.xlu1 %v4174_v49  ;;  %v4181_v51 = vsel %vm5104_vm12, -inf, %v3985_v8 }
 0x3c8   :  { %617 = vmax.xlane.f32.xlu0 %v4181_v51  ;;  %v4184_v52 = vpop.xlane.xlu1 %539 }
 0x3c9   :  { %v4186_v54 = vpop.xlane.xlu0 %541  ;;  %vm5102_vm13 = vcmp.eq.f32.partialorder %v4007_v16, %v4184_v52 }
 0x3ca   :  { %vm5103_vm14 = vcmp.eq.f32.partialorder %v4007_v16, %v4186_v54  ;;  %v4196_v55 = vsel %vm5102_vm13, -inf, %v3992_v15 }
 0x3cb   :  { %619 = vmax.xlane.f32.xlu1 %v4196_v55  ;;  %v4203_v57 = vsel %vm5103_vm14, -inf, %v3995_v19 }
 0x3cc   :  { %621 = vmax.xlane.f32.xlu0 %v4203_v57  ;;  %v4206_v58 = vpop.xlane.xlu1 %543 }
 0x3cd   :  { %5117 = vst [vmem:[#allocation19_spill] sm:$0xff] %v4206_v58  ;;  %vm5107_vm15 = vcmp.eq.f32.partialorder %v4007_v16, %v4206_v58 }
 0x3ce   :  { %v4214_v60 = vsel %vm5107_vm15, -inf, %v4002_v21 }
 0x3cf   :  { %623 = vmax.xlane.f32.xlu1 %v4214_v60 }
 0x43b   :  { %v594_v61 = vpop.xlane.xlu0 %593 }
 0x43c   :  { %vm625_vm13 = vcmp.eq.f32.partialorder %v4049_v9, %v594_v61 }
 0x43d   :  { %v641_v63 = vsel %vm625_vm13, %v4007_v16, 128.0 }
 0x43e   :  { %657 = vmin.xlane.f32.xlu0 %v641_v63 }
 0x43f   :  { %v598_v0 = vpop.xlane.xlu0 %597 }
 0x440   :  { %v596_v2 = vpop.xlane.xlu1 %595  ;;  %vm627_vm14 = vcmp.eq.f32.partialorder %v4064_v20, %v598_v0 }
 0x441   :  { %vm626_vm12 = vcmp.eq.f32.partialorder %v4070_v22, %v596_v2  ;;  %v643_v3 = vsel %vm627_vm14, %v4007_v16, 128.0 }
 0x442   :  { %v642_v5 = vsel %vm626_vm12, %v4007_v16, 128.0  ;;  %661 = vmin.xlane.f32.xlu0 %v643_v3 }
 0x443   :  { %659 = vmin.xlane.f32.xlu1 %v642_v5 }
 0x444   :  { %v600_v12 = vpop.xlane.xlu1 %599 }
 0x445   :  { %v602_v58 = vpop.xlane.xlu0 %601  ;;  %vm628_vm15 = vcmp.eq.f32.partialorder %v4084_v18, %v600_v12 }
 0x446   :  { %vm629_vm11 = vcmp.eq.f32.partialorder %v4093_v27, %v602_v58  ;;  %v644_v9 = vsel %vm628_vm15, %v4007_v16, 128.0 }
 0x447   :  { %663 = vmin.xlane.f32.xlu1 %v644_v9  ;;  %v645_v61 = vsel %vm629_vm11, %v4007_v16, 128.0 }
 0x448   :  { %665 = vmin.xlane.f32.xlu0 %v645_v61  ;;  %v604_v20 = vpop.xlane.xlu1 %603 }
 0x449   :  { %v606_v22 = vpop.xlane.xlu0 %605  ;;  %vm630_vm13 = vcmp.eq.f32.partialorder %v4106_v31, %v604_v20 }
 0x44a   :  { %vm631_vm12 = vcmp.eq.f32.partialorder %v4115_v32, %v606_v22  ;;  %v646_v63 = vsel %vm630_vm13, %v4007_v16, 128.0  ;;  %v3321_v22 = vld [vmem:[#allocation7 + $0x4] ss:$20 sps:$4 sm:$0xff]  }
 0x44b   :  { %667 = vmin.xlane.f32.xlu1 %v646_v63  ;;  %v647_v0 = vsel %vm631_vm12, %v4007_v16, 128.0  ;;  %v3323_v63 = vld [vmem:[#allocation7] ss:$20 sps:$4 sm:$0xff]   ;;  %1076 = vmatprep.subr.bf16.mxu1 %v3321_v22  ;;  %v3354_v22 = vld [vmem:[#allocation7 + $0xd0] ss:$20 sps:$4 sm:$0xff]  }
 0x44c   :  { %669 = vmin.xlane.f32.xlu0 %v647_v0  ;;  %v608_v12 = vpop.xlane.xlu1 %607  ;;  %v3324_v0 = vld [vmem:[#allocation7 + $0x8] ss:$20 sps:$4 sm:$0xff]   ;;  %1077 = vmatpush1.bf16.msra.mxu1 %v3323_v63 }
 0x44d   :  { %v610_v18 = vpop.xlane.xlu0 %609  ;;  %vm632_vm14 = vcmp.eq.f32.partialorder %v4130_v38, %v608_v12  ;;  %v3326_v12 = vld [vmem:[#allocation7 + $0xc] ss:$20 sps:$4 sm:$0xff]   ;;  %v3357_v63 = vld [vmem:[#allocation7 + $0xf4] ss:$20 sps:$4 sm:$0xff]  }
 0x44e   :  { %vm633_vm15 = vcmp.eq.f32.partialorder %v4137_v40, %v610_v18  ;;  %v648_v27 = vsel %vm632_vm14, %v4007_v16, 128.0  ;;  %v3327_v18 = vld [vmem:[#allocation7 + $0x2c] ss:$20 sps:$4 sm:$0xff]   ;;  %1189 = vmatprep.subr.bf16.mxu0 %v3326_v12  ;;  %v3359_v12 = vld [vmem:[#allocation7 + $0xf0] ss:$20 sps:$4 sm:$0xff]  }
 0x44f   :  { %671 = vmin.xlane.f32.xlu1 %v648_v27  ;;  %v649_v58 = vsel %vm633_vm15, %v4007_v16, 128.0  ;;  %1190 = vmatpush1.bf16.msra.mxu0 %v3324_v0  ;;  %v3330_v27 = vld [vmem:[#allocation7 + $0x30] ss:$20 sps:$4 sm:$0xff]  }
 0x450   :  { %673 = vmin.xlane.f32.xlu0 %v649_v58  ;;  %v612_v31 = vpop.xlane.xlu1 %611  ;;  %1078 = vmatprep.subr.bf16.mxu1 %v3327_v18  ;;  %v3333_v58 = vld [vmem:[#allocation7 + $0x54] ss:$20 sps:$4 sm:$0xff]   ;;  %v3362_v0 = vld [vmem:[#allocation7 + $0xfc] ss:$20 sps:$4 sm:$0xff]   ;;  %v3360_v18 = vld [vmem:[#allocation7 + $0xf8] ss:$20 sps:$4 sm:$0xff]  }
 0x451   :  { %v614_v32 = vpop.xlane.xlu0 %613  ;;  %vm634_vm11 = vcmp.eq.f32.partialorder %v4152_v43, %v612_v31  ;;  %v3338_v31 = vld [vmem:[#allocation7 + $0x5c] ss:$20 sps:$4 sm:$0xff]  }
 0x452   :  { %vm635_vm13 = vcmp.eq.f32.partialorder %v4159_v47, %v614_v32  ;;  %v650_v2 = vsel %vm634_vm11, %v4007_v16, 128.0  ;;  %v3336_v32 = vld [vmem:[#allocation7 + $0x58] ss:$20 sps:$4 sm:$0xff]  }
 0x453   :  { %675 = vmin.xlane.f32.xlu1 %v650_v2  ;;  %v651_v3 = vsel %vm635_vm13, %v4007_v16, 128.0  ;;  %v3339_v2 = vld [vmem:[#allocation7 + $0x7c] ss:$20 sps:$4 sm:$0xff]  }
 0x454   :  { %677 = vmin.xlane.f32.xlu0 %v651_v3  ;;  %v616_v38 = vpop.xlane.xlu1 %615  ;;  %v3344_v3 = vld [vmem:[#allocation7 + $0x84] ss:$20 sps:$4 sm:$0xff]  }
 0x455   :  { %v618_v40 = vpop.xlane.xlu0 %617  ;;  %vm636_vm12 = vcmp.eq.f32.partialorder %v4174_v49, %v616_v38  ;;  %v3341_v38 = vld [vmem:[#allocation7 + $0x78] ss:$20 sps:$4 sm:$0xff]  }
 0x456   :  { %vm637_vm14 = vcmp.eq.f32.partialorder %v4181_v51, %v618_v40  ;;  %v652_v5 = vsel %vm636_vm12, %v4007_v16, 128.0  ;;  %v5109_v40 = vmov 0  }
 0x457   :  { %679 = vmin.xlane.f32.xlu1 %v652_v5  ;;  %v653_v9 = vsel %vm637_vm14, %v4007_v16, 128.0  ;;  %1108 = vmatprep.mubr.bf16.mxu1 %v5109_v40  ;;  %v3342_v5 = vld [vmem:[#allocation7 + $0x80] ss:$20 sps:$4 sm:$0xff]  }
 0x458   :  { %681 = vmin.xlane.f32.xlu0 %v653_v9  ;;  %v620_v43 = vpop.xlane.xlu1 %619  ;;  %v3345_v9 = vld [vmem:[#allocation7 + $0xa4] ss:$20 sps:$4 sm:$0xff]   ;;  %1221 = vmatprep.mubr.bf16.mxu0 %v5109_v40 }
 0x459   :  { %v622_v47 = vpop.xlane.xlu0 %621  ;;  %vm638_vm15 = vcmp.eq.f32.partialorder %v4196_v55, %v620_v43  ;;  %v3332_v55 = vld [vmem:[#allocation7 + $0x34] ss:$20 sps:$4 sm:$0xff]   ;;  %v3350_v43 = vld [vmem:[#allocation7 + $0xac] ss:$20 sps:$4 sm:$0xff]  }
 0x45a   :  { %vm639_vm11 = vcmp.eq.f32.partialorder %v4203_v57, %v622_v47  ;;  %v654_v61 = vsel %vm638_vm15, %v4007_v16, 128.0  ;;  %v3329_v57 = vld [vmem:[#allocation7 + $0x28] ss:$20 sps:$4 sm:$0xff]   ;;  %1191 = vmatprep.subr.bf16.mxu0 %v3332_v55  ;;  %v3347_v47 = vld [vmem:[#allocation7 + $0xa0] ss:$20 sps:$4 sm:$0xff]   ;;  %vm5119_vm15 = vcmp.eq.f32.partialorder %v4007_v16, %v4164_v44 }
 0x45b   :  { %683 = vmin.xlane.f32.xlu1 %v654_v61  ;;  %v655_v20 = vsel %vm639_vm11, %v4007_v16, 128.0  ;;  %1079 = vmatpush1.bf16.msra.mxu1 %v3329_v57  ;;  %v3348_v61 = vld [vmem:[#allocation7 + $0xa8] ss:$20 sps:$4 sm:$0xff]   ;;  %v3368_v57 = vld [vmem:[#allocation7 + $0x124] ss:$20 sps:$4 sm:$0xff]  }
 0x45c   :  { %685 = vmin.xlane.f32.xlu0 %v655_v20  ;;  %v624_v49 = vpop.xlane.xlu1 %623  ;;  %1192 = vmatpush1.bf16.msra.mxu0 %v3330_v27  ;;  %v3351_v20 = vld [vmem:[#allocation7 + $0xcc] ss:$20 sps:$4 sm:$0xff]   ;;  %v3363_v55 = vld [vmem:[#allocation7 + $0x11c] ss:$20 sps:$4 sm:$0xff]  }
 0x45d   :  { %vm640_vm13 = vcmp.eq.f32.partialorder %v4214_v60, %v624_v49  ;;  %v3335_v60 = vld [vmem:[#allocation7 + $0x50] ss:$20 sps:$4 sm:$0xff]   ;;  %1080 = vmatprep.subr.bf16.mxu1 %v3333_v58  ;;  %1193 = vmatprep.subr.bf16.mxu0 %v3338_v31  ;;  %v3356_v49 = vld [vmem:[#allocation7 + $0xd4] ss:$20 sps:$4 sm:$0xff]   ;;  %v3365_v31 = vld [vmem:[#allocation7 + $0x118] ss:$20 sps:$4 sm:$0xff]  }
 0x45e   :  { %v656_v51 = vsel %vm640_vm13, %v4007_v16, 128.0  ;;  %v1935_v27 = vld [vmem:[#allocation10] sm:$0xff]  ;;  %v1936_v58 = vld [vmem:[#allocation10 + $0x8] sm:$0xff]  ;;  %vm5120_vm13 = vcmp.eq.f32.partialorder %v4007_v16, %v4184_v52 }
 0x45f   :  { %687 = vmin.xlane.f32.xlu1 %v656_v51  ;;  %1081 = vmatpush1.bf16.msra.mxu1 %v3335_v60  ;;  %v3353_v51 = vld [vmem:[#allocation7 + $0xc8] ss:$20 sps:$4 sm:$0xff]   ;;  %v3366_v60 = vld [vmem:[#allocation7 + $0x120] ss:$20 sps:$4 sm:$0xff]   ;;  %v574_v44 = vsel %vm5120_vm13, %v3992_v15, 0.0 }
 0x460   :  { %1194 = vmatpush1.bf16.msra.mxu0 %v3336_v32  ;;  %1082 = vmatprep.subr.bf16.mxu1 %v3339_v2  ;;  %v3215_v32 = vpack.c.bf16 %v1936_v58, %v1935_v27  ;;  %v1937_v2 = vld [vmem:[#allocation10 + $0x10] sm:$0xff]  ;;  %v1943_v58 = vld [vmem:[#allocation10 + $0x40] sm:$0xff] }
 0x461   :  { %1195 = vmatprep.subr.bf16.mxu0 %v3344_v3  ;;  %v1938_v3 = vld [vmem:[#allocation10 + $0x18] sm:$0xff] }
 0x463   :  { %1083 = vmatpush1.bf16.msra.mxu1 %v3341_v38  ;;  %v3219_v38 = vpack.c.bf16 %v1938_v3, %v1937_v2  ;;  %v1945_v3 = vld [vmem:[#allocation10 + $0x50] sm:$0xff] }
 0x464   :  { %1196 = vmatpush1.bf16.msra.mxu0 %v3342_v5  ;;  %1084 = vmatprep.subr.bf16.mxu1 %v3345_v9  ;;  %v1939_v5 = vld [vmem:[#allocation10 + $0x20] sm:$0xff]  ;;  %v1940_v9 = vld [vmem:[#allocation10 + $0x28] sm:$0xff] }
 0x465   :  { %1197 = vmatprep.subr.bf16.mxu0 %v3350_v43  ;;  %v3223_v43 = vpack.c.bf16 %v1940_v9, %v1939_v5 }
 0x467   :  { %1085 = vmatpush1.bf16.msra.mxu1 %v3347_v47  ;;  %v1941_v47 = vld [vmem:[#allocation10 + $0x30] sm:$0xff] }
 0x468   :  { %1198 = vmatpush1.bf16.msra.mxu0 %v3348_v61  ;;  %1086 = vmatprep.subr.bf16.mxu1 %v3351_v20  ;;  %v1942_v61 = vld [vmem:[#allocation10 + $0x38] sm:$0xff] }
 0x469   :  { %1199 = vmatprep.subr.bf16.mxu0 %v3356_v49  ;;  %v3227_v20 = vpack.c.bf16 %v1942_v61, %v1941_v47  ;;  %v1947_v47 = vld [vmem:[#allocation10 + $0x60] sm:$0xff]  ;;  %v1948_v61 = vld [vmem:[#allocation10 + $0x68] sm:$0xff] }
 0x46b   :  { %1087 = vmatpush1.bf16.msra.mxu1 %v3353_v51  ;;  %v561_v51 = vsel %vm545_vm0, %v3927_v39, 0.0 }
 0x46c   :  { %1200 = vmatpush1.bf16.msra.mxu0 %v3354_v22  ;;  %1088 = vmatprep.subr.bf16.mxu1 %v3357_v63 }
 0x46d   :  { %1201 = vmatprep.subr.bf16.mxu0 %v3362_v0  ;;  %v563_v0 = vsel %vm547_vm1, %v3932_v45, 0.0 }
 0x46f   :  { %1089 = vmatpush1.bf16.msra.mxu1 %v3359_v12 }
 0x470   :  { %1202 = vmatpush1.bf16.msra.mxu0 %v3360_v18  ;;  %1090 = vmatprep.subr.bf16.mxu1 %v3363_v55  ;;  %v564_v18 = vsel %vm548_vm3, %v3942_v50, 0.0 }
 0x471   :  { %1203 = vmatprep.subr.bf16.mxu0 %v3368_v57  ;;  %v566_v57 = vsel %vm550_vm5, %v3952_v56, 0.0 }
 0x473   :  { %1091 = vmatpush1.bf16.msra.mxu1 %v3365_v31  ;;  %v1944_v31 = vld [vmem:[#allocation10 + $0x48] sm:$0xff] }
 0x474   :  { %1204 = vmatpush1.bf16.msra.mxu0 %v3366_v60 }
 0x475   :  { %3216 = vmatprep.subr.bf16.mxu0 %v3215_v32 }
 0x476   :  { %1109 = vmatmul.mubr.bf16.vlgmr.msra.gmra.mrb[0].mxu1 %v3827_v13 }
 0x477   :  { %1222 = vmatmul.mubr.bf16.vlgmr.msra.gmra.mrb[16].mxu0 %v3827_v13  ;;  %1118 = vmatprep.mubr.bf16.mxu1 %v5109_v40 }
 0x478   :  { %1231 = vmatprep.mubr.bf16.mxu0 %v5109_v40  ;;  %3218 = vmatpush3.bf16.msra.mxu0 %v3215_v32 }
 0x479   :  { %3220 = vmatprep.subr.bf16.mxu0 %v3219_v38 }
 0x47c   :  { %3222 = vmatpush3.bf16.msra.mxu0 %v3219_v38  ;;  %v1946_v38 = vld [vmem:[#allocation10 + $0x58] sm:$0xff] }
 0x47d   :  { %3224 = vmatprep.subr.bf16.mxu0 %v3223_v43  ;;  %v3235_v5 = vpack.c.bf16 %v1946_v38, %v1945_v3  ;;  %v3383_v38 = vld [vmem:[#allocation8 + $0x50] sm:$0xff]  }
 0x47e   :  { %1119 = vmatmul.mubr.bf16.gmra.mrb[4].mxu1 %v3829_v17 }
 0x47f   :  { %1232 = vmatmul.mubr.bf16.gmra.mrb[20].mxu0 %v3829_v17  ;;  %1128 = vmatprep.mubr.bf16.mxu1 %v5109_v40 }
 0x480   :  { %1241 = vmatprep.mubr.bf16.mxu0 %v5109_v40  ;;  %3226 = vmatpush3.bf16.msra.mxu0 %v3223_v43 }
 0x481   :  { %3228 = vmatprep.subr.bf16.mxu0 %v3227_v20 }
 0x484   :  { %3230 = vmatpush3.bf16.msra.mxu0 %v3227_v20  ;;  %v3239_v20 = vpack.c.bf16 %v1948_v61, %v1947_v47 }
 0x486   :  { %1129 = vmatmul.mubr.bf16.gmra.mrb[8].mxu1 %v3831_v23 }
 0x487   :  { %1242 = vmatmul.mubr.bf16.gmra.mrb[24].mxu0 %v3831_v23  ;;  %1138 = vmatprep.mubr.bf16.mxu1 %v5109_v40 }
 0x488   :  { %1251 = vmatprep.mubr.bf16.mxu0 %v5109_v40 }
 0x48e   :  { %1139 = vmatmul.mubr.bf16.gmra.mrb[12].mxu1 %v3833_v24 }
 0x48f   :  { %1252 = vmatmul.mubr.bf16.gmra.mrb[28].mxu0 %v3833_v24  ;;  %1148 = vmatprep.mubr.bf16.mxu1 %v5109_v40 }
 0x490   :  { %1261 = vmatprep.mubr.bf16.mxu0 %v5109_v40 }
 0x496   :  { %1149 = vmatmul.mubr.bf16.gmra.mrb[16].mxu1 %v3835_v29 }
 0x497   :  { %1262 = vmatmul.mubr.bf16.gmra.mrb[32].mxu0 %v3835_v29  ;;  %1158 = vmatprep.mubr.bf16.mxu1 %v5109_v40 }
 0x498   :  { %1271 = vmatprep.mubr.bf16.mxu0 %v5109_v40 }
 0x49e   :  { %1159 = vmatmul.mubr.bf16.gmra.mrb[20].mxu1 %v3837_v33 }
 0x49f   :  { %1168 = vmatprep.mubr.bf16.mxu1 %v5109_v40  ;;  %1272 = vmatmul.mubr.bf16.gmra.mrb[36].mxu0 %v3837_v33 }
 0x4a0   :  { %1281 = vmatprep.mubr.bf16.mxu0 %v5109_v40 }
 0x4a6   :  { %1169 = vmatmul.mubr.bf16.gmra.mrb[24].mxu1 %v3839_v34 }
 0x4a7   :  { %1282 = vmatmul.mubr.bf16.gmra.mrb[40].mxu0 %v3839_v34  ;;  %1178 = vmatprep.mubr.bf16.mxu1 %v5109_v40 }
 0x4a8   :  { %1291 = vmatprep.mubr.bf16.mxu0 %v5109_v40 }
 0x4ae   :  { %1179 = vmatmul.mubr.bf16.gmra.mrb[28].mxu1 %v3841_v37 }
 0x4af   :  { %1292 = vmatmul.mubr.bf16.gmra.mrb[44].mxu0 %v3841_v37  ;;  %3079 = vmatprep.mubr.bf16.mxu1 %v3827_v13 }
 0x4cb   :  { %v658_v49 = vpop.xlane.xlu0 %657 }
 0x4cc   :  { %vm689_vm12 = vcmp.eq.f32.partialorder %v4007_v16, %v658_v49 }
 0x4cd   :  { %v4288_v22 = vsel %vm689_vm12, %v3927_v39, %v561_v51 }
 0x4ce   :  { %721 = vadd.xlane.f32.xlu0 %v4288_v22 }
 0x4cf   :  { %v662_v63 = vpop.xlane.xlu0 %661 }
 0x4d0   :  { %v660_v13 = vpop.xlane.xlu1 %659  ;;  %vm691_vm14 = vcmp.eq.f32.partialorder %v4007_v16, %v662_v63  ;;  %v1949_v63 = vld [vmem:[#allocation10 + $0x70] sm:$0xff] }
 0x4d1   :  { %vm690_vm0 = vcmp.eq.f32.partialorder %v4007_v16, %v660_v13  ;;  %v4302_v39 = vsel %vm691_vm14, %v3932_v45, %v563_v0  ;;  %v565_v45 = vsel %vm549_vm4, %v3945_v53, 0.0  ;;  %v1950_v0 = vld [vmem:[#allocation10 + $0x78] sm:$0xff]  ;;  %vm5121_vm14 = vcmp.eq.f32.partialorder %v4007_v16, %v4186_v54 }
 0x4d2   :  { %v4305_v12 = vsel %vm690_vm0, %v3935_v46, %v562_v7  ;;  %725 = vadd.xlane.f32.xlu0 %v4302_v39  ;;  %v3243_v13 = vpack.c.bf16 %v1950_v0, %v1949_v63  ;;  %v3387_v63 = vld [vmem:[#allocation8 + $0x58] sm:$0xff]  }
 0x4d3   :  { %723 = vadd.xlane.f32.xlu1 %v4305_v12 }
 0x4d4   :  { %v664_v11 = vpop.xlane.xlu1 %663 }
 0x4d5   :  { %vm692_vm1 = vcmp.eq.f32.partialorder %v4007_v16, %v664_v11  ;;  %v666_v14 = vpop.xlane.xlu0 %665 }
 0x4d6   :  { %vm693_vm2 = vcmp.eq.f32.partialorder %v4007_v16, %v666_v14  ;;  %v4320_v46 = vsel %vm692_vm1, %v3942_v50, %v564_v18  ;;  %v567_v50 = vsel %vm551_vm6, %v3955_v59, 0.0  ;;  %v5122_v18 = vld [vmem:[#allocation19_spill] sm:$0xff]  ;;  %v5113_v14 = vmov 2  }
 0x4d7   :  { %727 = vadd.xlane.f32.xlu1 %v4320_v46  ;;  %v4324_v55 = vsel %vm693_vm2, %v3945_v53, %v565_v45  ;;  %vm5123_vm1 = vcmp.eq.f32.partialorder %v4007_v16, %v5122_v18  ;;  %3267 = vset.pattern.permute.xlu0 %v5113_v14  ;;  %v3369_v45 = vld [vmem:[#allocation7 + $0x10] ss:$20 sps:$4 sm:$0xff]  }
 0x4d8   :  { %729 = vadd.xlane.f32.xlu0 %v4324_v55  ;;  %v668_v25 = vpop.xlane.xlu1 %667  ;;  %v576_v54 = vsel %vm5123_vm1, %v4002_v21, 0.0  ;;  %3063 = vmatprep.subr.bf16.mxu1 %v3369_v45 }
 0x4d9   :  { %vm694_vm3 = vcmp.eq.f32.partialorder %v4007_v16, %v668_v25  ;;  %v670_v26 = vpop.xlane.xlu0 %669  ;;  %3064 = vmatpush3.bf16.msra.mxu1 %v3369_v45  ;;  %v3370_v25 = vld [vmem:[#allocation7 + $0x38] ss:$20 sps:$4 sm:$0xff]   ;;  %v3391_v45 = vld [vmem:[#allocation8 + $0x60] sm:$0xff]  }
 0x4da   :  { %vm695_vm4 = vcmp.eq.f32.partialorder %v4007_v16, %v670_v26  ;;  %v4338_v53 = vsel %vm694_vm3, %v3952_v56, %v566_v57  ;;  %v3231_v56 = vpack.c.bf16 %v1944_v31, %v1943_v58  ;;  %3065 = vmatprep.subr.bf16.mxu1 %v3370_v25  ;;  %v3371_v57 = vld [vmem:[#allocation7 + $0x60] ss:$20 sps:$4 sm:$0xff]   ;;  %v3374_v26 = vld [vmem:[#allocation7 + $0xd8] ss:$20 sps:$4 sm:$0xff]  }
 0x4db   :  { %731 = vadd.xlane.f32.xlu1 %v4338_v53  ;;  %v4342_v27 = vsel %vm695_vm4, %v3955_v59, %v567_v50  ;;  %v569_v59 = vsel %vm553_vm8, %v3965_v1, 0.0  ;;  %v3375_v50 = vld [vmem:[#allocation7 + $0x100] ss:$20 sps:$4 sm:$0xff]  }
 0x4dc   :  { %733 = vadd.xlane.f32.xlu0 %v4342_v27  ;;  %v672_v28 = vpop.xlane.xlu1 %671  ;;  %3232 = vmatprep.subr.bf16.mxu0 %v3231_v56 }
 0x4dd   :  { %vm696_vm5 = vcmp.eq.f32.partialorder %v4007_v16, %v672_v28  ;;  %v674_v60 = vpop.xlane.xlu0 %673  ;;  %3234 = vmatpush3.bf16.msra.mxu0 %v3231_v56  ;;  %3066 = vmatpush3.bf16.msra.mxu1 %v3370_v25  ;;  %v3376_v28 = vld [vmem:[#allocation7 + $0x128] ss:$20 sps:$4 sm:$0xff]   ;;  %v3389_v25 = vld [vmem:[#allocation8 + $0xd0] sm:$0xff]  }
 0x4de   :  { %vm697_vm6 = vcmp.eq.f32.partialorder %v4007_v16, %v674_v60  ;;  %v4356_v32 = vsel %vm696_vm5, %v3962_v62, %v568_v30  ;;  %3236 = vmatprep.subr.bf16.mxu0 %v3235_v5  ;;  %3067 = vmatprep.subr.bf16.mxu1 %v3371_v57  ;;  %v3377_v60 = vld [vmem:[#allocation8 + $0x40] sm:$0xff]   ;;  %v3379_v56 = vld [vmem:[#allocation8 + $0x48] sm:$0xff]  }
 0x4df   :  { %735 = vadd.xlane.f32.xlu1 %v4356_v32  ;;  %v4360_v2 = vsel %vm697_vm6, %v3965_v1, %v569_v59  ;;  %v571_v1 = vsel %vm555_vm10, %v3975_v6, 0.0  ;;  %v3381_v59 = vld [vmem:[#allocation8 + $0xc0] sm:$0xff]  }
 0x4e0   :  { %737 = vadd.xlane.f32.xlu0 %v4360_v2  ;;  %v676_v35 = vpop.xlane.xlu1 %675 }
 0x4e1   :  { %vm698_vm7 = vcmp.eq.f32.partialorder %v4007_v16, %v676_v35  ;;  %v678_v62 = vpop.xlane.xlu0 %677  ;;  %3238 = vmatpush3.bf16.msra.mxu0 %v3235_v5  ;;  %3068 = vmatpush3.bf16.msra.mxu1 %v3371_v57  ;;  %v3384_v5 = vld [vmem:[#allocation8 + $0x10] sm:$0xff]   ;;  %v3392_v57 = vld [vmem:[#allocation8 + $0x20] sm:$0xff]  }
 0x4e2   :  { %vm699_vm8 = vcmp.eq.f32.partialorder %v4007_v16, %v678_v62  ;;  %v4374_v9 = vsel %vm698_vm7, %v3972_v4, %v570_v36  ;;  %3240 = vmatprep.subr.bf16.mxu0 %v3239_v20 }
 0x4e3   :  { %739 = vadd.xlane.f32.xlu1 %v4374_v9  ;;  %v4378_v43 = vsel %vm699_vm8, %v3975_v6, %v571_v1  ;;  %v573_v6 = vsel %vm5119_vm15, %v3985_v8, 0.0 }
 0x4e4   :  { %741 = vadd.xlane.f32.xlu0 %v4378_v43  ;;  %v680_v41 = vpop.xlane.xlu1 %679 }
 0x4e5   :  { %vm700_vm10 = vcmp.eq.f32.partialorder %v4007_v16, %v680_v41  ;;  %v682_v4 = vpop.xlane.xlu0 %681  ;;  %3242 = vmatpush3.bf16.msra.mxu0 %v3239_v20 }
 0x4e6   :  { %vm701_vm11 = vcmp.eq.f32.partialorder %v4007_v16, %v682_v4  ;;  %v4392_v49 = vsel %vm700_vm10, %v3982_v10, %v572_v42  ;;  %3244 = vmatprep.subr.bf16.mxu0 %v3243_v13 }
 0x4e7   :  { %743 = vadd.xlane.f32.xlu1 %v4392_v49  ;;  %v4396_v51 = vsel %vm701_vm11, %v3985_v8, %v573_v6  ;;  %v575_v8 = vsel %vm5121_vm14, %v3995_v19, 0.0 }
 0x4e8   :  { %745 = vadd.xlane.f32.xlu0 %v4396_v51  ;;  %v684_v48 = vpop.xlane.xlu1 %683 }
 0x4e9   :  { %vm702_vm12 = vcmp.eq.f32.partialorder %v4007_v16, %v684_v48  ;;  %v686_v10 = vpop.xlane.xlu0 %685  ;;  %3246 = vmatpush3.bf16.msra.mxu0 %v3243_v13  ;;  %v3382_v48 = vld [vmem:[#allocation8 + $0x80] sm:$0xff]  }
 0x4ea   :  { %vm703_vm0 = vcmp.eq.f32.partialorder %v4007_v16, %v686_v10  ;;  %v4410_v7 = vsel %vm702_vm12, %v3992_v15, %v574_v44  ;;  %2927 = vmatprep.subr.bf16.mxu0 %v3381_v59  ;;  %v3385_v44 = vld [vmem:[#allocation8 + $0xc8] sm:$0xff]   ;;  %v3388_v10 = vld [vmem:[#allocation8 + $0x18] sm:$0xff]  }
 0x4eb   :  { %747 = vadd.xlane.f32.xlu1 %v4410_v7  ;;  %v4414_v11 = vsel %vm703_vm0, %v3995_v19, %v575_v8  ;;  %v5115_v19 = vmov 1  }
 0x4ec   :  { %749 = vadd.xlane.f32.xlu0 %v4414_v11  ;;  %v688_v52 = vpop.xlane.xlu1 %687  ;;  %3264 = vset.pattern.permute.xlu1 %v5115_v19 }
 0x4ed   :  { %vm704_vm2 = vcmp.eq.f32.partialorder %v4007_v16, %v688_v52  ;;  %v3372_v16 = vld [vmem:[#allocation7 + $0x88] ss:$20 sps:$4 sm:$0xff]  }
 0x4ee   :  { %v4423_v15 = vsel %vm704_vm2, %v4002_v21, %v576_v54  ;;  %3069 = vmatprep.subr.bf16.mxu1 %v3372_v16  ;;  %v3373_v21 = vld [vmem:[#allocation7 + $0xb0] ss:$20 sps:$4 sm:$0xff]   ;;  %v3386_v54 = vld [vmem:[#allocation8 + $0x88] sm:$0xff]  }
 0x4ef   :  { %751 = vadd.xlane.f32.xlu1 %v4423_v15  ;;  %3070 = vmatpush3.bf16.msra.mxu1 %v3372_v16 }
 0x4f0   :  { %3071 = vmatprep.subr.bf16.mxu1 %v3373_v21 }
 0x4f3   :  { %3072 = vmatpush3.bf16.msra.mxu1 %v3373_v21 }
 0x4f4   :  { %3073 = vmatprep.subr.bf16.mxu1 %v3374_v26 }
 0x4f7   :  { %3074 = vmatpush3.bf16.msra.mxu1 %v3374_v26 }
 0x4f8   :  { %3075 = vmatprep.subr.bf16.mxu1 %v3375_v50 }
 0x4fb   :  { %3076 = vmatpush3.bf16.msra.mxu1 %v3375_v50 }
 0x4fc   :  { %3077 = vmatprep.subr.bf16.mxu1 %v3376_v28 }
 0x4ff   :  { %3078 = vmatpush3.bf16.msra.mxu1 %v3376_v28 }
 0x500   :  { %2863 = vmatprep.subr.bf16.mxu1 %v3377_v60 }
 0x502   :  { %3080 = vmatmul.mubr.bf16.vlgmr.msra.gmra.mrb[32].mxu1 %v3829_v17  ;;  %v3378_v17 = vld [vmem:[#allocation8] sm:$0xff]  }
 0x503   :  { %3083 = vmatprep.mubr.bf16.mxu1 %v3831_v23  ;;  %2864 = vmatpush3.bf16.msra.mxu1 %v3378_v17  ;;  %v3393_v17 = vld [vmem:[#allocation8 + $0xd8] sm:$0xff]  }
 0x504   :  { %2865 = vmatprep.subr.bf16.mxu1 %v3379_v56 }
 0x50a   :  { %3084 = vmatmul.mubr.bf16.gmra.mrb[36].mxu1 %v3833_v24 }
 0x50b   :  { %3087 = vmatprep.mubr.bf16.mxu1 %v3835_v29 }
 0x512   :  { %3088 = vmatmul.mubr.bf16.gmra.mrb[40].mxu1 %v3837_v33 }
 0x513   :  { %3091 = vmatprep.mubr.bf16.mxu1 %v3839_v34  ;;  %v3380_v34 = vld [vmem:[#allocation8 + $0x8] sm:$0xff]  }
 0x514   :  { %2866 = vmatpush3.bf16.msra.mxu1 %v3380_v34 }
 0x515   :  { %2867 = vmatprep.subr.bf16.mxu1 %v3383_v38  ;;  %v3396_v38 = vld [vmem:[#allocation8 + $0x28] sm:$0xff]  }
 0x518   :  { %2868 = vmatpush3.bf16.msra.mxu1 %v3384_v5 }
 0x519   :  { %2869 = vmatprep.subr.bf16.mxu1 %v3387_v63 }
 0x51a   :  { %3092 = vmatmul.mubr.bf16.gmra.mrb[44].mxu1 %v3841_v37 }
 0x51c   :  { %2870 = vmatpush3.bf16.msra.mxu1 %v3388_v10 }
 0x51d   :  { %2871 = vmatprep.subr.bf16.mxu1 %v3391_v45  ;;  %v3398_v45 = vld [vmem:[#allocation8 + $0xa0] sm:$0xff]  }
 0x520   :  { %2872 = vmatpush3.bf16.msra.mxu1 %v3392_v57  ;;  %v3401_v57 = vld [vmem:[#allocation8 + $0xe8] sm:$0xff]  }
 0x549   :  { %v4435_v33 = vpop.f32.mrb[0].mxu1 }
 0x54a   :  { %v4440_v37 = vpop.f32.mrb[1].mxu1  ;;  %v4442_v3 = vpop.f32.mrb[16].mxu0 }
 0x54b   :  { %v4444_v62 = vpop.f32.mrb[2].mxu1  ;;  %v4447_v41 = vpop.f32.mrb[17].mxu0 }
 0x54c   :  { %v4449_v47 = vpop.f32.mrb[3].mxu1  ;;  %v4451_v61 = vpop.f32.mrb[18].mxu0 }
 0x54d   :  { %v4481_v28 = vpop.f32.mrb[19].mxu0 }
 0x55b   :  { %v722_v58 = vpop.xlane.xlu0 %721 }
 0x55c   :  { %3481 = vrcp.f32 %v722_v58  ;;  %v3390_v58 = vld [vmem:[#allocation8 + $0x90] sm:$0xff]  }
 0x55f   :  { %v726_v31 = vpop.xlane.xlu0 %725 }
 0x560   :  { %v724_v30 = vpop.xlane.xlu1 %723  ;;  %3483 = vrcp.f32 %v726_v31  ;;  %v4485_v31 = vpop.f32.mrb[4].mxu1 }
 0x561   :  { %3485 = vrcp.f32 %v724_v30  ;;  %v3395_v30 = vld [vmem:[#allocation8 + $0x68] sm:$0xff]  }
 0x562   :  { %2873 = vmatprep.subr.bf16.mxu1 %v3395_v30 }
 0x563   :  { %2874 = vmatpush3.bf16.msra.mxu1 %v3396_v38  ;;  %v3406_v38 = vld [vmem:[#allocation8 + $0xb0] sm:$0xff]  }
 0x564   :  { %v728_v23 = vpop.xlane.xlu1 %727 }
 0x565   :  { %3487 = vrcp.f32 %v728_v23  ;;  %v730_v24 = vpop.xlane.xlu0 %729  ;;  %v4491_v23 = vpop.f32.mrb[5].mxu1 }
 0x566   :  { %v3482_v29 = vpop.eup %3481  ;;  %3489 = vrcp.f32 %v730_v24 }
 0x567   :  { %v4438_v35 = vmul.f32 %v3482_v29, %v4288_v22 }
 0x568   :  { %v732_v36 = vpop.xlane.xlu1 %731 }
 0x569   :  { %3491 = vrcp.f32 %v732_v36  ;;  %v734_v1 = vpop.xlane.xlu0 %733  ;;  %3127 = vmatprep.mubr.f32.mxu0 %v4438_v35 }
 0x56a   :  { %v3484_v22 = vpop.eup %3483  ;;  %3493 = vrcp.f32 %v734_v1  ;;  %v4505_v1 = vpop.f32.mrb[6].mxu1 }
 0x56b   :  { %v3486_v42 = vpop.eup %3485  ;;  %v4454_v4 = vmul.f32 %v3484_v22, %v4302_v39 }
 0x56c   :  { %v736_v20 = vpop.xlane.xlu1 %735  ;;  %v4457_v6 = vmul.f32 %v3486_v42, %v4305_v12  ;;  %v4509_v42 = vpop.f32.mrb[7].mxu1 }
 0x56d   :  { %3495 = vrcp.f32 %v736_v20  ;;  %v738_v0 = vpop.xlane.xlu0 %737 }
 0x56e   :  { %3497 = vrcp.f32 %v738_v0  ;;  %1580 = vperm.xlu1 %3264, %v4457_v6   ;;  %1660 = vperm.xlu0 %3267, %v4457_v6  }
 0x56f   :  { %v3488_v13 = vpop.eup %3487  ;;  %3128 = vmatmul.mubr.f32.vlgmr.msra.gmra.mrb[48].mxu0 %v4457_v6 }
 0x570   :  { %v3490_v39 = vpop.eup %3489  ;;  %3130 = vmatprep.mubr.f32.mxu0 %v4454_v4  ;;  %v740_v12 = vpop.xlane.xlu1 %739  ;;  %v4464_v8 = vmul.f32 %v3488_v13, %v4320_v46  ;;  %2928 = vmatpush3.bf16.msra.mxu0 %v3382_v48 }
 0x571   :  { %v4467_v52 = vmul.f32 %v3490_v39, %v4324_v55  ;;  %3499 = vrcp.f32 %v740_v12  ;;  %v742_v18 = vpop.xlane.xlu0 %741  ;;  %2929 = vmatprep.subr.bf16.mxu0 %v3385_v44  ;;  %v3399_v44 = vld [vmem:[#allocation8 + $0x70] sm:$0xff]  }
 0x572   :  { %3501 = vrcp.f32 %v742_v18  ;;  %3265 = vset.pattern.permute.xlu1 %v5109_v40  ;;  %3268 = vset.pattern.permute.xlu0 %v5115_v19  ;;  %v3400_v39 = vld [vmem:[#allocation8 + $0x30] sm:$0xff]  }
 0x573   :  { %v3492_v16 = vpop.eup %3491  ;;  %3131 = vmatmul.mubr.f32.gmra.mrb[50].mxu0 %v4464_v8  ;;  %1486 = vperm.xlu1 %3265, %v4457_v6  }
 0x574   :  { %v3494_v46 = vpop.eup %3493  ;;  %v4474_v55 = vmul.f32 %v3492_v16, %v4338_v53  ;;  %1576 = vperm.xlu0 %3268, %v4438_v35   ;;  %3133 = vmatprep.mubr.f32.mxu0 %v4467_v52  ;;  %v744_v21 = vpop.xlane.xlu1 %743  ;;  %v3403_v16 = vld [vmem:[#allocation8 + $0x78] sm:$0xff]  }
 0x575   :  { %v4479_v26 = vmul.f32 %v3494_v46, %v4342_v27  ;;  %3503 = vrcp.f32 %v744_v21  ;;  %v746_v50 = vpop.xlane.xlu0 %745  ;;  %2930 = vmatpush3.bf16.msra.mxu0 %v3386_v54  ;;  %v4483_v53 = vpop.f32.mrb[20].mxu0  ;;  %v5111_v27 = vmov 3   ;;  %2875 = vmatprep.subr.bf16.mxu1 %v3399_v44  ;;  %v3404_v46 = vld [vmem:[#allocation8 + $0x38] sm:$0xff]  }
 0x576   :  { %3505 = vrcp.f32 %v746_v50  ;;  %2931 = vmatprep.subr.bf16.mxu0 %v3389_v25  ;;  %v4489_v56 = vpop.f32.mrb[21].mxu0  ;;  %2876 = vmatpush3.bf16.msra.mxu1 %v3400_v39 }
 0x577   :  { %v3496_v60 = vpop.eup %3495  ;;  %3134 = vmatmul.mubr.f32.gmra.mrb[52].mxu0 %v4474_v55  ;;  %3266 = vset.pattern.permute.xlu1 %v5111_v27  ;;  %v4498_v59 = vpop.f32.mrb[22].mxu0 }
 0x578   :  { %v3498_v24 = vpop.eup %3497  ;;  %v4494_v29 = vmul.f32 %v3496_v60, %v4356_v32  ;;  %3270 = vset.pattern.permute.xlu0 %v5111_v27  ;;  %3136 = vmatprep.mubr.f32.mxu0 %v4479_v26  ;;  %v748_v34 = vpop.xlane.xlu1 %747  ;;  %v3394_v32 = vld [vmem:[#allocation8 + $0x98] sm:$0xff]  }
 0x579   :  { %v4501_v36 = vmul.f32 %v3498_v24, %v4360_v2  ;;  %1740 = vperm.xlu1 %3266, %v4457_v6   ;;  %3507 = vrcp.f32 %v748_v34  ;;  %1736 = vperm.xlu0 %3270, %v4438_v35   ;;  %v750_v5 = vpop.xlane.xlu0 %749  ;;  %v4507_v22 = vpop.f32.mrb[23].mxu0  ;;  %v3397_v2 = vld [vmem:[#allocation8 + $0xe0] sm:$0xff]  }
 0x57a   :  { %3509 = vrcp.f32 %v750_v5  ;;  %2932 = vmatpush3.bf16.msra.mxu0 %v3390_v58  ;;  %v4512_v6 = vpop.f32.mrb[8].mxu1  ;;  %v3402_v58 = vld [vmem:[#allocation8 + $0xa8] sm:$0xff]   ;;  %2877 = vmatprep.subr.bf16.mxu1 %v3403_v16  ;;  %v4550_v30 = vpop.f32.mrb[24].mxu0 }
 0x57b   :  { %v3500_v20 = vpop.eup %3499  ;;  %3137 = vmatmul.mubr.f32.gmra.mrb[54].mxu0 %v4494_v29  ;;  %2933 = vmatprep.subr.bf16.mxu0 %v3393_v17  ;;  %v4518_v10 = vpop.f32.mrb[9].mxu1 }
 0x57c   :  { %v3502_v48 = vpop.eup %3501  ;;  %v4515_v63 = vmul.f32 %v3500_v20, %v4374_v9  ;;  %3139 = vmatprep.mubr.f32.mxu0 %v4501_v36  ;;  %v752_v0 = vpop.xlane.xlu1 %751  ;;  %2878 = vmatpush3.bf16.msra.mxu1 %v3404_v46  ;;  %v3408_v20 = vld [vmem:[#allocation8 + $0xb8] sm:$0xff]  }
 0x57d   :  { %v4521_v13 = vmul.f32 %v3502_v48, %v4378_v43  ;;  %3269 = vset.pattern.permute.xlu1 %v5109_v40  ;;  %3511 = vrcp.f32 %v752_v0  ;;  %1748 = vperm.xlu0 %3270, %v4464_v8   ;;  %v4525_v12 = vpop.f32.mrb[10].mxu1  ;;  %v4553_v60 = vpop.f32.mrb[25].mxu0 }
 0x57e   :  { %1481 = vperm.xlu1 %3269, %v4438_v35   ;;  %2934 = vmatpush3.bf16.msra.mxu0 %v3394_v32  ;;  %v4528_v9 = vpop.f32.mrb[11].mxu1  ;;  %v3407_v32 = vld [vmem:[#allocation8 + $0xf8] sm:$0xff]  }
 0x57f   :  { %v3504_v18 = vpop.eup %3503  ;;  %3140 = vmatmul.mubr.f32.gmra.mrb[56].mxu0 %v4515_v63  ;;  %2935 = vmatprep.subr.bf16.mxu0 %v3397_v2  ;;  %v4580_v2 = vpop.f32.mrb[12].mxu1 }
 0x580   :  { %v3506_v54 = vpop.eup %3505  ;;  %v4532_v43 = vmul.f32 %v3504_v18, %v4392_v49  ;;  %3142 = vmatprep.mubr.f32.mxu0 %v4521_v13  ;;  %v4595_v18 = vpop.f32.mrb[13].mxu1 }
 0x581   :  { %v4536_v25 = vmul.f32 %v3506_v54, %v4396_v51  ;;  %3279 = vset.pattern.permute.xlu0 %v5115_v19  ;;  %v4602_v54 = vpop.f32.mrb[14].mxu1 }
 0x582   :  { %3271 = vset.pattern.permute.xlu1 %v5113_v14  ;;  %1596 = vperm.xlu0 %3279, %v4474_v55  }
 0x583   :  { %v3508_v21 = vpop.eup %3507  ;;  %1656 = vperm.xlu1 %3271, %v4438_v35   ;;  %3143 = vmatmul.mubr.f32.gmra.mrb[58].mxu0 %v4532_v43  ;;  %v3405_v35 = vld [vmem:[#allocation8 + $0xf0] sm:$0xff]  }
 0x584   :  { %v3510_v49 = vpop.eup %3509  ;;  %v4544_v50 = vmul.f32 %v3508_v21, %v4410_v7  ;;  %3145 = vmatprep.mubr.f32.mxu0 %v4536_v25  ;;  %2936 = vmatpush3.bf16.msra.mxu0 %v3398_v45  ;;  %v4557_v7 = vpop.f32.mrb[26].mxu0 }
 0x585   :  { %v4548_v51 = vmul.f32 %v3510_v49, %v4414_v11  ;;  %2937 = vmatprep.subr.bf16.mxu0 %v3401_v57  ;;  %v4564_v24 = vpop.f32.mrb[27].mxu0  ;;  %v4605_v45 = vpop.f32.mrb[15].mxu1 }
 0x586   :  { %3280 = vset.pattern.permute.xlu0 %v5109_v40  ;;  %v4567_v34 = vpop.f32.mrb[28].mxu0  ;;  %v4607_v57 = vpop.f32.mrb[16].mxu1 }
 0x587   :  { %v3512_v17 = vpop.eup %3511  ;;  %3272 = vset.pattern.permute.xlu1 %v5115_v19  ;;  %1506 = vperm.xlu0 %3280, %v4474_v55   ;;  %v4569_v5 = vpop.f32.mrb[29].mxu0 }
 0x588   :  { %v4560_v11 = vmul.f32 %v3512_v17, %v4423_v15  ;;  %3146 = vmatmul.mubr.f32.gmra.mrb[60].mxu0 %v4544_v50  ;;  %1588 = vperm.xlu1 %3272, %v4464_v8   ;;  %v4572_v15 = vpop.f32.mrb[30].mxu0  ;;  %v4609_v16 = vpop.f32.mrb[17].mxu1 }
 0x589   :  { %3148 = vmatprep.mubr.f32.mxu0 %v4548_v51  ;;  %2938 = vmatpush3.bf16.msra.mxu0 %v3402_v58  ;;  %v4586_v48 = vpop.f32.mrb[31].mxu0  ;;  %5128 = vst [vmem:[#allocation23_spill] sm:$0xff] %v4609_v16  ;;  %v4612_v46 = vpop.f32.mrb[18].mxu1 }
 0x58a   :  { %2939 = vmatprep.subr.bf16.mxu0 %v3405_v35  ;;  %v4589_v0 = vpop.f32.mrb[32].mxu0  ;;  %5129 = vst [vmem:[#allocation24_spill] sm:$0xff] %v4612_v46  ;;  %v4615_v21 = vpop.f32.mrb[19].mxu1 }
 0x58b   :  { %3286 = vset.pattern.permute.xlu0 %v5113_v14  ;;  %5124 = vst [vmem:[#allocation19_spill] sm:$0xff] %v4589_v0  ;;  %v4591_v44 = vpop.f32.mrb[33].mxu0  ;;  %5130 = vst [vmem:[#allocation25_spill] sm:$0xff] %v4615_v21  ;;  %v4618_v49 = vpop.f32.mrb[20].mxu1 }
 0x58c   :  { %3149 = vmatmul.mubr.f32.gmra.mrb[62].mxu0 %v4560_v11  ;;  %3273 = vset.pattern.permute.xlu1 %v5109_v40  ;;  %5125 = vst [vmem:[#allocation20_spill] sm:$0xff] %v4591_v44  ;;  %v4593_v39 = vpop.f32.mrb[34].mxu0  ;;  %5131 = vst [vmem:[#allocation26_spill] sm:$0xff] %v4618_v49  ;;  %v4620_v58 = vpop.f32.mrb[21].mxu1 }
 0x58d   :  { %1672 = vperm.xlu0 %3286, %v4467_v52   ;;  %1496 = vperm.xlu1 %3273, %v4464_v8   ;;  %5126 = vst [vmem:[#allocation21_spill] sm:$0xff] %v4593_v39  ;;  %5132 = vst [vmem:[#allocation27_spill] sm:$0xff] %v4620_v58  ;;  %v4623_v35 = vpop.f32.mrb[22].mxu1  ;;  %v5141_v39 = vmov 3  }
 0x58e   :  { %2940 = vmatpush3.bf16.msra.mxu0 %v3406_v38  ;;  %5133 = vst [vmem:[#allocation28_spill] sm:$0xff] %v4623_v35  ;;  %v4629_v17 = vpop.f32.mrb[23].mxu1  ;;  %v3409_v35 = vld [vmem:[#allocation8 + $0x100] sm:$0xff]  }
 0x58f   :  { %2941 = vmatprep.subr.bf16.mxu0 %v3407_v32  ;;  %5134 = vst [vmem:[#allocation29_spill] sm:$0xff] %v4629_v17  ;;  %v4631_v38 = vpop.f32.mrb[24].mxu1  ;;  %3151 = vmatprep.subr.bf16.mxu1 %v3409_v35 }
 0x590   :  { %5135 = vst [vmem:[#allocation30_spill] sm:$0xff] %v4631_v38  ;;  %v4634_v32 = vpop.f32.mrb[25].mxu1 }
 0x591   :  { %1684 = vperm.xlu0 %3286, %v4494_v29   ;;  %3274 = vset.pattern.permute.xlu1 %v5113_v14  ;;  %5136 = vst [vmem:[#allocation31_spill] sm:$0xff] %v4634_v32 }
 0x592   :  { %1668 = vperm.xlu1 %3274, %v4464_v8   ;;  %2942 = vmatpush3.bf16.msra.mxu0 %v3408_v20  ;;  %v4598_v8 = vpop.f32.mrb[35].mxu0  ;;  %v4637_v20 = vpop.f32.mrb[26].mxu1 }
 0x593   :  { %5127 = vst [vmem:[#allocation22_spill] sm:$0xff] %v4598_v8  ;;  %5137 = vst [vmem:[#allocation32_spill] sm:$0xff] %v4637_v20 }
 0x595   :  { %3291 = vset.pattern.permute.xlu0 %v5109_v40 }
 0x596   :  { %1511 = vperm.xlu0 %3291, %v4479_v26   ;;  %3275 = vset.pattern.permute.xlu1 %v5115_v19 }
 0x597   :  { %1584 = vperm.xlu1 %3275, %v4454_v4  }
 0x59a   :  { %3292 = vset.pattern.permute.xlu0 %v5111_v27 }
 0x59b   :  { %1760 = vperm.xlu0 %3292, %v4479_v26   ;;  %3276 = vset.pattern.permute.xlu1 %v5109_v40 }
 0x59c   :  { %1491 = vperm.xlu1 %3276, %v4454_v4  }
 0x59f   :  { %1772 = vperm.xlu0 %3292, %v4515_v63  }
 0x5a0   :  { %3277 = vset.pattern.permute.xlu1 %v5111_v27 }
 0x5a1   :  { %1744 = vperm.xlu1 %3277, %v4454_v4  }
 0x5a3   :  { %3297 = vset.pattern.permute.xlu0 %v5109_v40  ;;  %v4640_v40 = vpop.f32.mrb[27].mxu1 }
 0x5a4   :  { %1521 = vperm.xlu0 %3297, %v4501_v36   ;;  %5138 = vst [vmem:[#allocation33_spill] sm:$0xff] %v4640_v40  ;;  %v4654_v0 = vpop.f32.mrb[28].mxu1 }
 0x5a5   :  { %3278 = vset.pattern.permute.xlu1 %v5113_v14  ;;  %5142 = vst [vmem:[#allocation36_spill] sm:$0xff] %v4654_v0 }
 0x5a6   :  { %1664 = vperm.xlu1 %3278, %v4454_v4   ;;  %v4643_v4 = vpop.f32.mrb[36].mxu0 }
 0x5a7   :  { %5139 = vst [vmem:[#allocation34_spill] sm:$0xff] %v4643_v4 }
 0x5a8   :  { %1536 = vperm.xlu0 %3297, %v4532_v43  }
 0x5aa   :  { %3281 = vset.pattern.permute.xlu1 %v5111_v27  ;;  %v4648_v27 = vpop.f32.mrb[37].mxu0 }
 0x5ab   :  { %1756 = vperm.xlu1 %3281, %v4474_v55   ;;  %5140 = vst [vmem:[#allocation35_spill] sm:$0xff] %v4648_v27  ;;  %v4656_v20 = vpop.f32.mrb[38].mxu0 }
 0x5ac   :  { %3301 = vset.pattern.permute.xlu0 %v5115_v19  ;;  %5143 = vst [vmem:[#allocation37_spill] sm:$0xff] %v4656_v20  ;;  %v4658_v4 = vpop.f32.mrb[39].mxu0  ;;  %v5150_v20 = vmov 2  }
 0x5ad   :  { %1616 = vperm.xlu0 %3301, %v4521_v13   ;;  %5144 = vst [vmem:[#allocation38_spill] sm:$0xff] %v4658_v4 }
 0x5af   :  { %3282 = vset.pattern.permute.xlu1 %v5113_v14  ;;  %v5145_v14 = vmov 0  }
 0x5b0   :  { %1676 = vperm.xlu1 %3282, %v4474_v55   ;;  %v4664_v55 = vpop.f32.mrb[40].mxu0 }
 0x5b1   :  { %1628 = vperm.xlu0 %3301, %v4544_v50   ;;  %5146 = vst [vmem:[#allocation39_spill] sm:$0xff] %v4664_v55 }
 0x5b4   :  { %3283 = vset.pattern.permute.xlu1 %v5115_v19  ;;  %v4666_v19 = vpop.f32.mrb[41].mxu0 }
 0x5b5   :  { %3309 = vset.pattern.permute.xlu0 %v5141_v39  ;;  %1592 = vperm.xlu1 %3283, %v4467_v52   ;;  %5147 = vst [vmem:[#allocation40_spill] sm:$0xff] %v4666_v19  ;;  %v4668_v27 = vpop.f32.mrb[42].mxu0  ;;  %v5155_v19 = vmov 1  }
 0x5b6   :  { %1776 = vperm.xlu0 %3309, %v4521_v13   ;;  %5148 = vst [vmem:[#allocation41_spill] sm:$0xff] %v4668_v27  ;;  %v4671_v0 = vpop.f32.mrb[43].mxu0 }
 0x5b7   :  { %5149 = vst [vmem:[#allocation42_spill] sm:$0xff] %v4671_v0  ;;  %v4675_v4 = vpop.f32.mrb[44].mxu0 }
 0x5b8   :  { %5151 = vst [vmem:[#allocation43_spill] sm:$0xff] %v4675_v4  ;;  %v4678_v38 = vpop.f32.mrb[45].mxu0  ;;  %v4711_v4 = vld [vmem:[%s5096_s4] sm:$0x1f]  ;;  %s3692_s4 = smov [#allocation12]  }
 0x5b9   :  { %3284 = vset.pattern.permute.xlu1 %v5145_v14  ;;  %5152 = vst [vmem:[#allocation44_spill] sm:$0xff] %v4678_v38  ;;  %v4680_v40 = vpop.f32.mrb[46].mxu0  ;;  %s2683_s1 = sshll.u32 %s3692_s4, 4  ;;  %s2684_s1 = int_to_ptr.vmem [resolvable:$true] %s2683_s1 }
 0x5ba   :  { %3311 = vset.pattern.permute.xlu0 %v5145_v14  ;;  %1501 = vperm.xlu1 %3284, %v4467_v52   ;;  %5153 = vst [vmem:[#allocation45_spill] sm:$0xff] %v4680_v40  ;;  %v4682_v55 = vpop.f32.mrb[47].mxu0  ;;  %s3623_s10 = scalar_lea.vmem %s2684_s1, 2048  ;;  %p3628_p13 = scmp.lt.s32.totalorder %s2684_s1, %s2684_s1 }
 0x5bb   :  { %1551 = vperm.xlu0 %3311, %v4548_v51   ;;  %5154 = vst [vmem:[#allocation46_spill] sm:$0xff] %v4682_v55  ;;  %p3624_p12 = scmp.ne.s32.totalorder %s2684_s1, %s3623_s10  ;;  %p3629_p0 = scmp.lt.s32.totalorder %s3623_s10, %s3623_s10 }
 0x5bd   :  { %p3630_p1 = por %p3629_p0, %p3628_p13 }
 0x5be   :  { %3285 = vset.pattern.permute.xlu1 %v5141_v39 }
 0x5bf   :  { %3312 = vset.pattern.permute.xlu0 %v5150_v20  ;;  %1752 = vperm.xlu1 %3285, %v4467_v52   ;;  %v5156_v52 = vlaneseq  ;;  %p3631_p2 = pnand %p3630_p1, %p3624_p12 }
 0x5c0   :  { %1696 = vperm.xlu0 %3312, %v4521_v13  }
 0x5c1   :  { %v4703_v40 = vshrl.u32 %v5156_v52, 7 }
 0x5c3   :  { %3287 = vset.pattern.permute.xlu1 %v5155_v19  ;;  %v857_v52 = vsub.s32 3, %v4703_v40  ;;  %v853_v8 = vsub.s32 2, %v4703_v40 }
 0x5c4   :  { %3315 = vset.pattern.permute.xlu0 %v5141_v39  ;;  %1604 = vperm.xlu1 %3287, %v4494_v29  }
 0x5c5   :  { %1788 = vperm.xlu0 %3315, %v4544_v50   ;;  %v4726_v27 = vrot.slane %v4711_v4, %v857_v52 }
 0x5c8   :  { %3288 = vset.pattern.permute.xlu1 %v5145_v14 }
 0x5c9   :  { %1792 = vperm.xlu0 %3315, %v4548_v51   ;;  %1516 = vperm.xlu1 %3288, %v4494_v29  }
 0x5cd   :  { %3318 = vset.pattern.permute.xlu0 %v5150_v20  ;;  %3289 = vset.pattern.permute.xlu1 %v5141_v39 }
 0x5ce   :  { %1712 = vperm.xlu0 %3318, %v4548_v51   ;;  %1764 = vperm.xlu1 %3289, %v4494_v29   ;;  %v849_v29 = vsub.s32 1, %v4703_v40 }
 0x5d2   :  { %3290 = vset.pattern.permute.xlu1 %v5155_v19  ;;  %3320 = vset.pattern.permute.xlu0 %v5141_v39 }
 0x5d3   :  { %1600 = vperm.xlu1 %3290, %v4479_v26  }
 0x5d7   :  { %3293 = vset.pattern.permute.xlu1 %v5150_v20 }
 0x5d8   :  { %1680 = vperm.xlu1 %3293, %v4479_v26   ;;  %v4716_v26 = vrot.slane %v4711_v4, %v849_v29  ;;  %v845_v29 = vsub.s32 0, %v4703_v40 }
 0x5da   :  { %v1113_v55 = vadd.f32 %v4440_v37, %v4716_v26  ;;  %v1117_v38 = vadd.f32 %v4449_v47, %v4716_v26  ;;  %v1226_v37 = vadd.f32 %v4447_v41, %v4726_v27  ;;  %v1230_v47 = vadd.f32 %v4481_v28, %v4726_v27 }
 0x5db   :  { %v4736_v52 = vrot.slane %v4711_v4, %v845_v29  ;;  %v4746_v29 = vrot.slane %v4711_v4, %v853_v8 }
 0x5dc   :  { %3294 = vset.pattern.permute.xlu1 %v5155_v19  ;;  %v1400_v49 = vmax.f32 %v1113_v55, 0.0  ;;  %v1405_v17 = vmax.f32 %v1117_v38, 0.0  ;;  %v1402_v21 = vmax.f32 %v1226_v37, 0.0  ;;  %v1407_v16 = vmax.f32 %v1230_v47, 0.0 }
 0x5dd   :  { %1612 = vperm.xlu1 %3294, %v4515_v63   ;;  %v1111_v41 = vadd.f32 %v4435_v33, %v4736_v52  ;;  %v1224_v33 = vadd.f32 %v4442_v3, %v4746_v29 }
 0x5e1   :  { %3295 = vset.pattern.permute.xlu1 %v5145_v14 }
 0x5e2   :  { %1526 = vperm.xlu1 %3295, %v4515_v63  }
 0x5e6   :  { %3296 = vset.pattern.permute.xlu1 %v5155_v19 }
 0x5e7   :  { %1608 = vperm.xlu1 %3296, %v4501_v36  }
 0x5eb   :  { %3298 = vset.pattern.permute.xlu1 %v5141_v39 }
 0x5ec   :  { %1768 = vperm.xlu1 %3298, %v4501_v36  }
 0x5ed   :  { %v1581_v0 = vpop.permute.xlu1 %1580  ;;  %v1661_v32 = vpop.permute.xlu0 %1660 }
 0x5ee   :  { %v1640_v55 = vmul.f32 %v1581_v0, %v1405_v17  ;;  %v1399_v17 = vmax.f32 %v1111_v41, 0.0 }
 0x5f0   :  { %3299 = vset.pattern.permute.xlu1 %v5150_v20 }
 0x5f1   :  { %1688 = vperm.xlu1 %3299, %v4501_v36   ;;  %v1115_v36 = vadd.f32 %v4444_v62, %v4736_v52  ;;  %v1228_v62 = vadd.f32 %v4451_v61, %v4746_v29  ;;  %v3411_v61 = vld [vmem:[#allocation8 + $0x110] sm:$0xff]  }
 0x5f2   :  { %v1487_v58 = vpop.permute.xlu1 %1486 }
 0x5f3   :  { %v1577_v44 = vpop.permute.xlu0 %1576  ;;  %v1404_v37 = vmax.f32 %v1115_v36, 0.0 }
 0x5f4   :  { %v1639_v38 = vmul.f32 %v1577_v44, %v1400_v49 }
 0x5f5   :  { %3300 = vset.pattern.permute.xlu1 %v5155_v19 }
 0x5f6   :  { %v1816_v28 = vpack.c.bf16 %v1640_v55, %v1639_v38  ;;  %1620 = vperm.xlu1 %3300, %v4532_v43   ;;  %v1560_v55 = vmul.f32 %v1487_v58, %v1404_v37  ;;  %v4757_v58 = vpop.f32.mrb[29].mxu1  ;;  %v1123_v37 = vadd.f32 %v4491_v23, %v4716_v26  ;;  %v1125_v23 = vadd.f32 %v4505_v1, %v4736_v52 }
 0x5f8   :  { %v1741_v46 = vpop.permute.xlu1 %1740  ;;  %2368 = vmatprep.mubr.bf16.mxu1 %v1816_v28  ;;  %v1737_v0 = vpop.permute.xlu0 %1736  ;;  %v1401_v28 = vmax.f32 %v1224_v33, 0.0  ;;  %v1127_v33 = vadd.f32 %v4509_v42, %v4716_v26 }
 0x5f9   :  { %v1800_v44 = vmul.f32 %v1741_v46, %v1407_v16  ;;  %v1799_v49 = vmul.f32 %v1737_v0, %v1402_v21  ;;  %v1406_v16 = vmax.f32 %v1228_v62, 0.0  ;;  %v3410_v21 = vld [vmem:[#allocation8 + $0x108] sm:$0xff]  }
 0x5fa   :  { %3302 = vset.pattern.permute.xlu1 %v5145_v14 }
 0x5fb   :  { %v1818_v47 = vpack.c.bf16 %v1800_v44, %v1799_v49  ;;  %1531 = vperm.xlu1 %3302, %v4521_v13   ;;  %v1720_v36 = vmul.f32 %v1661_v32, %v1406_v16  ;;  %v4759_v44 = vpop.f32.mrb[30].mxu1  ;;  %v3412_v32 = vld [vmem:[#allocation8 + $0x118] sm:$0xff]  }
 0x5fc   :  { %v4763_v49 = vpop.f32.mrb[31].mxu1  ;;  %v1749_v1 = vpop.permute.xlu0 %1748 }
 0x5fd   :  { %v1482_v8 = vpop.permute.xlu1 %1481  ;;  %2465 = vmatprep.mubr.bf16.mxu0 %v1818_v47  ;;  %v1410_v47 = vmax.f32 %v1123_v37, 0.0 }
 0x5fe   :  { %v1559_v38 = vmul.f32 %v1482_v8, %v1399_v17  ;;  %v3413_v17 = vld [vmem:[#allocation8 + $0x120] sm:$0xff]   ;;  %v1415_v8 = vmax.f32 %v1127_v33, 0.0 }
 0x5ff   :  { %1546 = vperm.xlu1 %3302, %v4544_v50  }
 0x600   :  { %v1815_v46 = vpack.c.bf16 %v1560_v55, %v1559_v38  ;;  %v1121_v55 = vadd.f32 %v4485_v31, %v4736_v52  ;;  %v3414_v38 = vld [vmem:[#allocation8 + $0x128] sm:$0xff]   ;;  %v1240_v31 = vadd.f32 %v4507_v22, %v4726_v27 }
 0x602   :  { %v1657_v41 = vpop.permute.xlu1 %1656  ;;  %2369 = vmatmul.mubr.bf16.vlgmr.msra.gmra.mrb[48].mxu1 %v1815_v46  ;;  %v1409_v46 = vmax.f32 %v1121_v55, 0.0 }
 0x603   :  { %v1719_v3 = vmul.f32 %v1657_v41, %v1401_v28  ;;  %3303 = vset.pattern.permute.xlu1 %v5155_v19  ;;  %3152 = vmatpush3.bf16.msra.mxu1 %v3409_v35 }
 0x604   :  { %1624 = vperm.xlu1 %3303, %v4536_v25   ;;  %3153 = vmatprep.subr.bf16.mxu1 %v3410_v21 }
 0x605   :  { %v1817_v13 = vpack.c.bf16 %v1720_v36, %v1719_v3  ;;  %v861_v36 = vsub.s32 4, %v4703_v40  ;;  %v1417_v40 = vmax.f32 %v1240_v31, 0.0 }
 0x607   :  { %v1589_v0 = vpop.permute.xlu1 %1588  ;;  %2466 = vmatmul.mubr.bf16.vlgmr.msra.gmra.mrb[64].mxu0 %v1817_v13  ;;  %3154 = vmatpush3.bf16.msra.mxu1 %v3410_v21  ;;  %v1236_v21 = vadd.f32 %v4489_v56, %v4726_v27  ;;  %v1234_v56 = vadd.f32 %v4483_v53, %v4746_v29 }
 0x608   :  { %3304 = vset.pattern.permute.xlu1 %v5145_v14  ;;  %3155 = vmatprep.subr.bf16.mxu1 %v3411_v61  ;;  %v1642_v42 = vmul.f32 %v1589_v0, %v1415_v8 }
 0x609   :  { %1541 = vperm.xlu1 %3304, %v4536_v25   ;;  %v1412_v22 = vmax.f32 %v1236_v21, 0.0 }
 0x60b   :  { %3156 = vmatpush3.bf16.msra.mxu1 %v3411_v61  ;;  %v3081_v61 = vpop.f32.mrb[32].mxu1 }
 0x60c   :  { %v1497_v35 = vpop.permute.xlu1 %1496  ;;  %3157 = vmatprep.subr.bf16.mxu1 %v3412_v32  ;;  %v1336_v0 = vpop.f32.mrb[33].mxu1 }
 0x60d   :  { %3305 = vset.pattern.permute.xlu1 %v5155_v19  ;;  %v3082_v37 = vpop.f32.mrb[34].mxu1 }
 0x60e   :  { %1636 = vperm.xlu1 %3305, %v4560_v11   ;;  %v1339_v8 = vpop.f32.mrb[35].mxu1 }
 0x60f   :  { %3158 = vmatpush3.bf16.msra.mxu1 %v3412_v32  ;;  %v3415_v32 = vld [vmem:[#allocation8 + $0x130] sm:$0xff]  }
 0x610   :  { %3159 = vmatprep.subr.bf16.mxu1 %v3413_v17 }
 0x611   :  { %v4771_v62 = vpop.permute.xlu1 %1668 }
 0x612   :  { %3306 = vset.pattern.permute.xlu1 %v5145_v14  ;;  %v1414_v14 = vmax.f32 %v1125_v23, 0.0 }
 0x613   :  { %1556 = vperm.xlu1 %3306, %v4560_v11   ;;  %3160 = vmatpush3.bf16.msra.mxu1 %v3413_v17  ;;  %v1238_v17 = vadd.f32 %v4498_v59, %v4746_v29 }
 0x614   :  { %3161 = vmatprep.subr.bf16.mxu1 %v3414_v38 }
 0x615   :  { %v1416_v21 = vmax.f32 %v1238_v17, 0.0 }
 0x616   :  { %v1585_v28 = vpop.permute.xlu1 %1584 }
 0x617   :  { %v1641_v16 = vmul.f32 %v1585_v28, %v1410_v47  ;;  %3307 = vset.pattern.permute.xlu1 %v5155_v19  ;;  %3162 = vmatpush3.bf16.msra.mxu1 %v3414_v38  ;;  %v1562_v19 = vmul.f32 %v1497_v35, %v1414_v14  ;;  %v3416_v28 = vld [vmem:[#allocation8 + $0x138] sm:$0xff]   ;;  %v1411_v14 = vmax.f32 %v1234_v56, 0.0 }
 0x618   :  { %1632 = vperm.xlu1 %3307, %v4548_v51   ;;  %v4788_v51 = vrot.slane %v4711_v4, %v861_v36  ;;  %3163 = vmatprep.subr.bf16.mxu1 %v3415_v32 }
 0x619   :  { %v1821_v41 = vpack.c.bf16 %v1642_v42, %v1641_v16  ;;  %v4799_v42 = vpop.permute.xlu0 %1596 }
 0x61a   :  { %v1345_v33 = vadd.f32 %v3081_v61, %v4788_v51  ;;  %v1337_v47 = vadd.f32 %v1336_v0, %v4788_v51  ;;  %v1348_v4 = vadd.f32 %v3082_v37, %v4788_v51  ;;  %v1340_v55 = vadd.f32 %v1339_v8, %v4788_v51 }
 0x61b   :  { %v1492_v3 = vpop.permute.xlu1 %1491  ;;  %2376 = vmatprep.mubr.bf16.mxu1 %v1821_v41  ;;  %3164 = vmatpush3.bf16.msra.mxu1 %v3415_v32  ;;  %v1722_v32 = vmul.f32 %v4771_v62, %v1416_v21  ;;  %v1248_v62 = vadd.f32 %v4557_v7, %v4746_v29 }
 0x61c   :  { %v1561_v13 = vmul.f32 %v1492_v3, %v1409_v46  ;;  %3308 = vset.pattern.permute.xlu1 %v5150_v20  ;;  %v1413_v23 = vmax.f32 %v1345_v33, 0.0  ;;  %v1403_v59 = vmax.f32 %v1337_v47, 0.0  ;;  %v1418_v38 = vmax.f32 %v1348_v4, 0.0  ;;  %3165 = vmatprep.subr.bf16.mxu1 %v3416_v28  ;;  %v3085_v3 = vpop.f32.mrb[36].mxu1 }
 0x61d   :  { %1692 = vperm.xlu1 %3308, %v4515_v63   ;;  %v1802_v63 = vmul.f32 %v1749_v1, %v1417_v40  ;;  %v1408_v46 = vmax.f32 %v1340_v55, 0.0  ;;  %v1361_v1 = vadd.f32 %v3085_v3, %v4788_v51  ;;  %v1352_v61 = vpop.f32.mrb[37].mxu1  ;;  %v4812_v37 = vpop.permute.xlu0 %1506  ;;  %v1244_v47 = vadd.f32 %v4550_v30, %v4746_v29 }
 0x61e   :  { %v1820_v35 = vpack.c.bf16 %v1562_v19, %v1561_v13  ;;  %v4803_v31 = vpack.c.bf16 %v1418_v38, %v1413_v23  ;;  %v1353_v13 = vadd.f32 %v1352_v61, %v4788_v51  ;;  %v3086_v0 = vpop.f32.mrb[38].mxu1 }
 0x61f   :  { %v4805_v36 = vpack.c.bf16 %v1408_v46, %v1403_v59  ;;  %3166 = vmatpush3.bf16.msra.mxu1 %v3416_v28  ;;  %v1364_v17 = vadd.f32 %v3086_v0, %v4788_v51  ;;  %v1355_v40 = vpop.f32.mrb[39].mxu1  ;;  %v1421_v38 = vmax.f32 %v1244_v47, 0.0  ;;  %v1426_v28 = vmax.f32 %v1248_v62, 0.0 }
 0x620   :  { %v1745_v53 = vpop.permute.xlu1 %1744  ;;  %2377 = vmatmul.mubr.bf16.gmra.mrb[52].mxu1 %v1820_v35  ;;  %v1423_v35 = vmax.f32 %v1353_v13, 0.0  ;;  %v1356_v33 = vadd.f32 %v1355_v40, %v4788_v51  ;;  %v3089_v59 = vpop.f32.mrb[40].mxu1  ;;  %v1135_v40 = vadd.f32 %v4525_v12, %v4736_v52 }
 0x621   :  { %v1801_v16 = vmul.f32 %v1745_v53, %v1412_v22  ;;  %3310 = vset.pattern.permute.xlu1 %v5141_v39  ;;  %v1433_v22 = vmax.f32 %v1361_v1, 0.0  ;;  %v1438_v8 = vmax.f32 %v1364_v17, 0.0  ;;  %v1377_v30 = vadd.f32 %v3089_v59, %v4788_v51  ;;  %v1368_v7 = vpop.f32.mrb[41].mxu1  ;;  %v1673_v46 = vpop.permute.xlu0 %1672 }
 0x622   :  { %1780 = vperm.xlu1 %3310, %v4532_v43   ;;  %v1428_v55 = vmax.f32 %v1356_v33, 0.0  ;;  %v3090_v21 = vpop.f32.mrb[42].mxu1  ;;  %v1723_v0 = vmul.f32 %v1673_v46, %v1421_v38  ;;  %v1424_v12 = vmax.f32 %v1135_v40, 0.0  ;;  %v1250_v46 = vadd.f32 %v4564_v24, %v4726_v27 }
 0x623   :  { %v1823_v41 = vpack.c.bf16 %v1802_v63, %v1801_v16  ;;  %v4822_v23 = vpack.c.bf16 %v1438_v8, %v1433_v22  ;;  %v1133_v63 = vadd.f32 %v4518_v10, %v4716_v26  ;;  %v1137_v16 = vadd.f32 %v4528_v9, %v4716_v26  ;;  %v1371_v1 = vpop.f32.mrb[43].mxu1 }
 0x624   :  { %v1380_v3 = vadd.f32 %v3090_v21, %v4788_v51  ;;  %v1372_v13 = vadd.f32 %v1371_v1, %v4788_v51  ;;  %v1131_v9 = vadd.f32 %v4512_v6, %v4736_v52  ;;  %v3093_v62 = vpop.f32.mrb[44].mxu1  ;;  %v1564_v1 = vmul.f32 %v4812_v37, %v1424_v12 }
 0x625   :  { %v1665_v19 = vpop.permute.xlu1 %1664  ;;  %2473 = vmatprep.mubr.bf16.mxu0 %v1823_v41  ;;  %v1453_v41 = vmax.f32 %v1377_v30, 0.0  ;;  %v1425_v22 = vmax.f32 %v1137_v16, 0.0  ;;  %v1393_v8 = vadd.f32 %v3093_v62, %v4788_v51  ;;  %v1246_v30 = vadd.f32 %v4553_v60, %v4726_v27 }
 0x626   :  { %v1721_v56 = vmul.f32 %v1665_v19, %v1411_v14  ;;  %3313 = vset.pattern.permute.xlu1 %v5150_v20  ;;  %v1369_v14 = vadd.f32 %v1368_v7, %v4788_v51  ;;  %v1458_v10 = vmax.f32 %v1380_v3, 0.0  ;;  %v1448_v17 = vmax.f32 %v1372_v13, 0.0 }
 0x627   :  { %1700 = vperm.xlu1 %3313, %v4532_v43   ;;  %v4825_v43 = vpack.c.bf16 %v1428_v55, %v1423_v35  ;;  %v1384_v55 = vpop.f32.mrb[45].mxu1  ;;  %v1419_v59 = vmax.f32 %v1131_v9, 0.0  ;;  %v1644_v6 = vmul.f32 %v4799_v42, %v1425_v22  ;;  %v1473_v7 = vmax.f32 %v1393_v8, 0.0 }
 0x628   :  { %v1822_v4 = vpack.c.bf16 %v1722_v32, %v1721_v56  ;;  %v1443_v19 = vmax.f32 %v1369_v14, 0.0  ;;  %v1420_v56 = vmax.f32 %v1133_v63, 0.0  ;;  %v4842_v33 = vpack.c.bf16 %v1458_v10, %v1453_v41 }
 0x629   :  { %v1427_v13 = vmax.f32 %v1250_v46, 0.0  ;;  %v1141_v37 = vadd.f32 %v4580_v2, %v4736_v52  ;;  %v1145_v9 = vadd.f32 %v4602_v54, %v4736_v52  ;;  %v1260_v2 = vadd.f32 %v4586_v48, %v4726_v27 }
 0x62a   :  { %v4820_v53 = vpop.permute.xlu1 %1756  ;;  %2474 = vmatmul.mubr.bf16.gmra.mrb[68].mxu0 %v1822_v4  ;;  %v4844_v47 = vpack.c.bf16 %v1448_v17, %v1443_v19  ;;  %v1422_v19 = vmax.f32 %v1246_v30, 0.0 }
 0x62b   :  { %3314 = vset.pattern.permute.xlu1 %v5141_v39 }
 0x62c   :  { %1784 = vperm.xlu1 %3314, %v4536_v25  }
 0x62f   :  { %v1677_v61 = vpop.permute.xlu1 %1676 }
 0x630   :  { %v1724_v32 = vmul.f32 %v1677_v61, %v1426_v28  ;;  %3316 = vset.pattern.permute.xlu1 %v5150_v20  ;;  %v3094_v28 = vpop.f32.mrb[46].mxu1 }
 0x631   :  { %1704 = vperm.xlu1 %3316, %v4536_v25   ;;  %v1385_v25 = vadd.f32 %v1384_v55, %v4788_v51  ;;  %v1396_v63 = vadd.f32 %v3094_v28, %v4788_v51  ;;  %v1387_v16 = vpop.f32.mrb[47].mxu1 }
 0x632   :  { %v1827_v35 = vpack.c.bf16 %v1724_v32, %v1723_v0  ;;  %v1388_v42 = vadd.f32 %v1387_v16, %v4788_v51  ;;  %v1685_v51 = vpop.permute.xlu0 %1684 }
 0x633   :  { %v1463_v21 = vmax.f32 %v1385_v25, 0.0  ;;  %v1478_v41 = vmax.f32 %v1396_v63, 0.0 }
 0x634   :  { %v1593_v4 = vpop.permute.xlu1 %1592  ;;  %v1468_v3 = vmax.f32 %v1388_v42, 0.0  ;;  %v1254_v42 = vadd.f32 %v4567_v34, %v4746_v29 }
 0x635   :  { %v1643_v38 = vmul.f32 %v1593_v4, %v1420_v56  ;;  %1708 = vperm.xlu1 %3316, %v4544_v50   ;;  %v4859_v61 = vpack.c.bf16 %v1478_v41, %v1473_v7 }
 0x636   :  { %v4861_v24 = vpack.c.bf16 %v1468_v3, %v1463_v21  ;;  %v1512_v62 = vpop.permute.xlu0 %1511 }
 0x637   :  { %v1826_v14 = vpack.c.bf16 %v1644_v6, %v1643_v38  ;;  %v1437_v38 = vmax.f32 %v1260_v2, 0.0 }
 0x639   :  { %v1502_v50 = vpop.permute.xlu1 %1501  ;;  %3317 = vset.pattern.permute.xlu1 %v5141_v39  ;;  %2384 = vmatprep.mubr.bf16.mxu1 %v1826_v14  ;;  %v1804_v39 = vmul.f32 %v4820_v53, %v1427_v13  ;;  %v1434_v53 = vmax.f32 %v1145_v9, 0.0  ;;  %v1151_v9 = vadd.f32 %v4607_v57, %v4736_v52 }
 0x63a   :  { %v1563_v60 = vmul.f32 %v1502_v50, %v1419_v59  ;;  %1796 = vperm.xlu1 %3317, %v4560_v11   ;;  %v1761_v28 = vpop.permute.xlu0 %1760 }
 0x63b   :  { %v1439_v2 = vmax.f32 %v1151_v9, 0.0  ;;  %v5162_v9 = vld [vmem:[#allocation27_spill] sm:$0xff] }
 0x63c   :  { %v1825_v0 = vpack.c.bf16 %v1564_v1, %v1563_v60 }
 0x63e   :  { %v1753_v32 = vpop.permute.xlu1 %1752  ;;  %3319 = vset.pattern.permute.xlu1 %v5150_v20  ;;  %2385 = vmatmul.mubr.bf16.gmra.mrb[56].mxu1 %v1825_v0  ;;  %v1429_v20 = vmax.f32 %v1141_v37, 0.0  ;;  %v1773_v37 = vpop.permute.xlu0 %1772 }
 0x63f   :  { %v1803_v10 = vmul.f32 %v1753_v32, %v1422_v19  ;;  %1716 = vperm.xlu1 %3319, %v4560_v11   ;;  %v1256_v11 = vadd.f32 %v4569_v5, %v4726_v27  ;;  %v1147_v5 = vadd.f32 %v4605_v45, %v4716_v26  ;;  %v1431_v19 = vmax.f32 %v1254_v42, 0.0 }
 0x640   :  { %v1565_v55 = vmul.f32 %v1512_v62, %v1429_v20 }
 0x641   :  { %v1828_v56 = vpack.c.bf16 %v1804_v39, %v1803_v10  ;;  %v1432_v6 = vmax.f32 %v1256_v11, 0.0  ;;  %v1435_v14 = vmax.f32 %v1147_v5, 0.0 }
 0x642   :  { %v4870_v22 = vpop.f32.mrb[48].mxu0 }
 0x643   :  { %v4872_v17 = vpop.f32.mrb[49].mxu0  ;;  %v1605_v40 = vpop.permute.xlu1 %1604  ;;  %2481 = vmatprep.mubr.bf16.mxu0 %v1828_v56  ;;  %v1805_v7 = vmul.f32 %v1761_v28, %v1432_v6  ;;  %v5157_v56 = vld [vmem:[#allocation24_spill] sm:$0xff] }
 0x644   :  { %2482 = vmatmul.mubr.bf16.gmra.mrb[72].mxu0 %v1827_v35  ;;  %v1143_v35 = vadd.f32 %v4595_v18, %v4716_v26  ;;  %v1258_v18 = vadd.f32 %v4572_v15, %v4746_v29  ;;  %v1646_v3 = vmul.f32 %v1605_v40, %v1435_v14  ;;  %v1155_v40 = vadd.f32 %v5157_v56, %v4736_v52  ;;  %v5161_v14 = vld [vmem:[#allocation22_spill] sm:$0xff] }
 0x645   :  { %v1270_v42 = vadd.f32 %v5161_v14, %v4726_v27  ;;  %v1163_v56 = vadd.f32 %v5162_v9, %v4716_v26  ;;  %v5169_v9 = vld [vmem:[#allocation32_spill] sm:$0xff] }
 0x646   :  { %v4878_v4 = vpop.f32.mrb[50].mxu0  ;;  %v1430_v46 = vmax.f32 %v1143_v35, 0.0  ;;  %v1436_v13 = vmax.f32 %v1258_v18, 0.0 }
 0x647   :  { %v4880_v54 = vpop.f32.mrb[51].mxu0 }
 0x648   :  { %v1517_v8 = vpop.permute.xlu1 %1516  ;;  %v1726_v34 = vmul.f32 %v1685_v51, %v1436_v13  ;;  %v5158_v51 = vld [vmem:[#allocation23_spill] sm:$0xff] }
 0x649   :  { %v1566_v59 = vmul.f32 %v1517_v8, %v1434_v53  ;;  %v1444_v8 = vmax.f32 %v1155_v40, 0.0  ;;  %v5163_v40 = vld [vmem:[#allocation29_spill] sm:$0xff] }
 0x64a   :  { %v4882_v25 = vpop.f32.mrb[52].mxu0 }
 0x64b   :  { %v1830_v12 = vpack.c.bf16 %v1566_v59, %v1565_v55  ;;  %v4888_v48 = vpop.f32.mrb[53].mxu0  ;;  %v1153_v55 = vadd.f32 %v5158_v51, %v4716_v26  ;;  %v5159_v59 = vld [vmem:[#allocation25_spill] sm:$0xff] }
 0x64c   :  { %v1157_v6 = vadd.f32 %v5159_v59, %v4716_v26 }
 0x64d   :  { %v1765_v30 = vpop.permute.xlu1 %1764 }
 0x64e   :  { %v1806_v63 = vmul.f32 %v1765_v30, %v1437_v38  ;;  %v4890_v16 = vpop.f32.mrb[54].mxu0  ;;  %v1522_v38 = vpop.permute.xlu0 %1521  ;;  %v1440_v30 = vmax.f32 %v1153_v55, 0.0  ;;  %v5164_v55 = vld [vmem:[#allocation26_spill] sm:$0xff] }
 0x64f   :  { %v4892_v21 = vpop.f32.mrb[55].mxu0  ;;  %v1567_v5 = vmul.f32 %v1522_v38, %v1439_v2  ;;  %v1161_v59 = vadd.f32 %v5164_v55, %v4736_v52 }
 0x650   :  { %v1833_v41 = vpack.c.bf16 %v1806_v63, %v1805_v7  ;;  %v1445_v7 = vmax.f32 %v1157_v6, 0.0  ;;  %v5160_v63 = vld [vmem:[#allocation20_spill] sm:$0xff] }
 0x652   :  { %v1601_v45 = vpop.permute.xlu1 %1600  ;;  %v4898_v50 = vpop.f32.mrb[56].mxu0  ;;  %2489 = vmatprep.mubr.bf16.mxu0 %v1833_v41 }
 0x653   :  { %v1645_v1 = vmul.f32 %v1601_v45, %v1430_v46  ;;  %v4900_v60 = vpop.f32.mrb[57].mxu0  ;;  %v1266_v46 = vadd.f32 %v5160_v63, %v4726_v27 }
 0x655   :  { %v1831_v0 = vpack.c.bf16 %v1646_v3, %v1645_v1  ;;  %v1442_v1 = vmax.f32 %v1266_v46, 0.0 }
 0x656   :  { %v4902_v32 = vpop.f32.mrb[58].mxu0 }
 0x657   :  { %v1681_v39 = vpop.permute.xlu1 %1680  ;;  %v4904_v10 = vpop.f32.mrb[59].mxu0  ;;  %2392 = vmatprep.mubr.bf16.mxu1 %v1831_v0 }
 0x658   :  { %v1725_v15 = vmul.f32 %v1681_v39, %v1431_v19  ;;  %2393 = vmatmul.mubr.bf16.gmra.mrb[60].mxu1 %v1830_v12  ;;  %v1447_v19 = vmax.f32 %v1270_v42, 0.0 }
 0x65a   :  { %v1832_v20 = vpack.c.bf16 %v1726_v34, %v1725_v15  ;;  %v1808_v39 = vmul.f32 %v1773_v37, %v1447_v19  ;;  %v1537_v15 = vpop.permute.xlu0 %1536  ;;  %v5165_v37 = vld [vmem:[#allocation28_spill] sm:$0xff] }
 0x65b   :  { %v4910_v62 = vpop.f32.mrb[60].mxu0  ;;  %v1165_v6 = vadd.f32 %v5165_v37, %v4736_v52 }
 0x65c   :  { %v4912_v53 = vpop.f32.mrb[61].mxu0  ;;  %v1613_v11 = vpop.permute.xlu1 %1612  ;;  %2490 = vmatmul.mubr.bf16.gmra.mrb[76].mxu0 %v1832_v20  ;;  %v1167_v20 = vadd.f32 %v5163_v40, %v4716_v26 }
 0x65d   :  { %v1648_v45 = vmul.f32 %v1613_v11, %v1445_v7  ;;  %v1450_v11 = vmax.f32 %v1163_v56, 0.0  ;;  %v1454_v7 = vmax.f32 %v1165_v6, 0.0  ;;  %v1175_v56 = vadd.f32 %v5169_v9, %v4736_v52 }
 0x65e   :  { %v1455_v51 = vmax.f32 %v1167_v20, 0.0  ;;  %v1617_v38 = vpop.permute.xlu0 %1616 }
 0x65f   :  { %v4918_v57 = vpop.f32.mrb[62].mxu0  ;;  %v1570_v14 = vmul.f32 %v1537_v15, %v1454_v7 }
 0x660   :  { %v4920_v35 = vpop.f32.mrb[63].mxu0 }
 0x661   :  { %v1527_v28 = vpop.permute.xlu1 %1526 }
 0x662   :  { %v1568_v12 = vmul.f32 %v1527_v28, %v1444_v8  ;;  %v1629_v40 = vpop.permute.xlu0 %1628 }
 0x664   :  { %v1835_v18 = vpack.c.bf16 %v1568_v12, %v1567_v5  ;;  %v1649_v5 = vmul.f32 %v1617_v38, %v1450_v11 }
 0x666   :  { %v1609_v41 = vpop.permute.xlu1 %1608  ;;  %v1777_v38 = vpop.permute.xlu0 %1776 }
 0x667   :  { %v1647_v3 = vmul.f32 %v1609_v41, %v1440_v30  ;;  %v1449_v30 = vmax.f32 %v1161_v59, 0.0 }
 0x669   :  { %v1836_v13 = vpack.c.bf16 %v1648_v45, %v1647_v3  ;;  %v5167_v45 = vld [vmem:[#allocation33_spill] sm:$0xff] }
 0x66a   :  { %v1177_v3 = vadd.f32 %v5167_v45, %v4716_v26 }
 0x66b   :  { %v1769_v0 = vpop.permute.xlu1 %1768  ;;  %2400 = vmatprep.mubr.bf16.mxu1 %v1836_v13 }
 0x66c   :  { %v1807_v34 = vmul.f32 %v1769_v0, %v1442_v1  ;;  %2401 = vmatmul.mubr.bf16.gmra.mrb[64].mxu1 %v1835_v18  ;;  %v5166_v18 = vld [vmem:[#allocation31_spill] sm:$0xff]  ;;  %v1465_v0 = vmax.f32 %v1177_v3, 0.0 }
 0x66d   :  { %v1173_v41 = vadd.f32 %v5166_v18, %v4716_v26  ;;  %v1187_v18 = vadd.f32 %v4763_v49, %v4716_v26  ;;  %v5174_v49 = vld [vmem:[#allocation38_spill] sm:$0xff] }
 0x66e   :  { %v1838_v2 = vpack.c.bf16 %v1808_v39, %v1807_v34  ;;  %v5168_v39 = vld [vmem:[#allocation30_spill] sm:$0xff]  ;;  %v1652_v20 = vmul.f32 %v1629_v40, %v1465_v0 }
 0x66f   :  { %v1460_v13 = vmax.f32 %v1173_v41, 0.0  ;;  %v1171_v34 = vadd.f32 %v5168_v39, %v4736_v52 }
 0x670   :  { %v4930_v8 = vpop.permute.xlu1 %1688  ;;  %2497 = vmatprep.mubr.bf16.mxu0 %v1838_v2 }
 0x671   :  { %v1459_v11 = vmax.f32 %v1171_v34, 0.0 }
 0x675   :  { %v1621_v28 = vpop.permute.xlu1 %1620 }
 0x676   :  { %v1650_v12 = vmul.f32 %v1621_v28, %v1455_v51  ;;  %v1464_v51 = vmax.f32 %v1175_v56, 0.0  ;;  %v5170_v28 = vld [vmem:[#allocation36_spill] sm:$0xff] }
 0x678   :  { %v1841_v63 = vpack.c.bf16 %v1650_v12, %v1649_v5  ;;  %v1181_v5 = vadd.f32 %v5170_v28, %v4736_v52  ;;  %v1185_v12 = vadd.f32 %v4759_v44, %v4736_v52  ;;  %v5172_v44 = vld [vmem:[#allocation21_spill] sm:$0xff] }
 0x679   :  { %v1268_v0 = vadd.f32 %v5172_v44, %v4746_v29 }
 0x67a   :  { %v1532_v46 = vpop.permute.xlu1 %1531  ;;  %2408 = vmatprep.mubr.bf16.mxu1 %v1841_v63  ;;  %v1469_v63 = vmax.f32 %v1181_v5, 0.0  ;;  %v5176_v5 = vld [vmem:[#allocation37_spill] sm:$0xff] }
 0x67b   :  { %v1569_v42 = vmul.f32 %v1532_v46, %v1449_v30  ;;  %v1474_v46 = vmax.f32 %v1185_v12, 0.0  ;;  %v1278_v12 = vadd.f32 %v5176_v5, %v4746_v29 }
 0x67d   :  { %v1840_v1 = vpack.c.bf16 %v1570_v14, %v1569_v42  ;;  %v1552_v14 = vpop.permute.xlu0 %1551  ;;  %v1183_v42 = vadd.f32 %v4757_v58, %v4716_v26  ;;  %v1446_v58 = vmax.f32 %v1268_v0, 0.0 }
 0x67e   :  { %v1547_v19 = vpop.permute.xlu1 %1546  ;;  %v1573_v45 = vmul.f32 %v1552_v14, %v1469_v63 }
 0x67f   :  { %2409 = vmatmul.mubr.bf16.gmra.mrb[68].mxu1 %v1840_v1  ;;  %v1572_v37 = vmul.f32 %v1547_v19, %v1464_v51  ;;  %v1470_v1 = vmax.f32 %v1183_v42, 0.0  ;;  %v1475_v19 = vmax.f32 %v1187_v18, 0.0  ;;  %v1456_v42 = vmax.f32 %v1278_v12, 0.0  ;;  %v5177_v18 = vld [vmem:[#allocation40_spill] sm:$0xff] }
 0x683   :  { %v1625_v15 = vpop.permute.xlu1 %1624 }
 0x684   :  { %v1651_v2 = vmul.f32 %v1625_v15, %v1460_v13  ;;  %v5171_v13 = vld [vmem:[#allocation19_spill] sm:$0xff] }
 0x685   :  { %v1264_v52 = vadd.f32 %v5171_v13, %v4746_v29  ;;  %v5173_v15 = vld [vmem:[#allocation35_spill] sm:$0xff] }
 0x686   :  { %v1846_v55 = vpack.c.bf16 %v1652_v20, %v1651_v2  ;;  %v1276_v26 = vadd.f32 %v5173_v15, %v4726_v27  ;;  %v1280_v20 = vadd.f32 %v5174_v49, %v4726_v27  ;;  %v5181_v49 = vld [vmem:[#allocation44_spill] sm:$0xff] }
 0x687   :  { %v1441_v40 = vmax.f32 %v1264_v52, 0.0 }
 0x688   :  { %v1542_v59 = vpop.permute.xlu1 %1541  ;;  %2416 = vmatprep.mubr.bf16.mxu1 %v1846_v55 }
 0x689   :  { %v1571_v6 = vmul.f32 %v1542_v59, %v1459_v11  ;;  %v1727_v51 = vmul.f32 %v4930_v8, %v1441_v40  ;;  %v1452_v59 = vmax.f32 %v1276_v26, 0.0  ;;  %v1697_v8 = vpop.permute.xlu0 %1696 }
 0x68b   :  { %v1845_v30 = vpack.c.bf16 %v1572_v37, %v1571_v6  ;;  %v1457_v37 = vmax.f32 %v1280_v20, 0.0  ;;  %v5175_v6 = vld [vmem:[#allocation34_spill] sm:$0xff]  ;;  %v1809_v63 = vmul.f32 %v1777_v38, %v1452_v59  ;;  %v1296_v20 = vadd.f32 %v5181_v49, %v4726_v27 }
 0x68c   :  { %v1274_v28 = vadd.f32 %v5175_v6, %v4746_v29 }
 0x68d   :  { %v1637_v7 = vpop.permute.xlu1 %1636  ;;  %2417 = vmatmul.mubr.bf16.gmra.mrb[72].mxu1 %v1845_v30  ;;  %v1789_v44 = vpop.permute.xlu0 %1788 }
 0x68e   :  { %v1654_v9 = vmul.f32 %v1637_v7, %v1475_v19  ;;  %v1451_v14 = vmax.f32 %v1274_v28, 0.0  ;;  %v5183_v28 = vld [vmem:[#allocation43_spill] sm:$0xff] }
 0x68f   :  { %v1294_v5 = vadd.f32 %v5183_v28, %v4746_v29 }
 0x690   :  { %v1729_v19 = vmul.f32 %v1697_v8, %v1451_v14 }
 0x691   :  { %v1793_v6 = vpop.permute.xlu0 %1792  ;;  %v1471_v14 = vmax.f32 %v1294_v5, 0.0 }
 0x692   :  { %v1557_v41 = vpop.permute.xlu1 %1556 }
 0x693   :  { %v1574_v3 = vmul.f32 %v1557_v41, %v1474_v46  ;;  %v1286_v41 = vadd.f32 %v5177_v18, %v4726_v27 }
 0x695   :  { %v1850_v39 = vpack.c.bf16 %v1574_v3, %v1573_v45  ;;  %v5178_v45 = vld [vmem:[#allocation42_spill] sm:$0xff]  ;;  %v1462_v38 = vmax.f32 %v1286_v41, 0.0 }
 0x697   :  { %v1633_v34 = vpop.permute.xlu1 %1632 }
 0x698   :  { %v1653_v56 = vmul.f32 %v1633_v34, %v1470_v1 }
 0x69a   :  { %v1851_v2 = vpack.c.bf16 %v1654_v9, %v1653_v56  ;;  %v5179_v56 = vld [vmem:[#allocation39_spill] sm:$0xff] }
 0x69b   :  { %v1284_v40 = vadd.f32 %v5179_v56, %v4746_v29 }
 0x69c   :  { %v1693_v11 = vpop.permute.xlu1 %1692  ;;  %2424 = vmatprep.mubr.bf16.mxu1 %v1851_v2  ;;  %v5182_v2 = vld [vmem:[#allocation46_spill] sm:$0xff] }
 0x69d   :  { %v1728_v55 = vmul.f32 %v1693_v11, %v1446_v58  ;;  %2425 = vmatmul.mubr.bf16.gmra.mrb[76].mxu1 %v1850_v39  ;;  %v1461_v26 = vmax.f32 %v1284_v40, 0.0  ;;  %v1300_v11 = vadd.f32 %v5182_v2, %v4726_v27 }
 0x69e   :  { %3167 = vmatprep.mubr.bf16.mxu1 %v4805_v36  ;;  %v1290_v36 = vadd.f32 %v5178_v45, %v4726_v27 }
 0x69f   :  { %v1837_v30 = vpack.c.bf16 %v1728_v55, %v1727_v51 }
 0x6a0   :  { %v1467_v52 = vmax.f32 %v1290_v36, 0.0 }
 0x6a1   :  { %v1781_v7 = vpop.permute.xlu1 %1780  ;;  %2498 = vmatmul.mubr.bf16.gmra.mrb[80].mxu0 %v1837_v30  ;;  %v5184_v30 = vld [vmem:[#allocation45_spill] sm:$0xff] }
 0x6a2   :  { %v1810_v46 = vmul.f32 %v1781_v7, %v1457_v37  ;;  %v1812_v34 = vmul.f32 %v1789_v44, %v1467_v52  ;;  %v1298_v7 = vadd.f32 %v5184_v30, %v4746_v29 }
 0x6a4   :  { %v1843_v3 = vpack.c.bf16 %v1810_v46, %v1809_v63 }
 0x6a5   :  { %3168 = vmatmul.mubr.bf16.vlgmr.msra.gmra.mrb[80].mxu1 %v4803_v31 }
 0x6a6   :  { %v1701_v1 = vpop.permute.xlu1 %1700  ;;  %2505 = vmatprep.mubr.bf16.mxu0 %v1843_v3  ;;  %3171 = vmatprep.mubr.bf16.mxu1 %v4825_v43  ;;  %v5180_v43 = vld [vmem:[#allocation41_spill] sm:$0xff] }
 0x6a7   :  { %v1730_v13 = vmul.f32 %v1701_v1, %v1456_v42  ;;  %v1288_v58 = vadd.f32 %v5180_v43, %v4746_v29  ;;  %v1713_v42 = vpop.permute.xlu0 %1712 }
 0x6a9   :  { %v1842_v0 = vpack.c.bf16 %v1730_v13, %v1729_v19  ;;  %v1466_v51 = vmax.f32 %v1288_v58, 0.0 }
 0x6ab   :  { %v1785_v39 = vpop.permute.xlu1 %1784  ;;  %2506 = vmatmul.mubr.bf16.gmra.mrb[84].mxu0 %v1842_v0 }
 0x6ac   :  { %v1811_v9 = vmul.f32 %v1785_v39, %v1462_v38 }
 0x6ad   :  { %3172 = vmatmul.mubr.bf16.gmra.mrb[84].mxu1 %v4822_v23  ;;  %v1472_v23 = vmax.f32 %v1296_v20, 0.0 }
 0x6ae   :  { %v1848_v31 = vpack.c.bf16 %v1812_v34, %v1811_v9  ;;  %3175 = vmatprep.mubr.bf16.mxu1 %v4844_v47  ;;  %v1477_v47 = vmax.f32 %v1300_v11, 0.0 }
 0x6af   :  { %v1813_v27 = vmul.f32 %v1793_v6, %v1472_v23 }
 0x6b0   :  { %v1705_v15 = vpop.permute.xlu1 %1704  ;;  %2513 = vmatprep.mubr.bf16.mxu0 %v1848_v31 }
 0x6b1   :  { %v1731_v59 = vmul.f32 %v1705_v15, %v1461_v26 }
 0x6b4   :  { %v1709_v55 = vpop.permute.xlu1 %1708 }
 0x6b5   :  { %v1732_v37 = vmul.f32 %v1709_v55, %v1466_v51  ;;  %3176 = vmatmul.mubr.bf16.gmra.mrb[88].mxu1 %v4842_v33  ;;  %v1476_v33 = vmax.f32 %v1298_v7, 0.0 }
 0x6b6   :  { %3179 = vmatprep.mubr.bf16.mxu1 %v4861_v24  ;;  %v1733_v24 = vmul.f32 %v1713_v42, %v1471_v14 }
 0x6b7   :  { %v1847_v12 = vpack.c.bf16 %v1732_v37, %v1731_v59 }
 0x6b9   :  { %v1797_v63 = vpop.permute.xlu1 %1796  ;;  %2514 = vmatmul.mubr.bf16.gmra.mrb[88].mxu0 %v1847_v12 }
 0x6ba   :  { %v1814_v46 = vmul.f32 %v1797_v63, %v1477_v47 }
 0x6bc   :  { %v1853_v8 = vpack.c.bf16 %v1814_v46, %v1813_v27 }
 0x6bd   :  { %3180 = vmatmul.mubr.bf16.gmra.mrb[92].mxu1 %v4859_v61 }
 0x6be   :  { %v1717_v18 = vpop.permute.xlu1 %1716  ;;  %2521 = vmatprep.mubr.bf16.mxu0 %v1853_v8 }
 0x6bf   :  { %v1734_v41 = vmul.f32 %v1717_v18, %v1476_v33 }
 0x6c1   :  { %v1852_v45 = vpack.c.bf16 %v1734_v41, %v1733_v24 }
 0x6c3   :  { %2522 = vmatmul.mubr.bf16.gmra.mrb[92].mxu0 %v1852_v45 }
 0x6d5   :  { %v2879_v36 = vpop.f32.mrb[48].mxu1 }
 0x6d6   :  { %v2880_v3 = vpop.f32.mrb[49].mxu1 }
 0x6d7   :  { %v2881_v1 = vadd.f32 %v2880_v3, %v2879_v36  ;;  %v2882_v29 = vpop.f32.mrb[50].mxu1 }
 0x6d8   :  { %v2883_v19 = vpop.f32.mrb[51].mxu1 }
 0x6d9   :  { %v2371_v13 = vadd.f32 %v2881_v1, %v4872_v17  ;;  %v2884_v38 = vadd.f32 %v2883_v19, %v2882_v29 }
 0x6da   :  { %v2943_v52 = vpop.f32.mrb[64].mxu0 }
 0x6db   :  { %v2374_v44 = vadd.f32 %v4870_v22, %v2884_v38  ;;  %v2944_v0 = vpop.f32.mrb[65].mxu0 }
 0x6dc   :  { %v2945_v39 = vadd.f32 %v2944_v0, %v2943_v52  ;;  %v2946_v61 = vpop.f32.mrb[66].mxu0 }
 0x6dd   :  { %v2947_v34 = vpop.f32.mrb[67].mxu0 }
 0x6de   :  { %v2948_v9 = vadd.f32 %v2947_v34, %v2946_v61  ;;  %v4991_v56 = vadd.f32 %v2945_v39, %v2371_v13 }
 0x6e0   :  { %v4993_v40 = vadd.f32 %v2948_v9, %v2374_v44 }
 0x6f3   :  { %v2885_v31 = vpop.f32.mrb[52].mxu1 }
 0x6f4   :  { %v2886_v43 = vpop.f32.mrb[53].mxu1 }
 0x6f5   :  { %v2887_v58 = vadd.f32 %v2886_v43, %v2885_v31  ;;  %v2888_v15 = vpop.f32.mrb[54].mxu1 }
 0x6f6   :  { %v2889_v26 = vpop.f32.mrb[55].mxu1 }
 0x6f7   :  { %v2379_v17 = vadd.f32 %v2887_v58, %v4880_v54  ;;  %v2890_v49 = vadd.f32 %v2889_v26, %v2888_v15 }
 0x6f9   :  { %v2382_v20 = vadd.f32 %v4878_v4, %v2890_v49 }
 0x6fd   :  { %v2949_v22 = vpop.f32.mrb[68].mxu0 }
 0x6fe   :  { %v2950_v2 = vpop.f32.mrb[69].mxu0 }
 0x6ff   :  { %v2951_v11 = vadd.f32 %v2950_v2, %v2949_v22  ;;  %v2952_v51 = vpop.f32.mrb[70].mxu0 }
 0x700   :  { %v2953_v55 = vpop.f32.mrb[71].mxu0 }
 0x701   :  { %v2954_v59 = vadd.f32 %v2953_v55, %v2952_v51  ;;  %v4997_v37 = vadd.f32 %v2951_v11, %v2379_v17 }
 0x703   :  { %v4999_v23 = vadd.f32 %v2954_v59, %v2382_v20 }
 0x711   :  { %v2891_v47 = vpop.f32.mrb[56].mxu1 }
 0x712   :  { %v2892_v6 = vpop.f32.mrb[57].mxu1 }
 0x713   :  { %v2893_v28 = vadd.f32 %v2892_v6, %v2891_v47  ;;  %v2894_v5 = vpop.f32.mrb[58].mxu1 }
 0x714   :  { %v2895_v12 = vpop.f32.mrb[59].mxu1 }
 0x715   :  { %v2387_v54 = vadd.f32 %v2893_v28, %v4888_v48  ;;  %v2896_v30 = vadd.f32 %v2895_v12, %v2894_v5 }
 0x717   :  { %v2390_v4 = vadd.f32 %v4882_v25, %v2896_v30  ;;  %v2955_v7 = vpop.f32.mrb[72].mxu0 }
 0x718   :  { %v2956_v63 = vpop.f32.mrb[73].mxu0 }
 0x719   :  { %v2957_v27 = vadd.f32 %v2956_v63, %v2955_v7  ;;  %v2958_v46 = vpop.f32.mrb[74].mxu0 }
 0x71a   :  { %v2959_v14 = vpop.f32.mrb[75].mxu0 }
 0x71b   :  { %v2960_v42 = vadd.f32 %v2959_v14, %v2958_v46  ;;  %v5003_v8 = vadd.f32 %v2957_v27, %v2387_v54 }
 0x71d   :  { %v5005_v33 = vadd.f32 %v2960_v42, %v2390_v4 }
 0x71e   :  { %3634 = shalt.err (!%p3631_p2)
}
 0x71f   :  { %s3635_s16 = scalar_lea.hbm %s5101_s9, 2048 }
 0x720   :  { %p3636_p3 = scmp.ne.s32.totalorder %s5101_s9, %s3635_s16  ;;  %p3639_p4 = scmp.lt.u32.totalorder %s3635_s16, %s5101_s9 }
 0x722   :  { %p3641_p5 = pnand %p3639_p4, %p3636_p3 }
 0x724   :  { %3644 = shalt.err (!%p3641_p5)
}
 0x725   :  { %2689 = dma.vmem_to_hbm [thread:$0]  %s2684_s1, 2048, %s5101_s9, [#allocation13], %s3679_s21, %s3679_s21, %s3680_s22  }
 0x726   :  { %v5047_v42 = vld [vmem:[%s5099_s7] ss:$0 sm:$0xff]  ;;  %s3693_s7 = smov [#allocation11]  }
 0x727   :  { %s2671_s26 = sshll.u32 %s3693_s7, 4  ;;  %s2672_s26 = int_to_ptr.vmem [resolvable:$true] %s2671_s26 }
 0x728   :  { %s3645_s27 = scalar_lea.vmem %s2672_s26, 2048  ;;  %p3650_p7 = scmp.lt.s32.totalorder %s2672_s26, %s2672_s26 }
 0x729   :  { %p3646_p6 = scmp.ne.s32.totalorder %s2672_s26, %s3645_s27  ;;  %p3651_p8 = scmp.lt.s32.totalorder %s3645_s27, %s3645_s27 }
 0x72b   :  { %v2897_v25 = vpop.f32.mrb[60].mxu1  ;;  %p3652_p9 = por %p3651_p8, %p3650_p7 }
 0x72c   :  { %v2898_v48 = vpop.f32.mrb[61].mxu1 }
 0x72d   :  { %v2899_v18 = vadd.f32 %v2898_v48, %v2897_v25  ;;  %v2900_v24 = vpop.f32.mrb[62].mxu1  ;;  %p3653_p10 = pnand %p3652_p9, %p3646_p6 }
 0x72e   :  { %v2901_v41 = vpop.f32.mrb[63].mxu1 }
 0x72f   :  { %v2395_v45 = vadd.f32 %v2899_v18, %v4892_v21  ;;  %v2902_v36 = vadd.f32 %v2901_v41, %v2900_v24  ;;  %v2961_v3 = vpop.f32.mrb[76].mxu0 }
 0x730   :  { %v2962_v1 = vpop.f32.mrb[77].mxu0 }
 0x731   :  { %v2398_v29 = vadd.f32 %v4890_v16, %v2902_v36  ;;  %v2963_v19 = vadd.f32 %v2962_v1, %v2961_v3  ;;  %v2964_v13 = vpop.f32.mrb[78].mxu0 }
 0x732   :  { %v2965_v38 = vpop.f32.mrb[79].mxu0 }
 0x733   :  { %v2966_v52 = vadd.f32 %v2965_v38, %v2964_v13  ;;  %v5024_v44 = vadd.f32 %v2963_v19, %v2395_v45 }
 0x735   :  { %v5026_v0 = vadd.f32 %v2966_v52, %v2398_v29 }
 0x73f   :  { %v2903_v39 = vpop.f32.mrb[64].mxu1 }
 0x740   :  { %v2904_v61 = vpop.f32.mrb[65].mxu1 }
 0x741   :  { %v2905_v34 = vadd.f32 %v2904_v61, %v2903_v39  ;;  %v2906_v9 = vpop.f32.mrb[66].mxu1 }
 0x742   :  { %v2907_v31 = vpop.f32.mrb[67].mxu1 }
 0x743   :  { %v2403_v21 = vadd.f32 %v2905_v34, %v4900_v60  ;;  %v2908_v43 = vadd.f32 %v2907_v31, %v2906_v9 }
 0x745   :  { %v2406_v58 = vadd.f32 %v4898_v50, %v2908_v43 }
 0x752   :  { %v2909_v15 = vpop.f32.mrb[68].mxu1 }
 0x753   :  { %v2910_v16 = vpop.f32.mrb[69].mxu1 }
 0x754   :  { %v2911_v26 = vadd.f32 %v2910_v16, %v2909_v15  ;;  %v2912_v17 = vpop.f32.mrb[70].mxu1 }
 0x755   :  { %v2913_v49 = vpop.f32.mrb[71].mxu1 }
 0x756   :  { %v2411_v20 = vadd.f32 %v2911_v26, %v4904_v10  ;;  %v2914_v22 = vadd.f32 %v2913_v49, %v2912_v17 }
 0x758   :  { %v2414_v2 = vadd.f32 %v4902_v32, %v2914_v22 }
 0x760   :  { %v2915_v11 = vpop.f32.mrb[72].mxu1 }
 0x761   :  { %v2916_v51 = vpop.f32.mrb[73].mxu1 }
 0x762   :  { %v2917_v55 = vadd.f32 %v2916_v51, %v2915_v11  ;;  %v2918_v59 = vpop.f32.mrb[74].mxu1 }
 0x763   :  { %v2919_v47 = vpop.f32.mrb[75].mxu1 }
 0x764   :  { %v5033_v60 = vadd.f32 %v2917_v55, %v4912_v53  ;;  %v2920_v6 = vadd.f32 %v2919_v47, %v2918_v59 }
 0x766   :  { %v5036_v50 = vadd.f32 %v4910_v62, %v2920_v6 }
 0x770   :  { %v2921_v28 = vpop.f32.mrb[76].mxu1 }
 0x771   :  { %v2922_v5 = vpop.f32.mrb[77].mxu1 }
 0x772   :  { %v2923_v12 = vadd.f32 %v2922_v5, %v2921_v28  ;;  %v2924_v54 = vpop.f32.mrb[78].mxu1 }
 0x773   :  { %v2925_v10 = vpop.f32.mrb[79].mxu1 }
 0x774   :  { %v5039_v30 = vadd.f32 %v2923_v12, %v4920_v35  ;;  %v2926_v32 = vadd.f32 %v2925_v10, %v2924_v54  ;;  %v2967_v4 = vpop.f32.mrb[80].mxu0 }
 0x775   :  { %v2968_v7 = vpop.f32.mrb[81].mxu0 }
 0x776   :  { %v5042_v63 = vadd.f32 %v4918_v57, %v2926_v32  ;;  %v2969_v53 = vadd.f32 %v2968_v7, %v2967_v4  ;;  %v2970_v27 = vpop.f32.mrb[82].mxu0 }
 0x777   :  { %v2971_v46 = vpop.f32.mrb[83].mxu0 }
 0x778   :  { %v2972_v14 = vadd.f32 %v2971_v46, %v2970_v27  ;;  %v3169_v62 = vpop.f32.mrb[80].mxu1  ;;  %v2500_v25 = vadd.f32 %v2969_v53, %v2403_v21 }
 0x779   :  { %v2573_v35 = vadd.f32 %v3169_v62, %v4997_v37  ;;  %v2564_v48 = vpop.f32.mrb[81].mxu1 }
 0x77a   :  { %v2565_v18 = vadd.f32 %v2564_v48, %v4991_v56  ;;  %v3170_v24 = vpop.f32.mrb[82].mxu1  ;;  %v2503_v41 = vadd.f32 %v2972_v14, %v2406_v58 }
 0x77b   :  { %v2636_v57 = vadd.f32 %v5047_v42, %v2573_v35  ;;  %v2576_v45 = vadd.f32 %v3170_v24, %v4999_v23  ;;  %v2567_v36 = vpop.f32.mrb[83].mxu1 }
 0x77c   :  { %v2634_v3 = vadd.f32 %v5047_v42, %v2565_v18  ;;  %v2568_v1 = vadd.f32 %v2567_v36, %v4993_v40 }
 0x77d   :  { %2652 = vst [vmem:[#allocation11 + $0x10] sm:$0xff] %v2636_v57  ;;  %v2637_v29 = vadd.f32 %v5047_v42, %v2576_v45 }
 0x77e   :  { %2650 = vst [vmem:[#allocation11] sm:$0xff] %v2634_v3  ;;  %v2635_v37 = vadd.f32 %v5047_v42, %v2568_v1  ;;  %v2973_v19 = vpop.f32.mrb[84].mxu0 }
 0x77f   :  { %2653 = vst [vmem:[#allocation11 + $0x18] sm:$0xff] %v2637_v29  ;;  %v2974_v56 = vpop.f32.mrb[85].mxu0 }
 0x780   :  { %2651 = vst [vmem:[#allocation11 + $0x8] sm:$0xff] %v2635_v37  ;;  %v2975_v13 = vadd.f32 %v2974_v56, %v2973_v19  ;;  %v2976_v38 = vpop.f32.mrb[86].mxu0  ;;  %v3173_v52 = vpop.f32.mrb[84].mxu1 }
 0x781   :  { %v2589_v23 = vadd.f32 %v3173_v52, %v5024_v44  ;;  %v2977_v39 = vpop.f32.mrb[87].mxu0  ;;  %v2580_v61 = vpop.f32.mrb[85].mxu1 }
 0x782   :  { %v2978_v34 = vadd.f32 %v2977_v39, %v2976_v38  ;;  %v2581_v40 = vadd.f32 %v2580_v61, %v5003_v8  ;;  %v3174_v9 = vpop.f32.mrb[86].mxu1  ;;  %v2508_v31 = vadd.f32 %v2975_v13, %v2411_v20 }
 0x783   :  { %v2640_v21 = vadd.f32 %v5047_v42, %v2589_v23  ;;  %v2592_v43 = vadd.f32 %v3174_v9, %v5026_v0  ;;  %v2583_v58 = vpop.f32.mrb[87].mxu1 }
 0x784   :  { %v2638_v15 = vadd.f32 %v5047_v42, %v2581_v40  ;;  %v2584_v16 = vadd.f32 %v2583_v58, %v5005_v33  ;;  %v2511_v26 = vadd.f32 %v2978_v34, %v2414_v2 }
 0x785   :  { %2656 = vst [vmem:[#allocation11 + $0x30] sm:$0xff] %v2640_v21  ;;  %v2641_v44 = vadd.f32 %v5047_v42, %v2592_v43 }
 0x786   :  { %2654 = vst [vmem:[#allocation11 + $0x20] sm:$0xff] %v2638_v15  ;;  %v2639_v17 = vadd.f32 %v5047_v42, %v2584_v16 }
 0x787   :  { %2657 = vst [vmem:[#allocation11 + $0x38] sm:$0xff] %v2641_v44 }
 0x788   :  { %2655 = vst [vmem:[#allocation11 + $0x28] sm:$0xff] %v2639_v17  ;;  %v3177_v8 = vpop.f32.mrb[88].mxu1 }
 0x789   :  { %v2605_v49 = vadd.f32 %v3177_v8, %v2508_v31  ;;  %v2596_v20 = vpop.f32.mrb[89].mxu1 }
 0x78a   :  { %v2597_v22 = vadd.f32 %v2596_v20, %v2500_v25  ;;  %v3178_v11 = vpop.f32.mrb[90].mxu1 }
 0x78b   :  { %v2644_v0 = vadd.f32 %v5047_v42, %v2605_v49  ;;  %v2608_v51 = vadd.f32 %v3178_v11, %v2511_v26  ;;  %v2599_v55 = vpop.f32.mrb[91].mxu1 }
 0x78c   :  { %v2642_v33 = vadd.f32 %v5047_v42, %v2597_v22  ;;  %v2600_v2 = vadd.f32 %v2599_v55, %v2503_v41  ;;  %v2979_v59 = vpop.f32.mrb[88].mxu0 }
 0x78d   :  { %2660 = vst [vmem:[#allocation11 + $0x50] sm:$0xff] %v2644_v0  ;;  %v2645_v47 = vadd.f32 %v5047_v42, %v2608_v51  ;;  %v2980_v6 = vpop.f32.mrb[89].mxu0 }
 0x78e   :  { %2658 = vst [vmem:[#allocation11 + $0x40] sm:$0xff] %v2642_v33  ;;  %v2643_v28 = vadd.f32 %v5047_v42, %v2600_v2  ;;  %v2981_v5 = vadd.f32 %v2980_v6, %v2979_v59  ;;  %v2982_v12 = vpop.f32.mrb[90].mxu0 }
 0x78f   :  { %2661 = vst [vmem:[#allocation11 + $0x58] sm:$0xff] %v2645_v47  ;;  %v2983_v54 = vpop.f32.mrb[91].mxu0 }
 0x790   :  { %2659 = vst [vmem:[#allocation11 + $0x48] sm:$0xff] %v2643_v28  ;;  %v2984_v10 = vadd.f32 %v2983_v54, %v2982_v12  ;;  %v3181_v32 = vpop.f32.mrb[92].mxu1  ;;  %v2516_v4 = vadd.f32 %v2981_v5, %v5033_v60 }
 0x791   :  { %v2612_v7 = vpop.f32.mrb[93].mxu1 }
 0x792   :  { %v2613_v53 = vadd.f32 %v2612_v7, %v2516_v4  ;;  %v3182_v27 = vpop.f32.mrb[94].mxu1  ;;  %v2519_v46 = vadd.f32 %v2984_v10, %v5036_v50 }
 0x793   :  { %v2615_v14 = vpop.f32.mrb[95].mxu1 }
 0x794   :  { %v2646_v62 = vadd.f32 %v5047_v42, %v2613_v53  ;;  %v2616_v25 = vadd.f32 %v2615_v14, %v2519_v46 }
 0x796   :  { %2662 = vst [vmem:[#allocation11 + $0x60] sm:$0xff] %v2646_v62  ;;  %v2647_v35 = vadd.f32 %v5047_v42, %v2616_v25  ;;  %v2985_v48 = vpop.f32.mrb[92].mxu0 }
 0x797   :  { %v2986_v18 = vpop.f32.mrb[93].mxu0 }
 0x798   :  { %2663 = vst [vmem:[#allocation11 + $0x68] sm:$0xff] %v2647_v35  ;;  %v2987_v24 = vadd.f32 %v2986_v18, %v2985_v48  ;;  %v2988_v41 = vpop.f32.mrb[94].mxu0 }
 0x799   :  { %v2989_v57 = vpop.f32.mrb[95].mxu0 }
 0x79a   :  { %v2524_v60 = vadd.f32 %v2987_v24, %v5039_v30  ;;  %v2990_v45 = vadd.f32 %v2989_v57, %v2988_v41 }
 0x79c   :  { %v2621_v36 = vadd.f32 %v3181_v32, %v2524_v60  ;;  %v2527_v3 = vadd.f32 %v2990_v45, %v5042_v63 }
 0x79e   :  { %v2648_v50 = vadd.f32 %v5047_v42, %v2621_v36  ;;  %v2624_v1 = vadd.f32 %v3182_v27, %v2527_v3 }
 0x7a0   :  { %2664 = vst [vmem:[#allocation11 + $0x70] sm:$0xff] %v2648_v50  ;;  %v2649_v29 = vadd.f32 %v5047_v42, %v2624_v1 }
 0x7a2   :  { %2665 = vst [vmem:[#allocation11 + $0x78] sm:$0xff] %v2649_v29 }
 0x7a3   :  { %3656 = shalt.err (!%p3653_p10)
}
 0x7a4   :  { %s3657_s12 = scalar_lea.hbm %s5100_s8, 2048 }
 0x7a5   :  { %p3658_p11 = scmp.ne.s32.totalorder %s5100_s8, %s3657_s12  ;;  %p3661_p12 = scmp.lt.u32.totalorder %s3657_s12, %s5100_s8 }
 0x7a7   :  { %p3663_p13 = pnand %p3661_p12, %p3658_p11 }
 0x7a9   :  { %3666 = shalt.err (!%p3663_p13)
}
 0x7aa   :  { %2677 = dma.vmem_to_hbm [thread:$0]  %s2672_s26, 2048, %s5100_s8, [#allocation4], %s3679_s21, %s3679_s21, %s3680_s22  }
 0x7ab   :  { %3673 = dma.done.wait [#allocation4], 2048  }
 0x7ac   :  { %3674 = vsyncadd [#allocation4], 4294965248 }
 0x7ad   :  { %3675 = dma.done.wait [#allocation13], 2048  }
 0x7ae   :  { %3676 = vsyncadd [#allocation13], 4294965248 }
 0x7af   :  { %2696 = vsyncpa [#allocation3], 1 }
 0x7b0   :  { %2697 = vsyncpa [#allocation6], 1 }
 0x7b1   :  { %2698 = vsyncpa [#allocation9], 1 }
 0x7b2   :  { %2699 = vsyncpa [#allocation4], 1 }
 0x7b3   :  { %2700 = vsyncpa [#allocation13], 1 }

</bundles_post_ra>
